<compile_context>
chip_gen: v5e
topology: v5e:2x2
jax: 0.10.0
libtpu: 0.0.40
codegen_flags: <defaults>
</compile_context>

<pallas_src>
import functools

import jax
import jax.numpy as jnp
from jax import lax
from jax.experimental import pallas as pl
from jax.experimental.pallas import tpu as pltpu


def _round_up(n, m):
    return ((n + m - 1) // m) * m


_VMEM_SPEC = pl.BlockSpec(memory_space=pltpu.MemorySpace.VMEM)


# ---------------------------------------------------------------------------
# Fused kernel: all GRU layers + final FC.
#   refs layout (positional):
#     inputs : x_ref (T*Bp, Dp) f32,
#              per layer l: w_ih (bf16), b_fold (f32, 1x3Hp),
#                           w_hh (bf16, Hp x 3Hp), b_hhn (f32, 1xHp),
#              fc_w (bf16, Hp x Cp), fc_b (f32, 1 x Cp)
#     output : out_ref (Bp, Cp) f32
#     scratch: 1 or 2 gi buffers (T*Bp, 3*Hp) f32 (ping-pong between layers)
# ---------------------------------------------------------------------------
def fused_gru_fc_kernel(T, Bp, Hp, L, *refs):
    n_in = 1 + 4 * L + 2
    x_ref = refs[0]
    layer_refs = [refs[1 + 4 * l:1 + 4 * (l + 1)] for l in range(L)]
    fc_w_ref = refs[1 + 4 * L]
    fc_b_ref = refs[2 + 4 * L]
    out_ref = refs[n_in]
    gi_bufs = list(refs[n_in + 1:])

    # Hoisted layer-0 input projection: one big MXU matmul for all timesteps.
    x_bf = x_ref[...].astype(jnp.bfloat16)
    gi_bufs[0][...] = (jnp.dot(x_bf, layer_refs[0][0][...],
                               preferred_element_type=jnp.float32)
                       + layer_refs[0][1][...])

    h_final = None
    for l in range(L):
        gi_cur = gi_bufs[l % len(gi_bufs)]
        w_hh = layer_refs[l][2][...]                               # bf16
        bhn = jnp.broadcast_to(layer_refs[l][3][...], (Bp, Hp))    # hoisted

        if l + 1 < L:
            gi_next = gi_bufs[(l + 1) % len(gi_bufs)]
            w_ih_next = layer_refs[l + 1][0][...]                  # bf16
            b_next = jnp.broadcast_to(layer_refs[l + 1][1][...], (Bp, 3 * Hp))

            def store(row, h_new, gi_next=gi_next, w=w_ih_next, b=b_next):
                # Next layer's input projection for this timestep; off the
                # current layer's serial critical path (MXU slot otherwise idle).
                gi_next[pl.ds(row, Bp), :] = (
                    jnp.dot(h_new.astype(jnp.bfloat16), w,
                            preferred_element_type=jnp.float32) + b)
        else:
            def store(row, h_new):
                pass

        def step(t, h, gi_cur=gi_cur, w_hh=w_hh, bhn=bhn, store=store):
            row = pl.multiple_of(t * Bp, Bp)
            gi_t = gi_cur[pl.ds(row, Bp), :]                       # (Bp, 3Hp)
            # Single fused hidden-side matmul per step (all three gates).
            gh = jnp.dot(h.astype(jnp.bfloat16), w_hh,
                         preferred_element_type=jnp.float32)
            # One sigmoid over the contiguous r|z slice, then lane-aligned split.
            rz = jax.nn.sigmoid(gi_t[:, :2 * Hp] + gh[:, :2 * Hp])
            r = rz[:, :Hp]
            z = rz[:, Hp:]
            n = jnp.tanh(gi_t[:, 2 * Hp:] + r * (gh[:, 2 * Hp:] + bhn))
            h_new = n + z * (h - n)                                # (1-z)*n + z*h
            store(row, h_new)
            return h_new

        h0 = jnp.zeros((Bp, Hp), jnp.float32)
        h_final = lax.fori_loop(0, T, step, h0, unroll=min(T, 8))

    # Fused final Linear on the last layer's final hidden state.
    out_ref[...] = (jnp.dot(h_final.astype(jnp.bfloat16), fc_w_ref[...],
                            preferred_element_type=jnp.float32)
                    + fc_b_ref[...])


# ---------------------------------------------------------------------------
# Model wrapper: transpose to time-major, pad batch/features, single launch.
# ---------------------------------------------------------------------------
def gru_model(x_btd, layers, fc_w_p, fc_b_p, num_classes):
    B, T, D = x_btd.shape
    Bp = _round_up(B, 8)
    Dp = layers[0][0].shape[0]          # padded layer-0 input dim
    Hp = layers[0][2].shape[0]          # padded hidden dim
    Cp = fc_w_p.shape[-1]
    L = len(layers)

    x = jnp.transpose(x_btd, (1, 0, 2))                 # (T, B, D)
    x = jnp.pad(x, ((0, 0), (0, Bp - B), (0, Dp - D)))  # (T, Bp, Dp)
    x = x.reshape(T * Bp, Dp)                           # flat time-major slab

    flat_in = [x]
    for p in layers:
        flat_in.extend(p)
    flat_in.extend([fc_w_p, fc_b_p])

    n_gi = 1 if L == 1 else 2

    # VMEM budget: inputs + output + gi scratch, with headroom.
    resident = (sum(a.size * a.dtype.itemsize for a in flat_in)
                + Bp * Cp * 4 + n_gi * T * Bp * 3 * Hp * 4)
    vmem_limit = int(2 * resident + (8 << 20))

    out = pl.pallas_call(
        functools.partial(fused_gru_fc_kernel, T, Bp, Hp, L),
        out_shape=jax.ShapeDtypeStruct((Bp, Cp), jnp.float32),
        in_specs=[_VMEM_SPEC] * len(flat_in),
        out_specs=_VMEM_SPEC,
        scratch_shapes=[pltpu.VMEM((T * Bp, 3 * Hp), jnp.float32)] * n_gi,
        compiler_params=pltpu.CompilerParams(vmem_limit_bytes=vmem_limit),
    )(*flat_in)
    return out[:B, :num_classes]


# ---------------------------------------------------------------------------
# Parameter construction (PyTorch-style uniform init), packed + padded.
# Weight matrices are pre-packed as bf16 (MXU-native); biases stay f32.
# ---------------------------------------------------------------------------
def init_params(key, input_size, hidden_size, num_layers, num_classes):
    H = hidden_size
    Hp = _round_up(H, 128)
    Cp = _round_up(num_classes, 128)
    k = 1.0 / jnp.sqrt(hidden_size)

    layers, raw = [], []
    for layer in range(num_layers):
        d_in = input_size if layer == 0 else hidden_size
        d_in_p = _round_up(d_in, 128) if layer == 0 else Hp
        key, k1, k2, k3, k4 = jax.random.split(key, 5)
        w_ih = jax.random.uniform(k1, (3, d_in, H), jnp.float32, -k, k)
        w_hh = jax.random.uniform(k2, (3, H, H), jnp.float32, -k, k)
        b_ih = jax.random.uniform(k3, (3, H), jnp.float32, -k, k)
        b_hh = jax.random.uniform(k4, (3, H), jnp.float32, -k, k)
        raw.append((w_ih, w_hh, b_ih, b_hh))

        W_ih = jnp.zeros((d_in_p, 3 * Hp), jnp.float32)
        W_hh = jnp.zeros((Hp, 3 * Hp), jnp.float32)
        b_fold = jnp.zeros((1, 3 * Hp), jnp.float32)
        for g in range(3):
            W_ih = W_ih.at[:d_in, g * Hp:g * Hp + H].set(w_ih[g])
            W_hh = W_hh.at[:H, g * Hp:g * Hp + H].set(w_hh[g])
            bf = b_ih[g] + (b_hh[g] if g < 2 else 0.0)   # fold b_hh for r,z
            b_fold = b_fold.at[0, g * Hp:g * Hp + H].set(bf)
        b_hhn = jnp.zeros((1, Hp), jnp.float32).at[0, :H].set(b_hh[2])
        layers.append((W_ih.astype(jnp.bfloat16), b_fold,
                       W_hh.astype(jnp.bfloat16), b_hhn))

    key, k5, k6 = jax.random.split(key, 3)
    fc_w = jax.random.uniform(k5, (H, num_classes), jnp.float32, -k, k)
    fc_b = jax.random.uniform(k6, (num_classes,), jnp.float32, -k, k)
    fc_w_p = jnp.zeros((Hp, Cp), jnp.float32).at[:H, :num_classes].set(fc_w)
    fc_b_p = jnp.zeros((1, Cp), jnp.float32).at[0, :num_classes].set(fc_b)
    return layers, fc_w_p.astype(jnp.bfloat16), fc_b_p, raw, (fc_w, fc_b)


# Pure-JAX reference (matches torch.nn.GRU batch_first semantics), f32 weights.
def gru_reference(x_btd, raw, fc):
    hp = lax.Precision.HIGHEST
    B, T, _ = x_btd.shape
    out = x_btd
    for (w_ih, w_hh, b_ih, b_hh) in raw:
        H = w_hh.shape[-1]
        h = jnp.zeros((B, H), jnp.float32)
        ys = []
        for t in range(T):
            x_t = out[:, t, :]
            gi = lambda g: jnp.dot(x_t, w_ih[g], precision=hp) + b_ih[g]
            gh = lambda g: jnp.dot(h, w_hh[g], precision=hp) + b_hh[g]
            r = jax.nn.sigmoid(gi(0) + gh(0))
            z = jax.nn.sigmoid(gi(1) + gh(1))
            n = jnp.tanh(gi(2) + r * gh(2))
            h = (1.0 - z) * n + z * h
            ys.append(h)
        out = jnp.stack(ys, axis=1)
    fc_w, fc_b = fc
    return jnp.dot(out[:, -1, :], fc_w, precision=hp) + fc_b


if __name__ == "__main__":
    B, T, INPUT, HIDDEN, LAYERS, CLASSES = 2, 8, 16, 32, 2, 10

    key = jax.random.PRNGKey(0)
    key, kx = jax.random.split(key)
    x = jax.random.normal(kx, (B, T, INPUT), jnp.float32)

    layers, fc_w_p, fc_b_p, raw, fc = init_params(key, INPUT, HIDDEN,
                                                  LAYERS, CLASSES)

    out = gru_model(x, layers, fc_w_p, fc_b_p, CLASSES)
    jax.block_until_ready(out)
    assert out.shape == (B, CLASSES)

    ref = gru_reference(x, raw, fc)
    # Tolerance loosened slightly vs. the pure-f32 version: kernel matmuls use
    # bf16 operands (f32 accumulation), reference uses HIGHEST-precision f32.
    assert bool(jnp.allclose(out, ref, atol=3e-2, rtol=3e-2)), "mismatch vs reference"

    print("KERNEL_OK")
</pallas_src>

<mosaic_0001>
module attributes {stable_mosaic.version = 11 : i64} {
  func.func @fused_gru_fc_kernel(%arg0: memref<64x128xf32, #tpu.memory_space<vmem>>, %arg1: memref<128x384xbf16, #tpu.memory_space<vmem>>, %arg2: memref<1x384xf32, #tpu.memory_space<vmem>>, %arg3: memref<128x384xbf16, #tpu.memory_space<vmem>>, %arg4: memref<1x128xf32, #tpu.memory_space<vmem>>, %arg5: memref<128x384xbf16, #tpu.memory_space<vmem>>, %arg6: memref<1x384xf32, #tpu.memory_space<vmem>>, %arg7: memref<128x384xbf16, #tpu.memory_space<vmem>>, %arg8: memref<1x128xf32, #tpu.memory_space<vmem>>, %arg9: memref<128x128xbf16, #tpu.memory_space<vmem>>, %arg10: memref<1x128xf32, #tpu.memory_space<vmem>>, %arg11: memref<8x128xf32, #tpu.memory_space<vmem>>, %arg12: memref<64x384xf32, #tpu.memory_space<vmem>>, %arg13: memref<64x384xf32, #tpu.memory_space<vmem>>) attributes {dimension_semantics = [], scalar_prefetch = 0 : i64, scratch_operands = 2 : i64, tpu.core_type = #tpu.core_type<tc>} {
    %c0 = arith.constant 0 : index
    %c0_0 = arith.constant 0 : index
    %0 = vector.load %arg0[%c0, %c0_0] : memref<64x128xf32, #tpu.memory_space<vmem>>, vector<64x128xf32>
    %1 = arith.truncf %0 : vector<64x128xf32> to vector<64x128xbf16>
    %c0_1 = arith.constant 0 : index
    %c0_2 = arith.constant 0 : index
    %2 = vector.load %arg1[%c0_1, %c0_2] : memref<128x384xbf16, #tpu.memory_space<vmem>>, vector<128x384xbf16>
    %cst = arith.constant dense<0.000000e+00> : vector<64x384xf32>
    %3 = tpu.matmul %1, %2, %cst {dimension_numbers = #tpu.dot_dimension_numbers<[1], [0], [0], [1], [0, 0, 1, 1], [], []>} : vector<64x128xbf16>, vector<128x384xbf16>, vector<64x384xf32> -> vector<64x384xf32>
    %c0_3 = arith.constant 0 : index
    %c0_4 = arith.constant 0 : index
    %4 = vector.load %arg2[%c0_3, %c0_4] : memref<1x384xf32, #tpu.memory_space<vmem>>, vector<1x384xf32>
    %5 = vector.broadcast %4 : vector<1x384xf32> to vector<64x384xf32>
    %6 = arith.addf %3, %5 : vector<64x384xf32>
    %c0_5 = arith.constant 0 : index
    %c0_6 = arith.constant 0 : index
    %7 = vector.load %arg12[%c0_5, %c0_6] : memref<64x384xf32, #tpu.memory_space<vmem>>, vector<64x384xf32>
    tpu.vector_store %arg12[%c0_5, %c0_6], %6 {strides = array<i32>} : memref<64x384xf32, #tpu.memory_space<vmem>>, vector<64x384xf32>,
    %c0_7 = arith.constant 0 : index
    %c0_8 = arith.constant 0 : index
    %8 = vector.load %arg3[%c0_7, %c0_8] : memref<128x384xbf16, #tpu.memory_space<vmem>>, vector<128x384xbf16>
    %c0_9 = arith.constant 0 : index
    %c0_10 = arith.constant 0 : index
    %9 = vector.load %arg4[%c0_9, %c0_10] : memref<1x128xf32, #tpu.memory_space<vmem>>, vector<1x128xf32>
    %10 = vector.shape_cast %9 : vector<1x128xf32> to vector<1x128xf32>
    %11 = vector.broadcast %10 : vector<1x128xf32> to vector<8x128xf32>
    %c0_11 = arith.constant 0 : index
    %c0_12 = arith.constant 0 : index
    %12 = vector.load %arg5[%c0_11, %c0_12] : memref<128x384xbf16, #tpu.memory_space<vmem>>, vector<128x384xbf16>
    %c0_13 = arith.constant 0 : index
    %c0_14 = arith.constant 0 : index
    %13 = vector.load %arg6[%c0_13, %c0_14] : memref<1x384xf32, #tpu.memory_space<vmem>>, vector<1x384xf32>
    %14 = vector.shape_cast %13 : vector<1x384xf32> to vector<1x384xf32>
    %15 = vector.broadcast %14 : vector<1x384xf32> to vector<8x384xf32>
    %cst_15 = arith.constant 0.000000e+00 : f32
    %16 = vector.broadcast %cst_15 : f32 to vector<8x128xf32>
    %c0_i32 = arith.constant 0 : i32
    %c8_i32 = arith.constant 8 : i32
    %17 = arith.muli %c0_i32, %c8_i32 : i32
    %18 = tpu.assume_multiple %17, 8 : i32
    %19 = arith.index_cast %18 : i32 to index
    %c0_16 = arith.constant 0 : index
    %20 = vector.load %arg12[%19, %c0_16] : memref<64x384xf32, #tpu.memory_space<vmem>>, vector<8x384xf32>
    %21 = arith.truncf %16 : vector<8x128xf32> to vector<8x128xbf16>
    %cst_17 = arith.constant dense<0.000000e+00> : vector<8x384xf32>
    %22 = tpu.matmul %21, %8, %cst_17 {dimension_numbers = #tpu.dot_dimension_numbers<[1], [0], [0], [1], [0, 0, 1, 1], [], []>} : vector<8x128xbf16>, vector<128x384xbf16>, vector<8x384xf32> -> vector<8x384xf32>
    %23 = vector.extract_strided_slice %20 {offsets = [0, 0], sizes = [8, 256], strides = [1, 1]} : vector<8x384xf32> to vector<8x256xf32>
    %24 = vector.extract_strided_slice %22 {offsets = [0, 0], sizes = [8, 256], strides = [1, 1]} : vector<8x384xf32> to vector<8x256xf32>
    %25 = arith.addf %23, %24 : vector<8x256xf32>
    %26 = arith.negf %25 : vector<8x256xf32>
    %27 = math.exp %26 : vector<8x256xf32>
    %cst_18 = arith.constant 1.000000e+00 : f32
    %28 = vector.broadcast %cst_18 : f32 to vector<8x256xf32>
    %29 = arith.addf %28, %27 : vector<8x256xf32>
    %30 = arith.divf %28, %29 : vector<8x256xf32>
    %31 = vector.extract_strided_slice %30 {offsets = [0, 0], sizes = [8, 128], strides = [1, 1]} : vector<8x256xf32> to vector<8x128xf32>
    %32 = vector.extract_strided_slice %30 {offsets = [0, 128], sizes = [8, 128], strides = [1, 1]} : vector<8x256xf32> to vector<8x128xf32>
    %33 = vector.extract_strided_slice %20 {offsets = [0, 256], sizes = [8, 128], strides = [1, 1]} : vector<8x384xf32> to vector<8x128xf32>
    %34 = vector.extract_strided_slice %22 {offsets = [0, 256], sizes = [8, 128], strides = [1, 1]} : vector<8x384xf32> to vector<8x128xf32>
    %35 = arith.addf %34, %11 : vector<8x128xf32>
    %36 = arith.mulf %31, %35 : vector<8x128xf32>
    %37 = arith.addf %33, %36 : vector<8x128xf32>
    %38 = math.tanh %37 : vector<8x128xf32>
    %39 = arith.subf %16, %38 : vector<8x128xf32>
    %40 = arith.mulf %32, %39 : vector<8x128xf32>
    %41 = arith.addf %38, %40 : vector<8x128xf32>
    %42 = arith.truncf %41 : vector<8x128xf32> to vector<8x128xbf16>
    %cst_19 = arith.constant dense<0.000000e+00> : vector<8x384xf32>
    %43 = tpu.matmul %42, %12, %cst_19 {dimension_numbers = #tpu.dot_dimension_numbers<[1], [0], [0], [1], [0, 0, 1, 1], [], []>} : vector<8x128xbf16>, vector<128x384xbf16>, vector<8x384xf32> -> vector<8x384xf32>
    %44 = arith.addf %43, %15 : vector<8x384xf32>
    %45 = arith.index_cast %18 : i32 to index
    %c0_20 = arith.constant 0 : index
    %46 = vector.load %arg13[%45, %c0_20] : memref<64x384xf32, #tpu.memory_space<vmem>>, vector<8x384xf32>
    tpu.vector_store %arg13[%45, %c0_20], %44 {strides = array<i32>} : memref<64x384xf32, #tpu.memory_space<vmem>>, vector<8x384xf32>,
    %c1_i32 = arith.constant 1 : i32
    %c8_i32_21 = arith.constant 8 : i32
    %47 = arith.muli %c1_i32, %c8_i32_21 : i32
    %48 = tpu.assume_multiple %47, 8 : i32
    %49 = arith.index_cast %48 : i32 to index
    %c0_22 = arith.constant 0 : index
    %50 = vector.load %arg12[%49, %c0_22] : memref<64x384xf32, #tpu.memory_space<vmem>>, vector<8x384xf32>
    %51 = arith.truncf %41 : vector<8x128xf32> to vector<8x128xbf16>
    %cst_23 = arith.constant dense<0.000000e+00> : vector<8x384xf32>
    %52 = tpu.matmul %51, %8, %cst_23 {dimension_numbers = #tpu.dot_dimension_numbers<[1], [0], [0], [1], [0, 0, 1, 1], [], []>} : vector<8x128xbf16>, vector<128x384xbf16>, vector<8x384xf32> -> vector<8x384xf32>
    %53 = vector.extract_strided_slice %50 {offsets = [0, 0], sizes = [8, 256], strides = [1, 1]} : vector<8x384xf32> to vector<8x256xf32>
    %54 = vector.extract_strided_slice %52 {offsets = [0, 0], sizes = [8, 256], strides = [1, 1]} : vector<8x384xf32> to vector<8x256xf32>
    %55 = arith.addf %53, %54 : vector<8x256xf32>
    %56 = arith.negf %55 : vector<8x256xf32>
    %57 = math.exp %56 : vector<8x256xf32>
    %cst_24 = arith.constant 1.000000e+00 : f32
    %58 = vector.broadcast %cst_24 : f32 to vector<8x256xf32>
    %59 = arith.addf %58, %57 : vector<8x256xf32>
    %60 = arith.divf %58, %59 : vector<8x256xf32>
    %61 = vector.extract_strided_slice %60 {offsets = [0, 0], sizes = [8, 128], strides = [1, 1]} : vector<8x256xf32> to vector<8x128xf32>
    %62 = vector.extract_strided_slice %60 {offsets = [0, 128], sizes = [8, 128], strides = [1, 1]} : vector<8x256xf32> to vector<8x128xf32>
    %63 = vector.extract_strided_slice %50 {offsets = [0, 256], sizes = [8, 128], strides = [1, 1]} : vector<8x384xf32> to vector<8x128xf32>
    %64 = vector.extract_strided_slice %52 {offsets = [0, 256], sizes = [8, 128], strides = [1, 1]} : vector<8x384xf32> to vector<8x128xf32>
    %65 = arith.addf %64, %11 : vector<8x128xf32>
    %66 = arith.mulf %61, %65 : vector<8x128xf32>
    %67 = arith.addf %63, %66 : vector<8x128xf32>
    %68 = math.tanh %67 : vector<8x128xf32>
    %69 = arith.subf %41, %68 : vector<8x128xf32>
    %70 = arith.mulf %62, %69 : vector<8x128xf32>
    %71 = arith.addf %68, %70 : vector<8x128xf32>
    %72 = arith.truncf %71 : vector<8x128xf32> to vector<8x128xbf16>
    %cst_25 = arith.constant dense<0.000000e+00> : vector<8x384xf32>
    %73 = tpu.matmul %72, %12, %cst_25 {dimension_numbers = #tpu.dot_dimension_numbers<[1], [0], [0], [1], [0, 0, 1, 1], [], []>} : vector<8x128xbf16>, vector<128x384xbf16>, vector<8x384xf32> -> vector<8x384xf32>
    %74 = arith.addf %73, %15 : vector<8x384xf32>
    %75 = arith.index_cast %48 : i32 to index
    %c0_26 = arith.constant 0 : index
    %76 = vector.load %arg13[%75, %c0_26] : memref<64x384xf32, #tpu.memory_space<vmem>>, vector<8x384xf32>
    tpu.vector_store %arg13[%75, %c0_26], %74 {strides = array<i32>} : memref<64x384xf32, #tpu.memory_space<vmem>>, vector<8x384xf32>,
    %c2_i32 = arith.constant 2 : i32
    %c8_i32_27 = arith.constant 8 : i32
    %77 = arith.muli %c2_i32, %c8_i32_27 : i32
    %78 = tpu.assume_multiple %77, 8 : i32
    %79 = arith.index_cast %78 : i32 to index
    %c0_28 = arith.constant 0 : index
    %80 = vector.load %arg12[%79, %c0_28] : memref<64x384xf32, #tpu.memory_space<vmem>>, vector<8x384xf32>
    %81 = arith.truncf %71 : vector<8x128xf32> to vector<8x128xbf16>
    %cst_29 = arith.constant dense<0.000000e+00> : vector<8x384xf32>
    %82 = tpu.matmul %81, %8, %cst_29 {dimension_numbers = #tpu.dot_dimension_numbers<[1], [0], [0], [1], [0, 0, 1, 1], [], []>} : vector<8x128xbf16>, vector<128x384xbf16>, vector<8x384xf32> -> vector<8x384xf32>
    %83 = vector.extract_strided_slice %80 {offsets = [0, 0], sizes = [8, 256], strides = [1, 1]} : vector<8x384xf32> to vector<8x256xf32>
    %84 = vector.extract_strided_slice %82 {offsets = [0, 0], sizes = [8, 256], strides = [1, 1]} : vector<8x384xf32> to vector<8x256xf32>
    %85 = arith.addf %83, %84 : vector<8x256xf32>
    %86 = arith.negf %85 : vector<8x256xf32>
    %87 = math.exp %86 : vector<8x256xf32>
    %cst_30 = arith.constant 1.000000e+00 : f32
    %88 = vector.broadcast %cst_30 : f32 to vector<8x256xf32>
    %89 = arith.addf %88, %87 : vector<8x256xf32>
    %90 = arith.divf %88, %89 : vector<8x256xf32>
    %91 = vector.extract_strided_slice %90 {offsets = [0, 0], sizes = [8, 128], strides = [1, 1]} : vector<8x256xf32> to vector<8x128xf32>
    %92 = vector.extract_strided_slice %90 {offsets = [0, 128], sizes = [8, 128], strides = [1, 1]} : vector<8x256xf32> to vector<8x128xf32>
    %93 = vector.extract_strided_slice %80 {offsets = [0, 256], sizes = [8, 128], strides = [1, 1]} : vector<8x384xf32> to vector<8x128xf32>
    %94 = vector.extract_strided_slice %82 {offsets = [0, 256], sizes = [8, 128], strides = [1, 1]} : vector<8x384xf32> to vector<8x128xf32>
    %95 = arith.addf %94, %11 : vector<8x128xf32>
    %96 = arith.mulf %91, %95 : vector<8x128xf32>
    %97 = arith.addf %93, %96 : vector<8x128xf32>
    %98 = math.tanh %97 : vector<8x128xf32>
    %99 = arith.subf %71, %98 : vector<8x128xf32>
    %100 = arith.mulf %92, %99 : vector<8x128xf32>
    %101 = arith.addf %98, %100 : vector<8x128xf32>
    %102 = arith.truncf %101 : vector<8x128xf32> to vector<8x128xbf16>
    %cst_31 = arith.constant dense<0.000000e+00> : vector<8x384xf32>
    %103 = tpu.matmul %102, %12, %cst_31 {dimension_numbers = #tpu.dot_dimension_numbers<[1], [0], [0], [1], [0, 0, 1, 1], [], []>} : vector<8x128xbf16>, vector<128x384xbf16>, vector<8x384xf32> -> vector<8x384xf32>
    %104 = arith.addf %103, %15 : vector<8x384xf32>
    %105 = arith.index_cast %78 : i32 to index
    %c0_32 = arith.constant 0 : index
    %106 = vector.load %arg13[%105, %c0_32] : memref<64x384xf32, #tpu.memory_space<vmem>>, vector<8x384xf32>
    tpu.vector_store %arg13[%105, %c0_32], %104 {strides = array<i32>} : memref<64x384xf32, #tpu.memory_space<vmem>>, vector<8x384xf32>,
    %c3_i32 = arith.constant 3 : i32
    %c8_i32_33 = arith.constant 8 : i32
    %107 = arith.muli %c3_i32, %c8_i32_33 : i32
    %108 = tpu.assume_multiple %107, 8 : i32
    %109 = arith.index_cast %108 : i32 to index
    %c0_34 = arith.constant 0 : index
    %110 = vector.load %arg12[%109, %c0_34] : memref<64x384xf32, #tpu.memory_space<vmem>>, vector<8x384xf32>
    %111 = arith.truncf %101 : vector<8x128xf32> to vector<8x128xbf16>
    %cst_35 = arith.constant dense<0.000000e+00> : vector<8x384xf32>
    %112 = tpu.matmul %111, %8, %cst_35 {dimension_numbers = #tpu.dot_dimension_numbers<[1], [0], [0], [1], [0, 0, 1, 1], [], []>} : vector<8x128xbf16>, vector<128x384xbf16>, vector<8x384xf32> -> vector<8x384xf32>
    %113 = vector.extract_strided_slice %110 {offsets = [0, 0], sizes = [8, 256], strides = [1, 1]} : vector<8x384xf32> to vector<8x256xf32>
    %114 = vector.extract_strided_slice %112 {offsets = [0, 0], sizes = [8, 256], strides = [1, 1]} : vector<8x384xf32> to vector<8x256xf32>
    %115 = arith.addf %113, %114 : vector<8x256xf32>
    %116 = arith.negf %115 : vector<8x256xf32>
    %117 = math.exp %116 : vector<8x256xf32>
    %cst_36 = arith.constant 1.000000e+00 : f32
    %118 = vector.broadcast %cst_36 : f32 to vector<8x256xf32>
    %119 = arith.addf %118, %117 : vector<8x256xf32>
    %120 = arith.divf %118, %119 : vector<8x256xf32>
    %121 = vector.extract_strided_slice %120 {offsets = [0, 0], sizes = [8, 128], strides = [1, 1]} : vector<8x256xf32> to vector<8x128xf32>
    %122 = vector.extract_strided_slice %120 {offsets = [0, 128], sizes = [8, 128], strides = [1, 1]} : vector<8x256xf32> to vector<8x128xf32>
    %123 = vector.extract_strided_slice %110 {offsets = [0, 256], sizes = [8, 128], strides = [1, 1]} : vector<8x384xf32> to vector<8x128xf32>
    %124 = vector.extract_strided_slice %112 {offsets = [0, 256], sizes = [8, 128], strides = [1, 1]} : vector<8x384xf32> to vector<8x128xf32>
    %125 = arith.addf %124, %11 : vector<8x128xf32>
    %126 = arith.mulf %121, %125 : vector<8x128xf32>
    %127 = arith.addf %123, %126 : vector<8x128xf32>
    %128 = math.tanh %127 : vector<8x128xf32>
    %129 = arith.subf %101, %128 : vector<8x128xf32>
    %130 = arith.mulf %122, %129 : vector<8x128xf32>
    %131 = arith.addf %128, %130 : vector<8x128xf32>
    %132 = arith.truncf %131 : vector<8x128xf32> to vector<8x128xbf16>
    %cst_37 = arith.constant dense<0.000000e+00> : vector<8x384xf32>
    %133 = tpu.matmul %132, %12, %cst_37 {dimension_numbers = #tpu.dot_dimension_numbers<[1], [0], [0], [1], [0, 0, 1, 1], [], []>} : vector<8x128xbf16>, vector<128x384xbf16>, vector<8x384xf32> -> vector<8x384xf32>
    %134 = arith.addf %133, %15 : vector<8x384xf32>
    %135 = arith.index_cast %108 : i32 to index
    %c0_38 = arith.constant 0 : index
    %136 = vector.load %arg13[%135, %c0_38] : memref<64x384xf32, #tpu.memory_space<vmem>>, vector<8x384xf32>
    tpu.vector_store %arg13[%135, %c0_38], %134 {strides = array<i32>} : memref<64x384xf32, #tpu.memory_space<vmem>>, vector<8x384xf32>,
    %c4_i32 = arith.constant 4 : i32
    %c8_i32_39 = arith.constant 8 : i32
    %137 = arith.muli %c4_i32, %c8_i32_39 : i32
    %138 = tpu.assume_multiple %137, 8 : i32
    %139 = arith.index_cast %138 : i32 to index
    %c0_40 = arith.constant 0 : index
    %140 = vector.load %arg12[%139, %c0_40] : memref<64x384xf32, #tpu.memory_space<vmem>>, vector<8x384xf32>
    %141 = arith.truncf %131 : vector<8x128xf32> to vector<8x128xbf16>
    %cst_41 = arith.constant dense<0.000000e+00> : vector<8x384xf32>
    %142 = tpu.matmul %141, %8, %cst_41 {dimension_numbers = #tpu.dot_dimension_numbers<[1], [0], [0], [1], [0, 0, 1, 1], [], []>} : vector<8x128xbf16>, vector<128x384xbf16>, vector<8x384xf32> -> vector<8x384xf32>
    %143 = vector.extract_strided_slice %140 {offsets = [0, 0], sizes = [8, 256], strides = [1, 1]} : vector<8x384xf32> to vector<8x256xf32>
    %144 = vector.extract_strided_slice %142 {offsets = [0, 0], sizes = [8, 256], strides = [1, 1]} : vector<8x384xf32> to vector<8x256xf32>
    %145 = arith.addf %143, %144 : vector<8x256xf32>
    %146 = arith.negf %145 : vector<8x256xf32>
    %147 = math.exp %146 : vector<8x256xf32>
    %cst_42 = arith.constant 1.000000e+00 : f32
    %148 = vector.broadcast %cst_42 : f32 to vector<8x256xf32>
    %149 = arith.addf %148, %147 : vector<8x256xf32>
    %150 = arith.divf %148, %149 : vector<8x256xf32>
    %151 = vector.extract_strided_slice %150 {offsets = [0, 0], sizes = [8, 128], strides = [1, 1]} : vector<8x256xf32> to vector<8x128xf32>
    %152 = vector.extract_strided_slice %150 {offsets = [0, 128], sizes = [8, 128], strides = [1, 1]} : vector<8x256xf32> to vector<8x128xf32>
    %153 = vector.extract_strided_slice %140 {offsets = [0, 256], sizes = [8, 128], strides = [1, 1]} : vector<8x384xf32> to vector<8x128xf32>
    %154 = vector.extract_strided_slice %142 {offsets = [0, 256], sizes = [8, 128], strides = [1, 1]} : vector<8x384xf32> to vector<8x128xf32>
    %155 = arith.addf %154, %11 : vector<8x128xf32>
    %156 = arith.mulf %151, %155 : vector<8x128xf32>
    %157 = arith.addf %153, %156 : vector<8x128xf32>
    %158 = math.tanh %157 : vector<8x128xf32>
    %159 = arith.subf %131, %158 : vector<8x128xf32>
    %160 = arith.mulf %152, %159 : vector<8x128xf32>
    %161 = arith.addf %158, %160 : vector<8x128xf32>
    %162 = arith.truncf %161 : vector<8x128xf32> to vector<8x128xbf16>
    %cst_43 = arith.constant dense<0.000000e+00> : vector<8x384xf32>
    %163 = tpu.matmul %162, %12, %cst_43 {dimension_numbers = #tpu.dot_dimension_numbers<[1], [0], [0], [1], [0, 0, 1, 1], [], []>} : vector<8x128xbf16>, vector<128x384xbf16>, vector<8x384xf32> -> vector<8x384xf32>
    %164 = arith.addf %163, %15 : vector<8x384xf32>
    %165 = arith.index_cast %138 : i32 to index
    %c0_44 = arith.constant 0 : index
    %166 = vector.load %arg13[%165, %c0_44] : memref<64x384xf32, #tpu.memory_space<vmem>>, vector<8x384xf32>
    tpu.vector_store %arg13[%165, %c0_44], %164 {strides = array<i32>} : memref<64x384xf32, #tpu.memory_space<vmem>>, vector<8x384xf32>,
    %c5_i32 = arith.constant 5 : i32
    %c8_i32_45 = arith.constant 8 : i32
    %167 = arith.muli %c5_i32, %c8_i32_45 : i32
    %168 = tpu.assume_multiple %167, 8 : i32
    %169 = arith.index_cast %168 : i32 to index
    %c0_46 = arith.constant 0 : index
    %170 = vector.load %arg12[%169, %c0_46] : memref<64x384xf32, #tpu.memory_space<vmem>>, vector<8x384xf32>
    %171 = arith.truncf %161 : vector<8x128xf32> to vector<8x128xbf16>
    %cst_47 = arith.constant dense<0.000000e+00> : vector<8x384xf32>
    %172 = tpu.matmul %171, %8, %cst_47 {dimension_numbers = #tpu.dot_dimension_numbers<[1], [0], [0], [1], [0, 0, 1, 1], [], []>} : vector<8x128xbf16>, vector<128x384xbf16>, vector<8x384xf32> -> vector<8x384xf32>
    %173 = vector.extract_strided_slice %170 {offsets = [0, 0], sizes = [8, 256], strides = [1, 1]} : vector<8x384xf32> to vector<8x256xf32>
    %174 = vector.extract_strided_slice %172 {offsets = [0, 0], sizes = [8, 256], strides = [1, 1]} : vector<8x384xf32> to vector<8x256xf32>
    %175 = arith.addf %173, %174 : vector<8x256xf32>
    %176 = arith.negf %175 : vector<8x256xf32>
    %177 = math.exp %176 : vector<8x256xf32>
    %cst_48 = arith.constant 1.000000e+00 : f32
    %178 = vector.broadcast %cst_48 : f32 to vector<8x256xf32>
    %179 = arith.addf %178, %177 : vector<8x256xf32>
    %180 = arith.divf %178, %179 : vector<8x256xf32>
    %181 = vector.extract_strided_slice %180 {offsets = [0, 0], sizes = [8, 128], strides = [1, 1]} : vector<8x256xf32> to vector<8x128xf32>
    %182 = vector.extract_strided_slice %180 {offsets = [0, 128], sizes = [8, 128], strides = [1, 1]} : vector<8x256xf32> to vector<8x128xf32>
    %183 = vector.extract_strided_slice %170 {offsets = [0, 256], sizes = [8, 128], strides = [1, 1]} : vector<8x384xf32> to vector<8x128xf32>
    %184 = vector.extract_strided_slice %172 {offsets = [0, 256], sizes = [8, 128], strides = [1, 1]} : vector<8x384xf32> to vector<8x128xf32>
    %185 = arith.addf %184, %11 : vector<8x128xf32>
    %186 = arith.mulf %181, %185 : vector<8x128xf32>
    %187 = arith.addf %183, %186 : vector<8x128xf32>
    %188 = math.tanh %187 : vector<8x128xf32>
    %189 = arith.subf %161, %188 : vector<8x128xf32>
    %190 = arith.mulf %182, %189 : vector<8x128xf32>
    %191 = arith.addf %188, %190 : vector<8x128xf32>
    %192 = arith.truncf %191 : vector<8x128xf32> to vector<8x128xbf16>
    %cst_49 = arith.constant dense<0.000000e+00> : vector<8x384xf32>
    %193 = tpu.matmul %192, %12, %cst_49 {dimension_numbers = #tpu.dot_dimension_numbers<[1], [0], [0], [1], [0, 0, 1, 1], [], []>} : vector<8x128xbf16>, vector<128x384xbf16>, vector<8x384xf32> -> vector<8x384xf32>
    %194 = arith.addf %193, %15 : vector<8x384xf32>
    %195 = arith.index_cast %168 : i32 to index
    %c0_50 = arith.constant 0 : index
    %196 = vector.load %arg13[%195, %c0_50] : memref<64x384xf32, #tpu.memory_space<vmem>>, vector<8x384xf32>
    tpu.vector_store %arg13[%195, %c0_50], %194 {strides = array<i32>} : memref<64x384xf32, #tpu.memory_space<vmem>>, vector<8x384xf32>,
    %c6_i32 = arith.constant 6 : i32
    %c8_i32_51 = arith.constant 8 : i32
    %197 = arith.muli %c6_i32, %c8_i32_51 : i32
    %198 = tpu.assume_multiple %197, 8 : i32
    %199 = arith.index_cast %198 : i32 to index
    %c0_52 = arith.constant 0 : index
    %200 = vector.load %arg12[%199, %c0_52] : memref<64x384xf32, #tpu.memory_space<vmem>>, vector<8x384xf32>
    %201 = arith.truncf %191 : vector<8x128xf32> to vector<8x128xbf16>
    %cst_53 = arith.constant dense<0.000000e+00> : vector<8x384xf32>
    %202 = tpu.matmul %201, %8, %cst_53 {dimension_numbers = #tpu.dot_dimension_numbers<[1], [0], [0], [1], [0, 0, 1, 1], [], []>} : vector<8x128xbf16>, vector<128x384xbf16>, vector<8x384xf32> -> vector<8x384xf32>
    %203 = vector.extract_strided_slice %200 {offsets = [0, 0], sizes = [8, 256], strides = [1, 1]} : vector<8x384xf32> to vector<8x256xf32>
    %204 = vector.extract_strided_slice %202 {offsets = [0, 0], sizes = [8, 256], strides = [1, 1]} : vector<8x384xf32> to vector<8x256xf32>
    %205 = arith.addf %203, %204 : vector<8x256xf32>
    %206 = arith.negf %205 : vector<8x256xf32>
    %207 = math.exp %206 : vector<8x256xf32>
    %cst_54 = arith.constant 1.000000e+00 : f32
    %208 = vector.broadcast %cst_54 : f32 to vector<8x256xf32>
    %209 = arith.addf %208, %207 : vector<8x256xf32>
    %210 = arith.divf %208, %209 : vector<8x256xf32>
    %211 = vector.extract_strided_slice %210 {offsets = [0, 0], sizes = [8, 128], strides = [1, 1]} : vector<8x256xf32> to vector<8x128xf32>
    %212 = vector.extract_strided_slice %210 {offsets = [0, 128], sizes = [8, 128], strides = [1, 1]} : vector<8x256xf32> to vector<8x128xf32>
    %213 = vector.extract_strided_slice %200 {offsets = [0, 256], sizes = [8, 128], strides = [1, 1]} : vector<8x384xf32> to vector<8x128xf32>
    %214 = vector.extract_strided_slice %202 {offsets = [0, 256], sizes = [8, 128], strides = [1, 1]} : vector<8x384xf32> to vector<8x128xf32>
    %215 = arith.addf %214, %11 : vector<8x128xf32>
    %216 = arith.mulf %211, %215 : vector<8x128xf32>
    %217 = arith.addf %213, %216 : vector<8x128xf32>
    %218 = math.tanh %217 : vector<8x128xf32>
    %219 = arith.subf %191, %218 : vector<8x128xf32>
    %220 = arith.mulf %212, %219 : vector<8x128xf32>
    %221 = arith.addf %218, %220 : vector<8x128xf32>
    %222 = arith.truncf %221 : vector<8x128xf32> to vector<8x128xbf16>
    %cst_55 = arith.constant dense<0.000000e+00> : vector<8x384xf32>
    %223 = tpu.matmul %222, %12, %cst_55 {dimension_numbers = #tpu.dot_dimension_numbers<[1], [0], [0], [1], [0, 0, 1, 1], [], []>} : vector<8x128xbf16>, vector<128x384xbf16>, vector<8x384xf32> -> vector<8x384xf32>
    %224 = arith.addf %223, %15 : vector<8x384xf32>
    %225 = arith.index_cast %198 : i32 to index
    %c0_56 = arith.constant 0 : index
    %226 = vector.load %arg13[%225, %c0_56] : memref<64x384xf32, #tpu.memory_space<vmem>>, vector<8x384xf32>
    tpu.vector_store %arg13[%225, %c0_56], %224 {strides = array<i32>} : memref<64x384xf32, #tpu.memory_space<vmem>>, vector<8x384xf32>,
    %c7_i32 = arith.constant 7 : i32
    %c8_i32_57 = arith.constant 8 : i32
    %227 = arith.muli %c7_i32, %c8_i32_57 : i32
    %228 = tpu.assume_multiple %227, 8 : i32
    %229 = arith.index_cast %228 : i32 to index
    %c0_58 = arith.constant 0 : index
    %230 = vector.load %arg12[%229, %c0_58] : memref<64x384xf32, #tpu.memory_space<vmem>>, vector<8x384xf32>
    %231 = arith.truncf %221 : vector<8x128xf32> to vector<8x128xbf16>
    %cst_59 = arith.constant dense<0.000000e+00> : vector<8x384xf32>
    %232 = tpu.matmul %231, %8, %cst_59 {dimension_numbers = #tpu.dot_dimension_numbers<[1], [0], [0], [1], [0, 0, 1, 1], [], []>} : vector<8x128xbf16>, vector<128x384xbf16>, vector<8x384xf32> -> vector<8x384xf32>
    %233 = vector.extract_strided_slice %230 {offsets = [0, 0], sizes = [8, 256], strides = [1, 1]} : vector<8x384xf32> to vector<8x256xf32>
    %234 = vector.extract_strided_slice %232 {offsets = [0, 0], sizes = [8, 256], strides = [1, 1]} : vector<8x384xf32> to vector<8x256xf32>
    %235 = arith.addf %233, %234 : vector<8x256xf32>
    %236 = arith.negf %235 : vector<8x256xf32>
    %237 = math.exp %236 : vector<8x256xf32>
    %cst_60 = arith.constant 1.000000e+00 : f32
    %238 = vector.broadcast %cst_60 : f32 to vector<8x256xf32>
    %239 = arith.addf %238, %237 : vector<8x256xf32>
    %240 = arith.divf %238, %239 : vector<8x256xf32>
    %241 = vector.extract_strided_slice %240 {offsets = [0, 0], sizes = [8, 128], strides = [1, 1]} : vector<8x256xf32> to vector<8x128xf32>
    %242 = vector.extract_strided_slice %240 {offsets = [0, 128], sizes = [8, 128], strides = [1, 1]} : vector<8x256xf32> to vector<8x128xf32>
    %243 = vector.extract_strided_slice %230 {offsets = [0, 256], sizes = [8, 128], strides = [1, 1]} : vector<8x384xf32> to vector<8x128xf32>
    %244 = vector.extract_strided_slice %232 {offsets = [0, 256], sizes = [8, 128], strides = [1, 1]} : vector<8x384xf32> to vector<8x128xf32>
    %245 = arith.addf %244, %11 : vector<8x128xf32>
    %246 = arith.mulf %241, %245 : vector<8x128xf32>
    %247 = arith.addf %243, %246 : vector<8x128xf32>
    %248 = math.tanh %247 : vector<8x128xf32>
    %249 = arith.subf %221, %248 : vector<8x128xf32>
    %250 = arith.mulf %242, %249 : vector<8x128xf32>
    %251 = arith.addf %248, %250 : vector<8x128xf32>
    %252 = arith.truncf %251 : vector<8x128xf32> to vector<8x128xbf16>
    %cst_61 = arith.constant dense<0.000000e+00> : vector<8x384xf32>
    %253 = tpu.matmul %252, %12, %cst_61 {dimension_numbers = #tpu.dot_dimension_numbers<[1], [0], [0], [1], [0, 0, 1, 1], [], []>} : vector<8x128xbf16>, vector<128x384xbf16>, vector<8x384xf32> -> vector<8x384xf32>
    %254 = arith.addf %253, %15 : vector<8x384xf32>
    %255 = arith.index_cast %228 : i32 to index
    %c0_62 = arith.constant 0 : index
    %256 = vector.load %arg13[%255, %c0_62] : memref<64x384xf32, #tpu.memory_space<vmem>>, vector<8x384xf32>
    tpu.vector_store %arg13[%255, %c0_62], %254 {strides = array<i32>} : memref<64x384xf32, #tpu.memory_space<vmem>>, vector<8x384xf32>,
    %c8_i32_63 = arith.constant 8 : i32
    %c0_64 = arith.constant 0 : index
    %c0_65 = arith.constant 0 : index
    %257 = vector.load %arg7[%c0_64, %c0_65] : memref<128x384xbf16, #tpu.memory_space<vmem>>, vector<128x384xbf16>
    %c0_66 = arith.constant 0 : index
    %c0_67 = arith.constant 0 : index
    %258 = vector.load %arg8[%c0_66, %c0_67] : memref<1x128xf32, #tpu.memory_space<vmem>>, vector<1x128xf32>
    %259 = vector.shape_cast %258 : vector<1x128xf32> to vector<1x128xf32>
    %260 = vector.broadcast %259 : vector<1x128xf32> to vector<8x128xf32>
    %cst_68 = arith.constant 0.000000e+00 : f32
    %261 = vector.broadcast %cst_68 : f32 to vector<8x128xf32>
    %c0_i32_69 = arith.constant 0 : i32
    %c8_i32_70 = arith.constant 8 : i32
    %262 = arith.muli %c0_i32_69, %c8_i32_70 : i32
    %263 = tpu.assume_multiple %262, 8 : i32
    %264 = arith.index_cast %263 : i32 to index
    %c0_71 = arith.constant 0 : index
    %265 = vector.load %arg13[%264, %c0_71] : memref<64x384xf32, #tpu.memory_space<vmem>>, vector<8x384xf32>
    %266 = arith.truncf %261 : vector<8x128xf32> to vector<8x128xbf16>
    %cst_72 = arith.constant dense<0.000000e+00> : vector<8x384xf32>
    %267 = tpu.matmul %266, %257, %cst_72 {dimension_numbers = #tpu.dot_dimension_numbers<[1], [0], [0], [1], [0, 0, 1, 1], [], []>} : vector<8x128xbf16>, vector<128x384xbf16>, vector<8x384xf32> -> vector<8x384xf32>
    %268 = vector.extract_strided_slice %265 {offsets = [0, 0], sizes = [8, 256], strides = [1, 1]} : vector<8x384xf32> to vector<8x256xf32>
    %269 = vector.extract_strided_slice %267 {offsets = [0, 0], sizes = [8, 256], strides = [1, 1]} : vector<8x384xf32> to vector<8x256xf32>
    %270 = arith.addf %268, %269 : vector<8x256xf32>
    %271 = arith.negf %270 : vector<8x256xf32>
    %272 = math.exp %271 : vector<8x256xf32>
    %cst_73 = arith.constant 1.000000e+00 : f32
    %273 = vector.broadcast %cst_73 : f32 to vector<8x256xf32>
    %274 = arith.addf %273, %272 : vector<8x256xf32>
    %275 = arith.divf %273, %274 : vector<8x256xf32>
    %276 = vector.extract_strided_slice %275 {offsets = [0, 0], sizes = [8, 128], strides = [1, 1]} : vector<8x256xf32> to vector<8x128xf32>
    %277 = vector.extract_strided_slice %275 {offsets = [0, 128], sizes = [8, 128], strides = [1, 1]} : vector<8x256xf32> to vector<8x128xf32>
    %278 = vector.extract_strided_slice %265 {offsets = [0, 256], sizes = [8, 128], strides = [1, 1]} : vector<8x384xf32> to vector<8x128xf32>
    %279 = vector.extract_strided_slice %267 {offsets = [0, 256], sizes = [8, 128], strides = [1, 1]} : vector<8x384xf32> to vector<8x128xf32>
    %280 = arith.addf %279, %260 : vector<8x128xf32>
    %281 = arith.mulf %276, %280 : vector<8x128xf32>
    %282 = arith.addf %278, %281 : vector<8x128xf32>
    %283 = math.tanh %282 : vector<8x128xf32>
    %284 = arith.subf %261, %283 : vector<8x128xf32>
    %285 = arith.mulf %277, %284 : vector<8x128xf32>
    %286 = arith.addf %283, %285 : vector<8x128xf32>
    %c1_i32_74 = arith.constant 1 : i32
    %c8_i32_75 = arith.constant 8 : i32
    %287 = arith.muli %c1_i32_74, %c8_i32_75 : i32
    %288 = tpu.assume_multiple %287, 8 : i32
    %289 = arith.index_cast %288 : i32 to index
    %c0_76 = arith.constant 0 : index
    %290 = vector.load %arg13[%289, %c0_76] : memref<64x384xf32, #tpu.memory_space<vmem>>, vector<8x384xf32>
    %291 = arith.truncf %286 : vector<8x128xf32> to vector<8x128xbf16>
    %cst_77 = arith.constant dense<0.000000e+00> : vector<8x384xf32>
    %292 = tpu.matmul %291, %257, %cst_77 {dimension_numbers = #tpu.dot_dimension_numbers<[1], [0], [0], [1], [0, 0, 1, 1], [], []>} : vector<8x128xbf16>, vector<128x384xbf16>, vector<8x384xf32> -> vector<8x384xf32>
    %293 = vector.extract_strided_slice %290 {offsets = [0, 0], sizes = [8, 256], strides = [1, 1]} : vector<8x384xf32> to vector<8x256xf32>
    %294 = vector.extract_strided_slice %292 {offsets = [0, 0], sizes = [8, 256], strides = [1, 1]} : vector<8x384xf32> to vector<8x256xf32>
    %295 = arith.addf %293, %294 : vector<8x256xf32>
    %296 = arith.negf %295 : vector<8x256xf32>
    %297 = math.exp %296 : vector<8x256xf32>
    %cst_78 = arith.constant 1.000000e+00 : f32
    %298 = vector.broadcast %cst_78 : f32 to vector<8x256xf32>
    %299 = arith.addf %298, %297 : vector<8x256xf32>
    %300 = arith.divf %298, %299 : vector<8x256xf32>
    %301 = vector.extract_strided_slice %300 {offsets = [0, 0], sizes = [8, 128], strides = [1, 1]} : vector<8x256xf32> to vector<8x128xf32>
    %302 = vector.extract_strided_slice %300 {offsets = [0, 128], sizes = [8, 128], strides = [1, 1]} : vector<8x256xf32> to vector<8x128xf32>
    %303 = vector.extract_strided_slice %290 {offsets = [0, 256], sizes = [8, 128], strides = [1, 1]} : vector<8x384xf32> to vector<8x128xf32>
    %304 = vector.extract_strided_slice %292 {offsets = [0, 256], sizes = [8, 128], strides = [1, 1]} : vector<8x384xf32> to vector<8x128xf32>
    %305 = arith.addf %304, %260 : vector<8x128xf32>
    %306 = arith.mulf %301, %305 : vector<8x128xf32>
    %307 = arith.addf %303, %306 : vector<8x128xf32>
    %308 = math.tanh %307 : vector<8x128xf32>
    %309 = arith.subf %286, %308 : vector<8x128xf32>
    %310 = arith.mulf %302, %309 : vector<8x128xf32>
    %311 = arith.addf %308, %310 : vector<8x128xf32>
    %c2_i32_79 = arith.constant 2 : i32
    %c8_i32_80 = arith.constant 8 : i32
    %312 = arith.muli %c2_i32_79, %c8_i32_80 : i32
    %313 = tpu.assume_multiple %312, 8 : i32
    %314 = arith.index_cast %313 : i32 to index
    %c0_81 = arith.constant 0 : index
    %315 = vector.load %arg13[%314, %c0_81] : memref<64x384xf32, #tpu.memory_space<vmem>>, vector<8x384xf32>
    %316 = arith.truncf %311 : vector<8x128xf32> to vector<8x128xbf16>
    %cst_82 = arith.constant dense<0.000000e+00> : vector<8x384xf32>
    %317 = tpu.matmul %316, %257, %cst_82 {dimension_numbers = #tpu.dot_dimension_numbers<[1], [0], [0], [1], [0, 0, 1, 1], [], []>} : vector<8x128xbf16>, vector<128x384xbf16>, vector<8x384xf32> -> vector<8x384xf32>
    %318 = vector.extract_strided_slice %315 {offsets = [0, 0], sizes = [8, 256], strides = [1, 1]} : vector<8x384xf32> to vector<8x256xf32>
    %319 = vector.extract_strided_slice %317 {offsets = [0, 0], sizes = [8, 256], strides = [1, 1]} : vector<8x384xf32> to vector<8x256xf32>
    %320 = arith.addf %318, %319 : vector<8x256xf32>
    %321 = arith.negf %320 : vector<8x256xf32>
    %322 = math.exp %321 : vector<8x256xf32>
    %cst_83 = arith.constant 1.000000e+00 : f32
    %323 = vector.broadcast %cst_83 : f32 to vector<8x256xf32>
    %324 = arith.addf %323, %322 : vector<8x256xf32>
    %325 = arith.divf %323, %324 : vector<8x256xf32>
    %326 = vector.extract_strided_slice %325 {offsets = [0, 0], sizes = [8, 128], strides = [1, 1]} : vector<8x256xf32> to vector<8x128xf32>
    %327 = vector.extract_strided_slice %325 {offsets = [0, 128], sizes = [8, 128], strides = [1, 1]} : vector<8x256xf32> to vector<8x128xf32>
    %328 = vector.extract_strided_slice %315 {offsets = [0, 256], sizes = [8, 128], strides = [1, 1]} : vector<8x384xf32> to vector<8x128xf32>
    %329 = vector.extract_strided_slice %317 {offsets = [0, 256], sizes = [8, 128], strides = [1, 1]} : vector<8x384xf32> to vector<8x128xf32>
    %330 = arith.addf %329, %260 : vector<8x128xf32>
    %331 = arith.mulf %326, %330 : vector<8x128xf32>
    %332 = arith.addf %328, %331 : vector<8x128xf32>
    %333 = math.tanh %332 : vector<8x128xf32>
    %334 = arith.subf %311, %333 : vector<8x128xf32>
    %335 = arith.mulf %327, %334 : vector<8x128xf32>
    %336 = arith.addf %333, %335 : vector<8x128xf32>
    %c3_i32_84 = arith.constant 3 : i32
    %c8_i32_85 = arith.constant 8 : i32
    %337 = arith.muli %c3_i32_84, %c8_i32_85 : i32
    %338 = tpu.assume_multiple %337, 8 : i32
    %339 = arith.index_cast %338 : i32 to index
    %c0_86 = arith.constant 0 : index
    %340 = vector.load %arg13[%339, %c0_86] : memref<64x384xf32, #tpu.memory_space<vmem>>, vector<8x384xf32>
    %341 = arith.truncf %336 : vector<8x128xf32> to vector<8x128xbf16>
    %cst_87 = arith.constant dense<0.000000e+00> : vector<8x384xf32>
    %342 = tpu.matmul %341, %257, %cst_87 {dimension_numbers = #tpu.dot_dimension_numbers<[1], [0], [0], [1], [0, 0, 1, 1], [], []>} : vector<8x128xbf16>, vector<128x384xbf16>, vector<8x384xf32> -> vector<8x384xf32>
    %343 = vector.extract_strided_slice %340 {offsets = [0, 0], sizes = [8, 256], strides = [1, 1]} : vector<8x384xf32> to vector<8x256xf32>
    %344 = vector.extract_strided_slice %342 {offsets = [0, 0], sizes = [8, 256], strides = [1, 1]} : vector<8x384xf32> to vector<8x256xf32>
    %345 = arith.addf %343, %344 : vector<8x256xf32>
    %346 = arith.negf %345 : vector<8x256xf32>
    %347 = math.exp %346 : vector<8x256xf32>
    %cst_88 = arith.constant 1.000000e+00 : f32
    %348 = vector.broadcast %cst_88 : f32 to vector<8x256xf32>
    %349 = arith.addf %348, %347 : vector<8x256xf32>
    %350 = arith.divf %348, %349 : vector<8x256xf32>
    %351 = vector.extract_strided_slice %350 {offsets = [0, 0], sizes = [8, 128], strides = [1, 1]} : vector<8x256xf32> to vector<8x128xf32>
    %352 = vector.extract_strided_slice %350 {offsets = [0, 128], sizes = [8, 128], strides = [1, 1]} : vector<8x256xf32> to vector<8x128xf32>
    %353 = vector.extract_strided_slice %340 {offsets = [0, 256], sizes = [8, 128], strides = [1, 1]} : vector<8x384xf32> to vector<8x128xf32>
    %354 = vector.extract_strided_slice %342 {offsets = [0, 256], sizes = [8, 128], strides = [1, 1]} : vector<8x384xf32> to vector<8x128xf32>
    %355 = arith.addf %354, %260 : vector<8x128xf32>
    %356 = arith.mulf %351, %355 : vector<8x128xf32>
    %357 = arith.addf %353, %356 : vector<8x128xf32>
    %358 = math.tanh %357 : vector<8x128xf32>
    %359 = arith.subf %336, %358 : vector<8x128xf32>
    %360 = arith.mulf %352, %359 : vector<8x128xf32>
    %361 = arith.addf %358, %360 : vector<8x128xf32>
    %c4_i32_89 = arith.constant 4 : i32
    %c8_i32_90 = arith.constant 8 : i32
    %362 = arith.muli %c4_i32_89, %c8_i32_90 : i32
    %363 = tpu.assume_multiple %362, 8 : i32
    %364 = arith.index_cast %363 : i32 to index
    %c0_91 = arith.constant 0 : index
    %365 = vector.load %arg13[%364, %c0_91] : memref<64x384xf32, #tpu.memory_space<vmem>>, vector<8x384xf32>
    %366 = arith.truncf %361 : vector<8x128xf32> to vector<8x128xbf16>
    %cst_92 = arith.constant dense<0.000000e+00> : vector<8x384xf32>
    %367 = tpu.matmul %366, %257, %cst_92 {dimension_numbers = #tpu.dot_dimension_numbers<[1], [0], [0], [1], [0, 0, 1, 1], [], []>} : vector<8x128xbf16>, vector<128x384xbf16>, vector<8x384xf32> -> vector<8x384xf32>
    %368 = vector.extract_strided_slice %365 {offsets = [0, 0], sizes = [8, 256], strides = [1, 1]} : vector<8x384xf32> to vector<8x256xf32>
    %369 = vector.extract_strided_slice %367 {offsets = [0, 0], sizes = [8, 256], strides = [1, 1]} : vector<8x384xf32> to vector<8x256xf32>
    %370 = arith.addf %368, %369 : vector<8x256xf32>
    %371 = arith.negf %370 : vector<8x256xf32>
    %372 = math.exp %371 : vector<8x256xf32>
    %cst_93 = arith.constant 1.000000e+00 : f32
    %373 = vector.broadcast %cst_93 : f32 to vector<8x256xf32>
    %374 = arith.addf %373, %372 : vector<8x256xf32>
    %375 = arith.divf %373, %374 : vector<8x256xf32>
    %376 = vector.extract_strided_slice %375 {offsets = [0, 0], sizes = [8, 128], strides = [1, 1]} : vector<8x256xf32> to vector<8x128xf32>
    %377 = vector.extract_strided_slice %375 {offsets = [0, 128], sizes = [8, 128], strides = [1, 1]} : vector<8x256xf32> to vector<8x128xf32>
    %378 = vector.extract_strided_slice %365 {offsets = [0, 256], sizes = [8, 128], strides = [1, 1]} : vector<8x384xf32> to vector<8x128xf32>
    %379 = vector.extract_strided_slice %367 {offsets = [0, 256], sizes = [8, 128], strides = [1, 1]} : vector<8x384xf32> to vector<8x128xf32>
    %380 = arith.addf %379, %260 : vector<8x128xf32>
    %381 = arith.mulf %376, %380 : vector<8x128xf32>
    %382 = arith.addf %378, %381 : vector<8x128xf32>
    %383 = math.tanh %382 : vector<8x128xf32>
    %384 = arith.subf %361, %383 : vector<8x128xf32>
    %385 = arith.mulf %377, %384 : vector<8x128xf32>
    %386 = arith.addf %383, %385 : vector<8x128xf32>
    %c5_i32_94 = arith.constant 5 : i32
    %c8_i32_95 = arith.constant 8 : i32
    %387 = arith.muli %c5_i32_94, %c8_i32_95 : i32
    %388 = tpu.assume_multiple %387, 8 : i32
    %389 = arith.index_cast %388 : i32 to index
    %c0_96 = arith.constant 0 : index
    %390 = vector.load %arg13[%389, %c0_96] : memref<64x384xf32, #tpu.memory_space<vmem>>, vector<8x384xf32>
    %391 = arith.truncf %386 : vector<8x128xf32> to vector<8x128xbf16>
    %cst_97 = arith.constant dense<0.000000e+00> : vector<8x384xf32>
    %392 = tpu.matmul %391, %257, %cst_97 {dimension_numbers = #tpu.dot_dimension_numbers<[1], [0], [0], [1], [0, 0, 1, 1], [], []>} : vector<8x128xbf16>, vector<128x384xbf16>, vector<8x384xf32> -> vector<8x384xf32>
    %393 = vector.extract_strided_slice %390 {offsets = [0, 0], sizes = [8, 256], strides = [1, 1]} : vector<8x384xf32> to vector<8x256xf32>
    %394 = vector.extract_strided_slice %392 {offsets = [0, 0], sizes = [8, 256], strides = [1, 1]} : vector<8x384xf32> to vector<8x256xf32>
    %395 = arith.addf %393, %394 : vector<8x256xf32>
    %396 = arith.negf %395 : vector<8x256xf32>
    %397 = math.exp %396 : vector<8x256xf32>
    %cst_98 = arith.constant 1.000000e+00 : f32
    %398 = vector.broadcast %cst_98 : f32 to vector<8x256xf32>
    %399 = arith.addf %398, %397 : vector<8x256xf32>
    %400 = arith.divf %398, %399 : vector<8x256xf32>
    %401 = vector.extract_strided_slice %400 {offsets = [0, 0], sizes = [8, 128], strides = [1, 1]} : vector<8x256xf32> to vector<8x128xf32>
    %402 = vector.extract_strided_slice %400 {offsets = [0, 128], sizes = [8, 128], strides = [1, 1]} : vector<8x256xf32> to vector<8x128xf32>
    %403 = vector.extract_strided_slice %390 {offsets = [0, 256], sizes = [8, 128], strides = [1, 1]} : vector<8x384xf32> to vector<8x128xf32>
    %404 = vector.extract_strided_slice %392 {offsets = [0, 256], sizes = [8, 128], strides = [1, 1]} : vector<8x384xf32> to vector<8x128xf32>
    %405 = arith.addf %404, %260 : vector<8x128xf32>
    %406 = arith.mulf %401, %405 : vector<8x128xf32>
    %407 = arith.addf %403, %406 : vector<8x128xf32>
    %408 = math.tanh %407 : vector<8x128xf32>
    %409 = arith.subf %386, %408 : vector<8x128xf32>
    %410 = arith.mulf %402, %409 : vector<8x128xf32>
    %411 = arith.addf %408, %410 : vector<8x128xf32>
    %c6_i32_99 = arith.constant 6 : i32
    %c8_i32_100 = arith.constant 8 : i32
    %412 = arith.muli %c6_i32_99, %c8_i32_100 : i32
    %413 = tpu.assume_multiple %412, 8 : i32
    %414 = arith.index_cast %413 : i32 to index
    %c0_101 = arith.constant 0 : index
    %415 = vector.load %arg13[%414, %c0_101] : memref<64x384xf32, #tpu.memory_space<vmem>>, vector<8x384xf32>
    %416 = arith.truncf %411 : vector<8x128xf32> to vector<8x128xbf16>
    %cst_102 = arith.constant dense<0.000000e+00> : vector<8x384xf32>
    %417 = tpu.matmul %416, %257, %cst_102 {dimension_numbers = #tpu.dot_dimension_numbers<[1], [0], [0], [1], [0, 0, 1, 1], [], []>} : vector<8x128xbf16>, vector<128x384xbf16>, vector<8x384xf32> -> vector<8x384xf32>
    %418 = vector.extract_strided_slice %415 {offsets = [0, 0], sizes = [8, 256], strides = [1, 1]} : vector<8x384xf32> to vector<8x256xf32>
    %419 = vector.extract_strided_slice %417 {offsets = [0, 0], sizes = [8, 256], strides = [1, 1]} : vector<8x384xf32> to vector<8x256xf32>
    %420 = arith.addf %418, %419 : vector<8x256xf32>
    %421 = arith.negf %420 : vector<8x256xf32>
    %422 = math.exp %421 : vector<8x256xf32>
    %cst_103 = arith.constant 1.000000e+00 : f32
    %423 = vector.broadcast %cst_103 : f32 to vector<8x256xf32>
    %424 = arith.addf %423, %422 : vector<8x256xf32>
    %425 = arith.divf %423, %424 : vector<8x256xf32>
    %426 = vector.extract_strided_slice %425 {offsets = [0, 0], sizes = [8, 128], strides = [1, 1]} : vector<8x256xf32> to vector<8x128xf32>
    %427 = vector.extract_strided_slice %425 {offsets = [0, 128], sizes = [8, 128], strides = [1, 1]} : vector<8x256xf32> to vector<8x128xf32>
    %428 = vector.extract_strided_slice %415 {offsets = [0, 256], sizes = [8, 128], strides = [1, 1]} : vector<8x384xf32> to vector<8x128xf32>
    %429 = vector.extract_strided_slice %417 {offsets = [0, 256], sizes = [8, 128], strides = [1, 1]} : vector<8x384xf32> to vector<8x128xf32>
    %430 = arith.addf %429, %260 : vector<8x128xf32>
    %431 = arith.mulf %426, %430 : vector<8x128xf32>
    %432 = arith.addf %428, %431 : vector<8x128xf32>
    %433 = math.tanh %432 : vector<8x128xf32>
    %434 = arith.subf %411, %433 : vector<8x128xf32>
    %435 = arith.mulf %427, %434 : vector<8x128xf32>
    %436 = arith.addf %433, %435 : vector<8x128xf32>
    %c7_i32_104 = arith.constant 7 : i32
    %c8_i32_105 = arith.constant 8 : i32
    %437 = arith.muli %c7_i32_104, %c8_i32_105 : i32
    %438 = tpu.assume_multiple %437, 8 : i32
    %439 = arith.index_cast %438 : i32 to index
    %c0_106 = arith.constant 0 : index
    %440 = vector.load %arg13[%439, %c0_106] : memref<64x384xf32, #tpu.memory_space<vmem>>, vector<8x384xf32>
    %441 = arith.truncf %436 : vector<8x128xf32> to vector<8x128xbf16>
    %cst_107 = arith.constant dense<0.000000e+00> : vector<8x384xf32>
    %442 = tpu.matmul %441, %257, %cst_107 {dimension_numbers = #tpu.dot_dimension_numbers<[1], [0], [0], [1], [0, 0, 1, 1], [], []>} : vector<8x128xbf16>, vector<128x384xbf16>, vector<8x384xf32> -> vector<8x384xf32>
    %443 = vector.extract_strided_slice %440 {offsets = [0, 0], sizes = [8, 256], strides = [1, 1]} : vector<8x384xf32> to vector<8x256xf32>
    %444 = vector.extract_strided_slice %442 {offsets = [0, 0], sizes = [8, 256], strides = [1, 1]} : vector<8x384xf32> to vector<8x256xf32>
    %445 = arith.addf %443, %444 : vector<8x256xf32>
    %446 = arith.negf %445 : vector<8x256xf32>
    %447 = math.exp %446 : vector<8x256xf32>
    %cst_108 = arith.constant 1.000000e+00 : f32
    %448 = vector.broadcast %cst_108 : f32 to vector<8x256xf32>
    %449 = arith.addf %448, %447 : vector<8x256xf32>
    %450 = arith.divf %448, %449 : vector<8x256xf32>
    %451 = vector.extract_strided_slice %450 {offsets = [0, 0], sizes = [8, 128], strides = [1, 1]} : vector<8x256xf32> to vector<8x128xf32>
    %452 = vector.extract_strided_slice %450 {offsets = [0, 128], sizes = [8, 128], strides = [1, 1]} : vector<8x256xf32> to vector<8x128xf32>
    %453 = vector.extract_strided_slice %440 {offsets = [0, 256], sizes = [8, 128], strides = [1, 1]} : vector<8x384xf32> to vector<8x128xf32>
    %454 = vector.extract_strided_slice %442 {offsets = [0, 256], sizes = [8, 128], strides = [1, 1]} : vector<8x384xf32> to vector<8x128xf32>
    %455 = arith.addf %454, %260 : vector<8x128xf32>
    %456 = arith.mulf %451, %455 : vector<8x128xf32>
    %457 = arith.addf %453, %456 : vector<8x128xf32>
    %458 = math.tanh %457 : vector<8x128xf32>
    %459 = arith.subf %436, %458 : vector<8x128xf32>
    %460 = arith.mulf %452, %459 : vector<8x128xf32>
    %461 = arith.addf %458, %460 : vector<8x128xf32>
    %c8_i32_109 = arith.constant 8 : i32
    %462 = arith.truncf %461 : vector<8x128xf32> to vector<8x128xbf16>
    %c0_110 = arith.constant 0 : index
    %c0_111 = arith.constant 0 : index
    %463 = vector.load %arg9[%c0_110, %c0_111] : memref<128x128xbf16, #tpu.memory_space<vmem>>, vector<128x128xbf16>
    %cst_112 = arith.constant dense<0.000000e+00> : vector<8x128xf32>
    %464 = tpu.matmul %462, %463, %cst_112 {dimension_numbers = #tpu.dot_dimension_numbers<[1], [0], [0], [1], [0, 0, 1, 1], [], []>} : vector<8x128xbf16>, vector<128x128xbf16>, vector<8x128xf32> -> vector<8x128xf32>
    %c0_113 = arith.constant 0 : index
    %c0_114 = arith.constant 0 : index
    %465 = vector.load %arg10[%c0_113, %c0_114] : memref<1x128xf32, #tpu.memory_space<vmem>>, vector<1x128xf32>
    %466 = vector.broadcast %465 : vector<1x128xf32> to vector<8x128xf32>
    %467 = arith.addf %464, %466 : vector<8x128xf32>
    %c0_115 = arith.constant 0 : index
    %c0_116 = arith.constant 0 : index
    %468 = vector.load %arg11[%c0_115, %c0_116] : memref<8x128xf32, #tpu.memory_space<vmem>>, vector<8x128xf32>
    tpu.vector_store %arg11[%c0_115, %c0_116], %467 {strides = array<i32>} : memref<8x128xf32, #tpu.memory_space<vmem>>, vector<8x128xf32>,
    return
  }
}

</mosaic_0001>

<bundles_post_ra>
// kernel: tpu_custom_call.1
= control target key start
LH: loop header
LB: loop body
LE: loop exit
PB: predicated region body
PF: predicated region fallthrough
CT: control target
= control target key end

     0   :  { %16 = vsyncpa [#allocation5], 0  ;;  %s4970_s0 = inlined_call_operand.hbm [shape: f32[64,128], index: 0, kind: input, shape index: {}]   ;;  %s4971_s1 = inlined_call_operand.hbm [shape: bf16[128,384], index: 1, kind: input, shape index: {}]   ;;  %s4972_s2 = inlined_call_operand.hbm [shape: f32[1,384], index: 2, kind: input, shape index: {}]   ;;  %s4973_s3 = inlined_call_operand.hbm [shape: bf16[128,384], index: 3, kind: input, shape index: {}]   ;;  %s4974_s4 = inlined_call_operand.vmem [shape: f32[1,128], index: 4, kind: input, shape index: {}]   ;;  %s4975_s5 = inlined_call_operand.hbm [shape: bf16[128,384], index: 5, kind: input, shape index: {}]   ;;  %s4976_s6 = inlined_call_operand.vmem [shape: f32[1,384], index: 6, kind: input, shape index: {}]   ;;  %s4977_s7 = inlined_call_operand.hbm [shape: bf16[128,384], index: 7, kind: input, shape index: {}]   ;;  %s4978_s8 = inlined_call_operand.vmem [shape: f32[1,128], index: 8, kind: input, shape index: {}]   ;;  %s4979_s9 = inlined_call_operand.hbm [shape: bf16[128,128], index: 9, kind: input, shape index: {}]   ;;  %s4980_s10 = inlined_call_operand.vmem [shape: f32[1,128], index: 10, kind: input, shape index: {}]   ;;  %s4981_s11 = inlined_call_operand.hbm [shape: f32[8,128], index: 11, kind: output, shape index: {}]  }
   0x1   :  { %17 = vsyncpa [#allocation8], 0 }
   0x2   :  { %18 = vsyncpa [#allocation11], 0 }
   0x3   :  { %19 = vsyncpa [#allocation14], 0  ;;  %s38_s19 = sshll.u32 %s4971_s1, 4  ;;  %s39_s19 = int_to_ptr.hbm [resolvable:$true] %s38_s19 }
   0x4   :  { %20 = vsyncpa [#allocation6], 0  ;;  %s3800_s20 = smov [#allocation7]   ;;  %s62_s24 = sshll.u32 %s4973_s3, 4  ;;  %s63_s24 = int_to_ptr.hbm [resolvable:$true] %s62_s24 }
   0x5   :  { %s40_s21 = sshll.u32 %s3800_s20, 4  ;;  %s3801_s25 = smov 192   ;;  %s41_s21 = int_to_ptr.vmem [resolvable:$true] %s40_s21 }
   0x6   :  { %s3802_s26 = smov 12   ;;  %s3803_s27 = smov [#allocation10]  }
   0x7   :  { %46 = dma.hbm_to_vmem [thread:$0]  %s39_s19, 3072, %s41_s21, [#allocation8], %s3801_s25, %s3801_s25, %s3802_s26  }
   0x8   :  { %s64_s28 = sshll.u32 %s3803_s27, 4  ;;  %s92_s30 = sshll.u32 %s4977_s7, 4  ;;  %s65_s28 = int_to_ptr.vmem [resolvable:$true] %s64_s28  ;;  %s93_s30 = int_to_ptr.hbm [resolvable:$true] %s92_s30 }
   0x9   :  { %70 = dma.hbm_to_vmem [thread:$0]  %s63_s24, 3072, %s65_s28, [#allocation11], %s3801_s25, %s3801_s25, %s3802_s26  }
   0xa   :  { %s25_s13 = sshll.u32 %s4970_s0, 4  ;;  %s3804_s14 = smov [#allocation13]   ;;  %s26_s13 = int_to_ptr.hbm [resolvable:$true] %s25_s13 }
   0xb   :  { %s94_s15 = sshll.u32 %s3804_s14, 4  ;;  %s3805_s16 = smov [#allocation4]   ;;  %s95_s15 = int_to_ptr.vmem [resolvable:$true] %s94_s15 }
   0xc   :  { %100 = dma.hbm_to_vmem [thread:$0]  %s93_s30, 3072, %s95_s15, [#allocation14], %s3801_s25, %s3801_s25, %s3802_s26  }
   0xd   :  { %s27_s7 = sshll.u32 %s3805_s16, 4  ;;  %s3806_s17 = smov 128   ;;  %s28_s7 = int_to_ptr.vmem [resolvable:$true] %s27_s7 }
   0xe   :  { %s3807_s18 = smov 8   ;;  %s52_s21 = sshll.u32 %s4972_s2, 4  ;;  %s53_s21 = int_to_ptr.hbm [resolvable:$true] %s52_s21 }
   0xf   :  { %33 = dma.hbm_to_vmem [thread:$0]  %s26_s13, 1024, %s28_s7, [#allocation5], %s3806_s17, %s3806_s17, %s3807_s18  }
  0x10   :  { %s3808_s0 = smov [#allocation9]   ;;  %s77_s27 = sshll.u32 %s4975_s5, 4  ;;  %s78_s27 = int_to_ptr.hbm [resolvable:$true] %s77_s27 }
  0x11   :  { %s54_s22 = sshll.u32 %s3808_s0, 4  ;;  %s3809_s28 = smov [#allocation12]   ;;  %s55_s22 = int_to_ptr.vmem [resolvable:$true] %s54_s22 }
  0x12   :  { %57 = dma.hbm_to_vmem [thread:$0]  %s53_s21, 48, %s55_s22, [#allocation8]  }
  0x13   :  { %s79_s29 = sshll.u32 %s3809_s28, 4  ;;  %s107_s3 = sshll.u32 %s4979_s9, 4  ;;  %s80_s29 = int_to_ptr.vmem [resolvable:$true] %s79_s29  ;;  %s108_s3 = int_to_ptr.hbm [resolvable:$true] %s107_s3 }
  0x14   :  { %85 = dma.hbm_to_vmem [thread:$0]  %s78_s27, 3072, %s80_s29, [#allocation11], %s3801_s25, %s3801_s25, %s3802_s26  }
  0x15   :  { %s3810_s2 = smov [#allocation15]   ;;  %s3811_s13 = smov 64  }
  0x16   :  { %s109_s12 = sshll.u32 %s3810_s2, 4  ;;  %s3812_s14 = smov 4   ;;  %s110_s12 = int_to_ptr.vmem [resolvable:$true] %s109_s12 }
  0x17   :  { %115 = dma.hbm_to_vmem [thread:$0]  %s108_s3, 1024, %s110_s12, [#allocation14], %s3811_s13, %s3811_s13, %s3812_s14  }
  0x18   :  { %3790 = dma.done.wait [#allocation5], 1024  }
  0x19   :  { %3791 = vsyncadd [#allocation5], 4294966272 }
  0x1a   :  { %3792 = dma.done.wait [#allocation8], 3120  }
  0x1b   :  { %3793 = vsyncadd [#allocation8], 4294964176 }
  0x1c   :  { %3794 = dma.done.wait [#allocation11], 6144  }
  0x1d   :  { %3795 = vsyncadd [#allocation11], 4294961152 }
  0x1e   :  { %3796 = dma.done.wait [#allocation14], 4096  }
  0x1f   :  { %3797 = vsyncadd [#allocation14], 4294963200  ;;  %v2952_v0 = vld [vmem:[#allocation7 + $0xa8] sm:$0xf]  ;;  %v3336_v1 = vld [vmem:[#allocation7 + $0xb0] sm:$0xf0] }
  0x20   :  { %v3048_v2 = vld [vmem:[#allocation10 + $0xa8] sm:$0xf]  ;;  %v2953_v3 = vor.u32 %v3336_v1, %v2952_v0  ;;  %v3360_v4 = vld [vmem:[#allocation10 + $0xb0] sm:$0xf0]  ;;  %v2940_v5 = vld [vmem:[#allocation7 + $0x90] sm:$0xf] }
  0x21   :  { %v3333_v6 = vld [vmem:[#allocation7 + $0x98] sm:$0xf0]  ;;  %v3908_v7 = vor.u32 %v3360_v4, %v3048_v2  ;;  %v3036_v8 = vld [vmem:[#allocation10 + $0x90] sm:$0xf]  ;;  %v3357_v9 = vld [vmem:[#allocation10 + $0x98] sm:$0xf0] }
  0x22   :  { %327 = vmatpush.bf16.msra.mxu0 %v2953_v3  ;;  %v2941_v10 = vor.u32 %v3333_v6, %v2940_v5  ;;  %v3911_v11 = vor.u32 %v3357_v9, %v3036_v8  ;;  %v2928_v12 = vld [vmem:[#allocation7 + $0x78] sm:$0xf]  ;;  %v3330_v13 = vld [vmem:[#allocation7 + $0x80] sm:$0xf0]  ;;  %v3024_v14 = vld [vmem:[#allocation10 + $0x78] sm:$0xf] }
  0x23   :  { %648 = vmatpush.bf16.msra.mxu3 %v3908_v7  ;;  %v3354_v15 = vld [vmem:[#allocation10 + $0x80] sm:$0xf0]  ;;  %v2929_v16 = vor.u32 %v3330_v13, %v2928_v12  ;;  %v2916_v18 = vld [vmem:[#allocation7 + $0x60] sm:$0xf]  ;;  %v3327_v19 = vld [vmem:[#allocation7 + $0x68] sm:$0xf0] }
  0x24   :  { %v3914_v17 = vor.u32 %v3354_v15, %v3024_v14  ;;  %v3012_v20 = vld [vmem:[#allocation10 + $0x60] sm:$0xf]  ;;  %v3351_v21 = vld [vmem:[#allocation10 + $0x68] sm:$0xf0]  ;;  %v2917_v22 = vor.u32 %v3327_v19, %v2916_v18  ;;  %v2904_v24 = vld [vmem:[#allocation7 + $0x48] sm:$0xf] }
  0x25   :  { %v3917_v23 = vor.u32 %v3351_v21, %v3012_v20  ;;  %v3324_v25 = vld [vmem:[#allocation7 + $0x50] sm:$0xf0]  ;;  %v3335_v26 = vld [vmem:[#allocation7 + $0xac] sm:$0xf]  ;;  %v3348_v28 = vld [vmem:[#allocation10 + $0x50] sm:$0xf0] }
  0x26   :  { %328 = vmatpush.bf16.msra.mxu0 %v2941_v10  ;;  %v3000_v27 = vld [vmem:[#allocation10 + $0x48] sm:$0xf]  ;;  %v2954_v29 = vld [vmem:[#allocation7 + $0xb4] sm:$0xf0]  ;;  %v3332_v31 = vld [vmem:[#allocation7 + $0x94] sm:$0xf]  ;;  %v2905_v33 = vor.u32 %v3324_v25, %v2904_v24 }
  0x27   :  { %649 = vmatpush.bf16.msra.mxu3 %v3911_v11  ;;  %v2957_v30 = vor.u32 %v3335_v26, %v2954_v29  ;;  %v2942_v32 = vld [vmem:[#allocation7 + $0x9c] sm:$0xf0]  ;;  %v3920_v34 = vor.u32 %v3348_v28, %v3000_v27  ;;  %v2892_v35 = vld [vmem:[#allocation7 + $0x30] sm:$0xf]  ;;  %v3321_v36 = vld [vmem:[#allocation7 + $0x38] sm:$0xf0] }
  0x28   :  { %v2988_v37 = vld [vmem:[#allocation10 + $0x30] sm:$0xf]  ;;  %v2945_v38 = vor.u32 %v3332_v31, %v2942_v32  ;;  %v3345_v39 = vld [vmem:[#allocation10 + $0x38] sm:$0xf0]  ;;  %v3329_v40 = vld [vmem:[#allocation7 + $0x7c] sm:$0xf]  ;;  %v2893_v42 = vor.u32 %v3321_v36, %v2892_v35 }
  0x29   :  { %356 = vmatpush.bf16.msra.mxu1 %v2957_v30  ;;  %v2930_v41 = vld [vmem:[#allocation7 + $0x84] sm:$0xf0]  ;;  %v2880_v43 = vld [vmem:[#allocation7 + $0x18] sm:$0xf]  ;;  %v3318_v44 = vld [vmem:[#allocation7 + $0x20] sm:$0xf0]  ;;  %v3923_v45 = vor.u32 %v3345_v39, %v2988_v37 }
  0x2a   :  { %329 = vmatpush.bf16.msra.mxu0 %v2929_v16  ;;  %v2976_v46 = vld [vmem:[#allocation10 + $0x18] sm:$0xf]  ;;  %v3342_v47 = vld [vmem:[#allocation10 + $0x20] sm:$0xf0]  ;;  %v2933_v48 = vor.u32 %v3329_v40, %v2930_v41  ;;  %v3326_v49 = vld [vmem:[#allocation7 + $0x64] sm:$0xf]  ;;  %v2881_v56 = vor.u32 %v3318_v44, %v2880_v43 }
  0x2b   :  { %650 = vmatpush.bf16.msra.mxu3 %v3914_v17  ;;  %v2918_v50 = vld [vmem:[#allocation7 + $0x6c] sm:$0xf0]  ;;  %v3337_v52 = vld [vmem:[#allocation7 + $0xb8] sm:$0xf0]  ;;  %v2868_v53 = vld [vmem:[#allocation7] sm:$0xf]  ;;  %v3926_v59 = vor.u32 %v3342_v47, %v2976_v46 }
  0x2c   :  { %v2960_v51 = vld [vmem:[#allocation7 + $0xb0] sm:$0xf]  ;;  %v3315_v54 = vld [vmem:[#allocation7 + $0x8] sm:$0xf0]  ;;  %v2964_v57 = vld [vmem:[#allocation10] sm:$0xf]  ;;  %v2921_v62 = vor.u32 %v3326_v49, %v2918_v50 }
  0x2d   :  { %357 = vmatpush.bf16.msra.mxu1 %v2945_v38  ;;  %v2961_v55 = vor.u32 %v3337_v52, %v2960_v51  ;;  %v3339_v58 = vld [vmem:[#allocation10 + $0x8] sm:$0xf0]  ;;  %v3050_v61 = vld [vmem:[#allocation10 + $0xb4] sm:$0xf0]  ;;  %v3056_v63 = vld [vmem:[#allocation10 + $0xb0] sm:$0xf]  ;;  %v2869_v5 = vor.u32 %v3315_v54, %v2868_v53 }
  0x2e   :  { %330 = vmatpush.bf16.msra.mxu0 %v2917_v22  ;;  %v3359_v60 = vld [vmem:[#allocation10 + $0xac] sm:$0xf]  ;;  %v3361_v0 = vld [vmem:[#allocation10 + $0xb8] sm:$0xf0]  ;;  %v2948_v1 = vld [vmem:[#allocation7 + $0x98] sm:$0xf]  ;;  %v3929_v10 = vor.u32 %v3339_v58, %v2964_v57 }
  0x2f   :  { %651 = vmatpush.bf16.msra.mxu3 %v3917_v23  ;;  %385 = vmatpush.bf16.msra.mxu2 %v2961_v55  ;;  %v3323_v2 = vld [vmem:[#allocation7 + $0x4c] sm:$0xf]  ;;  %v2906_v3 = vld [vmem:[#allocation7 + $0x54] sm:$0xf0]  ;;  %v3334_v4 = vld [vmem:[#allocation7 + $0xa0] sm:$0xf0]  ;;  %v3931_v12 = vor.u32 %v3361_v0, %v3056_v63  ;;  %v3933_v15 = vor.u32 %v3359_v60, %v3050_v61 }
  0x30   :  { %v147_v6 = vld [vmem:[#allocation4] sm:$0xff]  ;;  %v148_v8 = vld [vmem:[#allocation4 + $0x8] sm:$0xff]  ;;  %v2949_v9 = vor.u32 %v3334_v4, %v2948_v1  ;;  %v3356_v13 = vld [vmem:[#allocation10 + $0x94] sm:$0xf]  ;;  %v2909_v18 = vor.u32 %v3323_v2, %v2906_v3  ;;  %v4982_v40 = vmov 0   ;;  %s3814_s19 = smov [#allocation16]  }
  0x31   :  { %358 = vmatpush.bf16.msra.mxu1 %v2933_v48  ;;  %v3044_v14 = vld [vmem:[#allocation10 + $0x98] sm:$0xf]  ;;  %v3358_v16 = vld [vmem:[#allocation10 + $0xa0] sm:$0xf0]  ;;  %v2936_v19 = vld [vmem:[#allocation7 + $0x80] sm:$0xf]  ;;  %v3935_v21 = vpack.c.bf16 %v148_v8, %v147_v6 }
  0x32   :  { %331 = vmatpush.bf16.msra.mxu0 %v2905_v33  ;;  %v3331_v20 = vld [vmem:[#allocation7 + $0x88] sm:$0xf0]  ;;  %v3038_v22 = vld [vmem:[#allocation10 + $0x9c] sm:$0xf0]  ;;  %v3320_v24 = vld [vmem:[#allocation7 + $0x34] sm:$0xf]  ;;  %v3939_v28 = vor.u32 %v3358_v16, %v3044_v14 }
  0x33   :  { %652 = vmatpush.bf16.msra.mxu3 %v3920_v34  ;;  %386 = vmatpush.bf16.msra.mxu2 %v2949_v9  ;;  %v2894_v25 = vld [vmem:[#allocation7 + $0x3c] sm:$0xf0]  ;;  %v2937_v26 = vor.u32 %v3331_v20, %v2936_v19  ;;  %v3032_v29 = vld [vmem:[#allocation10 + $0x80] sm:$0xf]  ;;  %v3942_v30 = vor.u32 %v3356_v13, %v3038_v22  ;;  %v3355_v31 = vld [vmem:[#allocation10 + $0x88] sm:$0xf0] }
  0x34   :  { %v3353_v27 = vld [vmem:[#allocation10 + $0x7c] sm:$0xf]  ;;  %v2897_v32 = vor.u32 %v3320_v24, %v2894_v25  ;;  %v2924_v33 = vld [vmem:[#allocation7 + $0x68] sm:$0xf]  ;;  %v3328_v35 = vld [vmem:[#allocation7 + $0x70] sm:$0xf0]  ;;  %v3947_v43 = vor.u32 %v3355_v31, %v3032_v29 }
  0x35   :  { %359 = vmatpush.bf16.msra.mxu1 %v2921_v62  ;;  %v3026_v36 = vld [vmem:[#allocation10 + $0x84] sm:$0xf0]  ;;  %v3317_v37 = vld [vmem:[#allocation7 + $0x1c] sm:$0xf]  ;;  %v2882_v38 = vld [vmem:[#allocation7 + $0x24] sm:$0xf0]  ;;  %v2925_v39 = vor.u32 %v3328_v35, %v2924_v33 }
  0x36   :  { %332 = vmatpush.bf16.msra.mxu0 %v2893_v42  ;;  %v2912_v41 = vld [vmem:[#allocation7 + $0x50] sm:$0xf]  ;;  %v3325_v42 = vld [vmem:[#allocation7 + $0x58] sm:$0xf0]  ;;  %v3950_v44 = vor.u32 %v3353_v27, %v3026_v36  ;;  %v3350_v46 = vld [vmem:[#allocation10 + $0x64] sm:$0xf]  ;;  %v2885_v49 = vor.u32 %v3317_v37, %v2882_v38 }
  0x37   :  { %653 = vmatpush.bf16.msra.mxu3 %v3923_v45  ;;  %387 = vmatpush.bf16.msra.mxu2 %v2937_v26  ;;  %v3020_v47 = vld [vmem:[#allocation10 + $0x68] sm:$0xf]  ;;  %v3352_v48 = vld [vmem:[#allocation10 + $0x70] sm:$0xf0]  ;;  %v3014_v50 = vld [vmem:[#allocation10 + $0x6c] sm:$0xf0]  ;;  %v2913_v53 = vor.u32 %v3325_v42, %v2912_v41 }
  0x38   :  { %v3314_v51 = vld [vmem:[#allocation7 + $0x4] sm:$0xf]  ;;  %v2870_v52 = vld [vmem:[#allocation7 + $0xc] sm:$0xf0]  ;;  %v2900_v54 = vld [vmem:[#allocation7 + $0x38] sm:$0xf]  ;;  %v3956_v57 = vor.u32 %v3350_v46, %v3014_v50 }
  0x39   :  { %360 = vmatpush.bf16.msra.mxu1 %v2909_v18  ;;  %v3322_v55 = vld [vmem:[#allocation7 + $0x40] sm:$0xf0]  ;;  %v2873_v58 = vor.u32 %v3314_v51, %v2870_v52  ;;  %v3008_v60 = vld [vmem:[#allocation10 + $0x50] sm:$0xf]  ;;  %v3349_v61 = vld [vmem:[#allocation10 + $0x58] sm:$0xf0] }
  0x3a   :  { %333 = vmatpush.bf16.msra.mxu0 %v2881_v56  ;;  %v3953_v56 = vor.u32 %v3352_v48, %v3020_v47  ;;  %v3347_v62 = vld [vmem:[#allocation10 + $0x4c] sm:$0xf]  ;;  %v3002_v63 = vld [vmem:[#allocation10 + $0x54] sm:$0xf0]  ;;  %v2901_v1 = vor.u32 %v3322_v55, %v2900_v54  ;;  %v2888_v3 = vld [vmem:[#allocation7 + $0x20] sm:$0xf] }
  0x3b   :  { %654 = vmatpush.bf16.msra.mxu3 %v3926_v59  ;;  %388 = vmatpush.bf16.msra.mxu2 %v2925_v39  ;;  %v149_v0 = vld [vmem:[#allocation4 + $0x10] sm:$0xff]  ;;  %v150_v2 = vld [vmem:[#allocation4 + $0x18] sm:$0xff]  ;;  %v3319_v4 = vld [vmem:[#allocation7 + $0x28] sm:$0xf0]  ;;  %v3962_v6 = vor.u32 %v3347_v62, %v3002_v63  ;;  %s2837_s20 = sshll.u32 %s3814_s19, 4  ;;  %s2839_s22 = sshll.u32 %s4981_s11, 4  ;;  %s2838_s20 = int_to_ptr.vmem [resolvable:$true] %s2837_s20  ;;  %s2840_s22 = int_to_ptr.hbm [resolvable:$true] %s2839_s22 }
  0x3c   :  { %v2996_v8 = vld [vmem:[#allocation10 + $0x38] sm:$0xf]  ;;  %v3346_v9 = vld [vmem:[#allocation10 + $0x40] sm:$0xf0]  ;;  %v156_v13 = vpack.c.bf16 %v150_v2, %v149_v0  ;;  %v3344_v14 = vld [vmem:[#allocation10 + $0x34] sm:$0xf]  ;;  %v2889_v18 = vor.u32 %v3319_v4, %v2888_v3 }
  0x3d   :  { %361 = vmatpush.bf16.msra.mxu1 %v2897_v32  ;;  %v2990_v16 = vld [vmem:[#allocation10 + $0x3c] sm:$0xf0]  ;;  %v3966_v19 = vor.u32 %v3346_v9, %v2996_v8  ;;  %v3341_v22 = vld [vmem:[#allocation10 + $0x1c] sm:$0xf]  ;;  %v2876_v24 = vld [vmem:[#allocation7 + $0x8] sm:$0xf] }
  0x3e   :  { %334 = vmatpush.bf16.msra.mxu0 %v2869_v5  ;;  %v3959_v5 = vor.u32 %v3349_v61, %v3008_v60  ;;  %v3969_v20 = vor.u32 %v3344_v14, %v2990_v16  ;;  %v3316_v25 = vld [vmem:[#allocation7 + $0x10] sm:$0xf0]  ;;  %v2978_v26 = vld [vmem:[#allocation10 + $0x24] sm:$0xf0]  ;;  %v2984_v27 = vld [vmem:[#allocation10 + $0x20] sm:$0xf] }
  0x3f   :  { %655 = vmatpush.bf16.msra.mxu3 %v3929_v10  ;;  %389 = vmatpush.bf16.msra.mxu2 %v2913_v53  ;;  %v3343_v29 = vld [vmem:[#allocation10 + $0x28] sm:$0xf0]  ;;  %v2877_v31 = vor.u32 %v3316_v25, %v2876_v24  ;;  %v3975_v33 = vor.u32 %v3341_v22, %v2978_v26  ;;  %v2972_v35 = vld [vmem:[#allocation10 + $0x8] sm:$0xf]  ;;  %v3340_v36 = vld [vmem:[#allocation10 + $0x10] sm:$0xf0] }
  0x40   :  { %v3972_v32 = vor.u32 %v3343_v29, %v2984_v27  ;;  %v3338_v37 = vld [vmem:[#allocation10 + $0x4] sm:$0xf]  ;;  %v2966_v38 = vld [vmem:[#allocation10 + $0xc] sm:$0xf0]  ;;  %v3978_v39 = vor.u32 %v3340_v36, %v2972_v35  ;;  %v151_v42 = vld [vmem:[#allocation4 + $0x20] sm:$0xff] }
  0x41   :  { %335 = vmatmul.bf16.vlgmr.msra.gmra.mxu0 %v3935_v21  ;;  %362 = vmatpush.bf16.msra.mxu1 %v2885_v49  ;;  %v3981_v41 = vor.u32 %v3338_v37, %v2966_v38  ;;  %v152_v46 = vld [vmem:[#allocation4 + $0x28] sm:$0xff]  ;;  %v154_v48 = vld [vmem:[#allocation4 + $0x38] sm:$0xff]  ;;  %v3134_v53 = vld [vmem:[#allocation12 + $0x90] sm:$0xf] }
  0x42   :  { %674 = vmatpush.bf16.msrb.mxu0 %v3931_v12  ;;  %656 = vmatmul.bf16.vlgmr.msra.gmra.mxu3 %v4982_v40  ;;  %v157_v47 = vpack.c.bf16 %v152_v46, %v151_v42  ;;  %v3146_v50 = vld [vmem:[#allocation12 + $0xa8] sm:$0xf]  ;;  %v3384_v51 = vld [vmem:[#allocation12 + $0xb0] sm:$0xf0]  ;;  %v3381_v54 = vld [vmem:[#allocation12 + $0x98] sm:$0xf0] }
  0x43   :  { %661 = vmatpush.bf16.msrb.mxu3 %v3933_v15  ;;  %390 = vmatpush.bf16.msra.mxu2 %v2901_v1  ;;  %v3996_v52 = vor.u32 %v3384_v51, %v3146_v50  ;;  %v3383_v55 = vld [vmem:[#allocation12 + $0xac] sm:$0xf]  ;;  %v3148_v60 = vld [vmem:[#allocation12 + $0xb4] sm:$0xf0]  ;;  %v4006_v63 = vld [vmem:[#allocation9] sm:$0x7] }
  0x44   :  { %v4001_v61 = vor.u32 %v3383_v55, %v3148_v60  ;;  %v4011_v2 = vperm.slane %v4006_v63, 0  ;;  %v3380_v3 = vld [vmem:[#allocation12 + $0x94] sm:$0xf]  ;;  %v3136_v4 = vld [vmem:[#allocation12 + $0x9c] sm:$0xf0] }
  0x45   :  { %363 = vmatpush.bf16.msra.mxu1 %v2873_v58  ;;  %v3999_v58 = vor.u32 %v3381_v54, %v3134_v53  ;;  %v4014_v9 = vor.u32 %v3380_v3, %v3136_v4  ;;  %v3378_v22 = vld [vmem:[#allocation12 + $0x80] sm:$0xf0]  ;;  %v3377_v24 = vld [vmem:[#allocation12 + $0x7c] sm:$0xf]  ;;  %v3124_v27 = vld [vmem:[#allocation12 + $0x84] sm:$0xf0] }
  0x46   :  { %675 = vmatpush.bf16.msrb.mxu0 %v3939_v28  ;;  %5008 = vst [vmem:[#allocation23_spill] sm:$0xff] %v4011_v2  ;;  %v4023_v29 = vor.u32 %v3377_v24, %v3124_v27  ;;  %v3110_v35 = vld [vmem:[#allocation12 + $0x60] sm:$0xf]  ;;  %v3375_v36 = vld [vmem:[#allocation12 + $0x68] sm:$0xf0]  ;;  %v4047_v4 = vperm.slane %v4006_v63, 1 }
  0x47   :  { %662 = vmatpush.bf16.msrb.mxu3 %v3942_v30  ;;  %391 = vmatpush.bf16.msra.mxu2 %v2889_v18  ;;  %v3122_v18 = vld [vmem:[#allocation12 + $0x78] sm:$0xf]  ;;  %v3374_v37 = vld [vmem:[#allocation12 + $0x64] sm:$0xf]  ;;  %v4028_v38 = vor.u32 %v3375_v36, %v3110_v35  ;;  %v3112_v42 = vld [vmem:[#allocation12 + $0x6c] sm:$0xf0] }
  0x48   :  { %364 = vmatmul.bf16.vlgmr.msra.gmra.mxu1 %v3935_v21  ;;  %v4021_v26 = vor.u32 %v3378_v22, %v3122_v18  ;;  %v3154_v46 = vld [vmem:[#allocation12 + $0xb0] sm:$0xf]  ;;  %v3098_v50 = vld [vmem:[#allocation12 + $0x48] sm:$0xf]  ;;  %v3372_v51 = vld [vmem:[#allocation12 + $0x50] sm:$0xf0] }
  0x49   :  { %863 = vmatpush.bf16.msrb.mxu1 %v3996_v52  ;;  %v3371_v53 = vld [vmem:[#allocation12 + $0x4c] sm:$0xf]  ;;  %v4039_v54 = vor.u32 %v3372_v51, %v3098_v50  ;;  %v3100_v55 = vld [vmem:[#allocation12 + $0x54] sm:$0xf0]  ;;  %5014 = vst [vmem:[#allocation29_spill] sm:$0xff] %v4047_v4 }
  0x4a   :  { %676 = vmatpush.bf16.msrb.mxu0 %v3947_v43  ;;  %v3142_v60 = vld [vmem:[#allocation12 + $0x98] sm:$0xf]  ;;  %v3088_v18 = vld [vmem:[#allocation12 + $0x3c] sm:$0xf0]  ;;  %v3379_v24 = vld [vmem:[#allocation12 + $0x88] sm:$0xf0] }
  0x4b   :  { %663 = vmatpush.bf16.msrb.mxu3 %v3950_v44  ;;  %392 = vmatpush.bf16.msra.mxu2 %v2877_v31  ;;  %5012 = vst [vmem:[#allocation27_spill] sm:$0xff] %v4039_v54  ;;  %v3130_v22 = vld [vmem:[#allocation12 + $0x80] sm:$0xf]  ;;  %v3074_v50 = vld [vmem:[#allocation12 + $0x18] sm:$0xf] }
  0x4c   :  { %v4057_v35 = vor.u32 %v3379_v24, %v3130_v22  ;;  %v3366_v51 = vld [vmem:[#allocation12 + $0x20] sm:$0xf0] }
  0x4d   :  { %864 = vmatpush.bf16.msrb.mxu1 %v3999_v58 }
  0x4e   :  { %677 = vmatpush.bf16.msrb.mxu0 %v3953_v56  ;;  %393 = vmatmul.bf16.vlgmr.msra.gmra.mxu2 %v3935_v21  ;;  %v153_v21 = vld [vmem:[#allocation4 + $0x30] sm:$0xff] }
  0x4f   :  { %664 = vmatpush.bf16.msrb.mxu3 %v3956_v57  ;;  %v158_v49 = vpack.c.bf16 %v154_v48, %v153_v21  ;;  %876 = vmatpush.bf16.msrb.mxu2 %v4001_v61  ;;  %v4030_v21 = vor.u32 %v3374_v37, %v3112_v42 }
  0x51   :  { %340 = vmatmul.bf16.gmra.mxu0 %v156_v13  ;;  %865 = vmatpush.bf16.msrb.mxu1 %v4021_v26  ;;  %5010 = vst [vmem:[#allocation25_spill] sm:$0xff] %v4030_v21 }
  0x52   :  { %678 = vmatpush.bf16.msrb.mxu0 %v3959_v5 }
  0x53   :  { %665 = vmatpush.bf16.msrb.mxu3 %v3962_v6  ;;  %877 = vmatpush.bf16.msrb.mxu2 %v4014_v9 }
  0x55   :  { %866 = vmatpush.bf16.msrb.mxu1 %v4028_v38 }
  0x56   :  { %679 = vmatpush.bf16.msrb.mxu0 %v3966_v19 }
  0x57   :  { %666 = vmatpush.bf16.msrb.mxu3 %v3969_v20  ;;  %878 = vmatpush.bf16.msrb.mxu2 %v4023_v29 }
  0x58   :  { %369 = vmatmul.bf16.gmra.mxu1 %v156_v13 }
  0x59   :  { %867 = vmatpush.bf16.msrb.mxu1 %v4039_v54 }
  0x5a   :  { %680 = vmatpush.bf16.msrb.mxu0 %v3972_v32 }
  0x5b   :  { %667 = vmatpush.bf16.msrb.mxu3 %v3975_v33  ;;  %879 = vmatpush.bf16.msrb.mxu2 %v4030_v21 }
  0x5e   :  { %681 = vmatpush.bf16.msrb.mxu0 %v3978_v39  ;;  %398 = vmatmul.bf16.gmra.mxu2 %v156_v13 }
  0x5f   :  { %668 = vmatpush.bf16.msrb.mxu3 %v3981_v41 }
  0x61   :  { %345 = vmatmul.bf16.gmra.mxu0 %v157_v47 }
  0x62   :  { %913 = vmatpush.bf16.msra.mxu0 %v3908_v7  ;;  %669 = vmatmul.bf16.vlgmr.msrb.gmra.mxu3 %v4982_v40 }
  0x66   :  { %914 = vmatpush.bf16.msra.mxu0 %v3911_v11 }
  0x68   :  { %374 = vmatmul.bf16.gmra.mxu1 %v157_v47 }
  0x6a   :  { %915 = vmatpush.bf16.msra.mxu0 %v3914_v17 }
  0x6e   :  { %916 = vmatpush.bf16.msra.mxu0 %v3917_v23  ;;  %403 = vmatmul.bf16.gmra.mxu2 %v157_v47  ;;  %v3385_v47 = vld [vmem:[#allocation12 + $0xb8] sm:$0xf0] }
  0x6f   :  { %v4032_v48 = vor.u32 %v3385_v47, %v3154_v46 }
  0x71   :  { %350 = vmatmul.bf16.gmra.mxu0 %v158_v49  ;;  %889 = vmatpush.bf16.msra.mxu3 %v4032_v48 }
  0x72   :  { %917 = vmatpush.bf16.msra.mxu0 %v3920_v34 }
  0x76   :  { %918 = vmatpush.bf16.msra.mxu0 %v3923_v45 }
  0x78   :  { %379 = vmatmul.bf16.gmra.mxu1 %v158_v49 }
  0x7a   :  { %919 = vmatpush.bf16.msra.mxu0 %v3926_v59 }
  0x7e   :  { %920 = vmatpush.bf16.msra.mxu0 %v3929_v10  ;;  %408 = vmatmul.bf16.gmra.mxu2 %v158_v49 }
  0x81   :  { %682 = vmatmul.bf16.vlgmr.msrb.gmra.mxu0 %v4982_v40  ;;  %v3367_v40 = vld [vmem:[#allocation12 + $0x28] sm:$0xf0] }
  0x82   :  { %1013 = vmatpush.bf16.msrb.mxu0 %v4001_v61 }
  0x86   :  { %1014 = vmatpush.bf16.msrb.mxu0 %v4014_v9 }
  0x8a   :  { %1015 = vmatpush.bf16.msrb.mxu0 %v4023_v29 }
  0x8e   :  { %1016 = vmatpush.bf16.msrb.mxu0 %v4030_v21 }
  0xbe   :  { %v336_v62 = vpop.f32.mrf.mxu0 }
  0xbf   :  { %v337_v8 = vadd.f32 %v336_v62, %v4011_v2  ;;  %v3382_v62 = vld [vmem:[#allocation12 + $0xa0] sm:$0xf0] }
  0xc0   :  { %v4044_v3 = vor.u32 %v3382_v62, %v3142_v60  ;;  %v4069_v60 = vor.u32 %v3366_v51, %v3074_v50  ;;  %v3076_v62 = vld [vmem:[#allocation12 + $0x24] sm:$0xf0]  ;;  %v3064_v51 = vld [vmem:[#allocation12 + $0xc] sm:$0xf0] }
  0xc2   :  { %890 = vmatpush.bf16.msra.mxu3 %v4044_v3  ;;  %5018 = vst [vmem:[#allocation33_spill] sm:$0xff] %v4069_v60 }
  0xc5   :  { %v657_v0 = vpop.f32.mrf.mxu3  ;;  %v365_v27 = vpop.f32.mrf.mxu1 }
  0xc6   :  { %v4008_v1 = vpop.f32.mrf.mxu0  ;;  %v687_v13 = vadd.f32 %v657_v0, %v337_v8  ;;  %v4042_v0 = vor.u32 %v3371_v53, %v3100_v55  ;;  %v3086_v8 = vld [vmem:[#allocation12 + $0x30] sm:$0xf]  ;;  %891 = vmatpush.bf16.msra.mxu3 %v4057_v35  ;;  %v366_v46 = vadd.f32 %v365_v27, %v4047_v4  ;;  %v3365_v53 = vld [vmem:[#allocation12 + $0x1c] sm:$0xf]  ;;  %v3062_v27 = vld [vmem:[#allocation12] sm:$0xf] }
  0xc7   :  { %5007 = vst [vmem:[#allocation22_spill] sm:$0xff] %v4008_v1 }
  0xc8   :  { %v3058_v31 = vmul.f32 -1.442695, %v687_v13  ;;  %5013 = vst [vmem:[#allocation28_spill] sm:$0xff] %v4042_v0  ;;  %880 = vmatpush.bf16.msrb.mxu2 %v4042_v0  ;;  %v3369_v13 = vld [vmem:[#allocation12 + $0x38] sm:$0xf0]  ;;  %1017 = vmatpush.bf16.msrb.mxu0 %v4042_v0 }
  0xca   :  { %3436 = vpow2.f32 %v3058_v31 }
  0xcd   :  { %v659_v14 = vpop.f32.mrf.mxu3 }
  0xce   :  { %v341_v16 = vpop.f32.mrf.mxu0  ;;  %v3368_v14 = vld [vmem:[#allocation12 + $0x34] sm:$0xf] }
  0xcf   :  { %v4019_v25 = vadd.f32 %v341_v16, %v4011_v2  ;;  %v4052_v16 = vor.u32 %v3369_v13, %v3086_v8  ;;  %v4055_v31 = vor.u32 %v3368_v14, %v3088_v18  ;;  %v3118_v8 = vld [vmem:[#allocation12 + $0x68] sm:$0xf]  ;;  %v3376_v13 = vld [vmem:[#allocation12 + $0x70] sm:$0xf0]  ;;  %v4071_v18 = vor.u32 %v3365_v53, %v3076_v62  ;;  %v3106_v53 = vld [vmem:[#allocation12 + $0x50] sm:$0xf] }
  0xd0   :  { %v3437_v36 = vpop.eup %3436  ;;  %v4073_v22 = vor.u32 %v3376_v13, %v3118_v8  ;;  %v3373_v62 = vld [vmem:[#allocation12 + $0x58] sm:$0xf0] }
  0xd1   :  { %5009 = vst [vmem:[#allocation24_spill] sm:$0xff] %v4019_v25  ;;  %868 = vmatpush.bf16.msrb.mxu1 %v4052_v16  ;;  %881 = vmatpush.bf16.msrb.mxu2 %v4055_v31  ;;  %v4067_v47 = vadd.f32 1.0, %v3437_v36  ;;  %v3363_v36 = vld [vmem:[#allocation12 + $0x8] sm:$0xf0]  ;;  %v4087_v8 = vor.u32 %v3373_v62, %v3106_v53  ;;  %v394_v4 = vpop.f32.mrf.mxu2 }
  0xd2   :  { %5015 = vst [vmem:[#allocation30_spill] sm:$0xff] %v4052_v16  ;;  %1018 = vmatpush.bf16.msrb.mxu0 %v4055_v31  ;;  %892 = vmatpush.bf16.msra.mxu3 %v4073_v22  ;;  %v4081_v50 = vor.u32 %v3363_v36, %v3062_v27  ;;  %v3094_v27 = vld [vmem:[#allocation12 + $0x38] sm:$0xf]  ;;  %v3370_v36 = vld [vmem:[#allocation12 + $0x40] sm:$0xf0] }
  0xd3   :  { %5016 = vst [vmem:[#allocation31_spill] sm:$0xff] %v4055_v31  ;;  %3438 = vrcp.f32 %v4067_v47  ;;  %vm702_vm1 = vweird.f32 %v4067_v47 }
  0xd4   :  { %5019 = vst [vmem:[#allocation34_spill] sm:$0xff] %v4071_v18 }
  0xd5   :  { %869 = vmatpush.bf16.msrb.mxu1 %v4069_v60  ;;  %882 = vmatpush.bf16.msrb.mxu2 %v4071_v18  ;;  %5021 = vst [vmem:[#allocation36_spill] sm:$0xff] %v4081_v50 }
  0xd6   :  { %v4035_v49 = vpop.f32.mrf.mxu0  ;;  %1019 = vmatpush.bf16.msrb.mxu0 %v4071_v18  ;;  %893 = vmatpush.bf16.msra.mxu3 %v4087_v8 }
  0xd7   :  { %5011 = vst [vmem:[#allocation26_spill] sm:$0xff] %v4035_v49 }
  0xd9   :  { %870 = vmatpush.bf16.msrb.mxu1 %v4081_v50  ;;  %v3439_v13 = vpop.eup %3438 }
  0xda   :  { %vm703_vm0 = vweird.f32 %v3439_v13 }
  0xdb   :  { %vm704_vm2 = vmor %vm702_vm1, %vm703_vm0 }
  0xdd   :  { %926 = vmatpush.bf16.msra.mxu1 %v3933_v15 }
  0xde   :  { %v346_v37 = vpop.f32.mrf.mxu0 }
  0xdf   :  { %v4063_v42 = vadd.f32 %v346_v37, %v4011_v2 }
  0xe1   :  { %5017 = vst [vmem:[#allocation32_spill] sm:$0xff] %v4063_v42  ;;  %927 = vmatpush.bf16.msra.mxu1 %v3942_v30  ;;  %v3364_v42 = vld [vmem:[#allocation12 + $0x10] sm:$0xf0] }
  0xe5   :  { %v670_v55 = vpop.f32.mrf.mxu3  ;;  %928 = vmatpush.bf16.msra.mxu1 %v3950_v44 }
  0xe6   :  { %v688_v14 = vadd.f32 %v670_v55, %v366_v46  ;;  %v4079_v37 = vpop.f32.mrf.mxu0  ;;  %v3362_v46 = vld [vmem:[#allocation12 + $0x4] sm:$0xf] }
  0xe7   :  { %5020 = vst [vmem:[#allocation35_spill] sm:$0xff] %v4079_v37  ;;  %v4084_v55 = vor.u32 %v3362_v46, %v3064_v51  ;;  %v698_v51 = vmul.f32 %v3439_v13, %v4067_v47 }
  0xe8   :  { %v3059_v24 = vmul.f32 -1.442695, %v688_v14 }
  0xe9   :  { %5022 = vst [vmem:[#allocation37_spill] sm:$0xff] %v4084_v55  ;;  %883 = vmatpush.bf16.msrb.mxu2 %v4084_v55  ;;  %1020 = vmatpush.bf16.msrb.mxu0 %v4084_v55 }
  0xea   :  { %3440 = vpow2.f32 %v3059_v24  ;;  %v4093_v24 = vor.u32 %v3370_v36, %v3094_v27  ;;  %v699_v36 = vsub.f32 1.0, %v698_v51  ;;  %929 = vmatpush.bf16.msra.mxu1 %v3956_v57 }
  0xec   :  { %894 = vmatpush.bf16.msra.mxu3 %v4093_v24  ;;  %v700_v25 = vmul.f32 %v3439_v13, %v699_v36  ;;  %v4124_v36 = vperm.slane %v4006_v63, 2 }
  0xed   :  { %v672_v14 = vpop.f32.mrf.mxu3  ;;  %939 = vmatpush.bf16.msra.mxu2 %v3931_v12 }
  0xee   :  { %v351_v62 = vpop.f32.mrf.mxu0  ;;  %v3082_v14 = vld [vmem:[#allocation12 + $0x20] sm:$0xf]  ;;  %v701_v51 = vadd.f32 %v3439_v13, %v700_v25  ;;  %930 = vmatpush.bf16.msra.mxu1 %v3962_v6  ;;  %v706_v25 = vand.u32 2147483647, %v4067_v47 }
  0xef   :  { %v4103_v37 = vadd.f32 %v351_v62, %v4011_v2  ;;  %v4105_v27 = vor.u32 %v3367_v40, %v3082_v14  ;;  %v395_v2 = vadd.f32 %v394_v4, %v4124_v36 }
  0xf0   :  { %v3441_v46 = vpop.eup %3440  ;;  %vm707_vm3 = vcmp.eq.f32.partialorder %v706_v25, 8.507059e+37 }
  0xf1   :  { %v4098_v53 = vadd.f32 1.0, %v3441_v46  ;;  %940 = vmatpush.bf16.msra.mxu2 %v3939_v28  ;;  %5023 = vst [vmem:[#allocation38_spill] sm:$0xff] %v4103_v37  ;;  %895 = vmatpush.bf16.msra.mxu3 %v4105_v27  ;;  %v3070_v46 = vld [vmem:[#allocation12 + $0x8] sm:$0xf] }
  0xf2   :  { %v4111_v49 = vor.u32 %v3364_v42, %v3070_v46  ;;  %v708_v42 = vand.u32 2147483648, %v4067_v47  ;;  %v4129_v46 = vld [vmem:[%s4974_s4] ss:$0 sm:$0xff]  ;;  %931 = vmatpush.bf16.msra.mxu1 %v3969_v20 }
  0xf3   :  { %3442 = vrcp.f32 %v4098_v53  ;;  %vm717_vm4 = vweird.f32 %v4098_v53  ;;  %v723_v4 = vand.u32 2147483648, %v4098_v53 }
  0xf4   :  { %v709_v63 = vor.u32 1.1754944e-38, %v708_v42 }
  0xf5   :  { %941 = vmatpush.bf16.msra.mxu2 %v3947_v43  ;;  %896 = vmatpush.bf16.msra.mxu3 %v4111_v49 }
  0xf6   :  { %v4114_v62 = vpop.f32.mrf.mxu0  ;;  %932 = vmatpush.bf16.msra.mxu1 %v3975_v33 }
  0xf7   :  { %5024 = vst [vmem:[#allocation39_spill] sm:$0xff] %v4114_v62  ;;  %v705_v62 = vsel %vm704_vm2, %v3439_v13, %v701_v51 }
  0xf8   :  { %v710_v47 = vsel %vm707_vm3, %v709_v63, %v705_v62  ;;  %v721_v62 = vand.u32 2147483647, %v4098_v53 }
  0xf9   :  { %942 = vmatpush.bf16.msra.mxu2 %v3953_v56  ;;  %v3443_v40 = vpop.eup %3442  ;;  %1000 = vmatpush.bf16.msrb.mxu3 %v3996_v52 }
  0xfa   :  { %v713_v14 = vmul.f32 %v3443_v40, %v4098_v53  ;;  %vm718_vm5 = vweird.f32 %v3443_v40  ;;  %933 = vmatpush.bf16.msra.mxu1 %v3981_v41  ;;  %vm722_vm7 = vcmp.eq.f32.partialorder %v721_v62, 8.507059e+37 }
  0xfb   :  { %vm719_vm6 = vmor %vm717_vm4, %vm718_vm5 }
  0xfc   :  { %v714_v37 = vsub.f32 1.0, %v713_v14 }
  0xfd   :  { %943 = vmatpush.bf16.msra.mxu2 %v3959_v5  ;;  %1001 = vmatpush.bf16.msrb.mxu3 %v3999_v58 }
  0xfe   :  { %v683_v1 = vpop.f32.mrf.mxu0  ;;  %v715_v13 = vmul.f32 %v3443_v40, %v714_v37 }
  0xff   :  { %v727_v55 = vadd.f32 %v4129_v46, %v683_v1 }
 0x100   :  { %v716_v1 = vadd.f32 %v3443_v40, %v715_v13  ;;  %v5026_v13 = vld [vmem:[#allocation37_spill] sm:$0xff] }
 0x101   :  { %944 = vmatpush.bf16.msra.mxu2 %v3966_v19  ;;  %1002 = vmatpush.bf16.msrb.mxu3 %v4021_v26  ;;  %v728_v18 = vmul.f32 %v727_v55, %v710_v47  ;;  %v367_v47 = vpop.f32.mrf.mxu1 }
 0x103   :  { %v729_v51 = vadd.f32 %v728_v18, %v395_v2  ;;  %v724_v2 = vor.u32 1.1754944e-38, %v723_v4  ;;  %v720_v18 = vsel %vm719_vm6, %v3443_v40, %v716_v1  ;;  %v5025_v40 = vld [vmem:[#allocation34_spill] sm:$0xff] }
 0x105   :  { %945 = vmatpush.bf16.msra.mxu2 %v3972_v32  ;;  %1003 = vmatpush.bf16.msrb.mxu3 %v4028_v38  ;;  %3444 = vtanh.f32 %v729_v51  ;;  %v725_v42 = vsel %vm722_vm7, %v724_v2, %v720_v18  ;;  %v396_v51 = vpop.f32.mrf.mxu2 }
 0x106   :  { %v685_v55 = vpop.f32.mrf.mxu0 }
 0x109   :  { %946 = vmatpush.bf16.msra.mxu2 %v3978_v39  ;;  %1004 = vmatpush.bf16.msrb.mxu3 %v4039_v54  ;;  %v4203_v4 = vpop.f32.mrf.mxu1 }
 0x10a   :  { %5027 = vst [vmem:[#allocation40_spill] sm:$0xff] %v4203_v4 }
 0x10b   :  { %v3445_v37 = vpop.eup %3444 }
 0x10c   :  { %v731_v14 = vsub.f32 0.0, %v3445_v37 }
 0x10d   :  { %1005 = vmatpush.bf16.msrb.mxu3 %v4052_v16  ;;  %v4205_v1 = vpop.f32.mrf.mxu2 }
 0x10e   :  { %v732_v25 = vmul.f32 %v731_v14, %v725_v42  ;;  %5028 = vst [vmem:[#allocation41_spill] sm:$0xff] %v4205_v1  ;;  %v5039_v1 = vld [vmem:[#allocation23_spill] sm:$0xff] }
 0x110   :  { %v4150_v63 = vadd.f32 %v3445_v37, %v732_v25 }
 0x111   :  { %1006 = vmatpush.bf16.msrb.mxu3 %v4069_v60  ;;  %v4207_v62 = vpop.f32.mrf.mxu1 }
 0x112   :  { %v734_v53 = vpack.c.bf16 %v4150_v63, %v4150_v63  ;;  %5029 = vst [vmem:[#allocation42_spill] sm:$0xff] %v4207_v62  ;;  %v5040_v62 = vld [vmem:[#allocation22_spill] sm:$0xff] }
 0x114   :  { %871 = vmatmul.bf16.vlgmr.msrb.gmra.mxu1 %v734_v53  ;;  %884 = vmatmul.bf16.vlgmr.msrb.gmra.mxu2 %v734_v53 }
 0x115   :  { %1007 = vmatpush.bf16.msrb.mxu3 %v4081_v50  ;;  %921 = vmatmul.bf16.vlgmr.msra.gmra.mxu0 %v734_v53  ;;  %v4209_v55 = vpop.f32.mrf.mxu2 }
 0x116   :  { %897 = vmatmul.bf16.vlgmr.msra.gmra.mxu3 %v734_v53  ;;  %1026 = vmatpush.bf16.msrb.mxu1 %v4032_v48  ;;  %5030 = vst [vmem:[#allocation43_spill] sm:$0xff] %v4209_v55 }
 0x117   :  { %1050 = vmatpush.bf16.msrb.mxu2 %v3908_v7  ;;  %1076 = vmatpush.bf16.msra.mxu0 %v3931_v12 }
 0x119   :  { %1063 = vmatpush.bf16.msra.mxu3 %v3933_v15  ;;  %v4211_v2 = vpop.f32.mrf.mxu1 }
 0x11a   :  { %1027 = vmatpush.bf16.msrb.mxu1 %v4044_v3  ;;  %5031 = vst [vmem:[#allocation44_spill] sm:$0xff] %v4211_v2 }
 0x11b   :  { %1051 = vmatpush.bf16.msrb.mxu2 %v3911_v11  ;;  %1077 = vmatpush.bf16.msra.mxu0 %v3939_v28 }
 0x11d   :  { %1064 = vmatpush.bf16.msra.mxu3 %v3942_v30  ;;  %v4213_v18 = vpop.f32.mrf.mxu2 }
 0x11e   :  { %1028 = vmatpush.bf16.msrb.mxu1 %v4057_v35  ;;  %5032 = vst [vmem:[#allocation45_spill] sm:$0xff] %v4213_v18 }
 0x11f   :  { %1052 = vmatpush.bf16.msrb.mxu2 %v3914_v17  ;;  %1078 = vmatpush.bf16.msra.mxu0 %v3947_v43 }
 0x121   :  { %1065 = vmatpush.bf16.msra.mxu3 %v3950_v44  ;;  %v4215_v37 = vpop.f32.mrf.mxu1 }
 0x122   :  { %1029 = vmatpush.bf16.msrb.mxu1 %v4073_v22  ;;  %5033 = vst [vmem:[#allocation46_spill] sm:$0xff] %v4215_v37 }
 0x123   :  { %1053 = vmatpush.bf16.msrb.mxu2 %v3917_v23  ;;  %1079 = vmatpush.bf16.msra.mxu0 %v3953_v56 }
 0x124   :  { %934 = vmatmul.bf16.vlgmr.msra.gmra.mxu1 %v734_v53  ;;  %947 = vmatmul.bf16.vlgmr.msra.gmra.mxu2 %v734_v53 }
 0x125   :  { %1066 = vmatpush.bf16.msra.mxu3 %v3956_v57  ;;  %v4217_v14 = vpop.f32.mrf.mxu2 }
 0x126   :  { %1030 = vmatpush.bf16.msrb.mxu1 %v4087_v8  ;;  %5034 = vst [vmem:[#allocation47_spill] sm:$0xff] %v4217_v14 }
 0x127   :  { %1054 = vmatpush.bf16.msrb.mxu2 %v3920_v34  ;;  %1080 = vmatpush.bf16.msra.mxu0 %v3959_v5 }
 0x129   :  { %1067 = vmatpush.bf16.msra.mxu3 %v3962_v6  ;;  %v4219_v42 = vpop.f32.mrf.mxu1 }
 0x12a   :  { %1031 = vmatpush.bf16.msrb.mxu1 %v4093_v24  ;;  %5035 = vst [vmem:[#allocation48_spill] sm:$0xff] %v4219_v42 }
 0x12b   :  { %1055 = vmatpush.bf16.msrb.mxu2 %v3923_v45  ;;  %1081 = vmatpush.bf16.msra.mxu0 %v3966_v19 }
 0x12d   :  { %1068 = vmatpush.bf16.msra.mxu3 %v3969_v20  ;;  %v4221_v25 = vpop.f32.mrf.mxu2 }
 0x12e   :  { %1032 = vmatpush.bf16.msrb.mxu1 %v4105_v27  ;;  %5036 = vst [vmem:[#allocation49_spill] sm:$0xff] %v4221_v25 }
 0x12f   :  { %1056 = vmatpush.bf16.msrb.mxu2 %v3926_v59  ;;  %1082 = vmatpush.bf16.msra.mxu0 %v3972_v32 }
 0x131   :  { %1069 = vmatpush.bf16.msra.mxu3 %v3975_v33  ;;  %v4223_v53 = vpop.f32.mrf.mxu1 }
 0x132   :  { %1033 = vmatpush.bf16.msrb.mxu1 %v4111_v49  ;;  %5037 = vst [vmem:[#allocation50_spill] sm:$0xff] %v4223_v53 }
 0x133   :  { %1057 = vmatpush.bf16.msrb.mxu2 %v3929_v10  ;;  %1083 = vmatpush.bf16.msra.mxu0 %v3978_v39 }
 0x135   :  { %1070 = vmatpush.bf16.msra.mxu3 %v3981_v41  ;;  %v4225_v4 = vpop.f32.mrf.mxu2 }
 0x136   :  { %1137 = vmatpush.bf16.msra.mxu1 %v3996_v52  ;;  %5038 = vst [vmem:[#allocation51_spill] sm:$0xff] %v4225_v4 }
 0x137   :  { %1150 = vmatpush.bf16.msra.mxu2 %v4001_v61 }
 0x13a   :  { %1138 = vmatpush.bf16.msra.mxu1 %v3999_v58 }
 0x13b   :  { %1151 = vmatpush.bf16.msra.mxu2 %v4014_v9 }
 0x13e   :  { %1139 = vmatpush.bf16.msra.mxu1 %v4021_v26 }
 0x13f   :  { %1152 = vmatpush.bf16.msra.mxu2 %v4023_v29 }
 0x142   :  { %1140 = vmatpush.bf16.msra.mxu1 %v4028_v38 }
 0x143   :  { %1153 = vmatpush.bf16.msra.mxu2 %v4030_v21 }
 0x146   :  { %1141 = vmatpush.bf16.msra.mxu1 %v4039_v54 }
 0x147   :  { %1154 = vmatpush.bf16.msra.mxu2 %v4042_v0 }
 0x14a   :  { %1142 = vmatpush.bf16.msra.mxu1 %v4052_v16 }
 0x14b   :  { %1155 = vmatpush.bf16.msra.mxu2 %v4055_v31  ;;  %v5044_v31 = vld [vmem:[#allocation29_spill] sm:$0xff] }
 0x14c   :  { %v368_v4 = vadd.f32 %v367_v47, %v5044_v31 }
 0x14e   :  { %1143 = vmatpush.bf16.msra.mxu1 %v4069_v60 }
 0x14f   :  { %1156 = vmatpush.bf16.msra.mxu2 %v5025_v40 }
 0x152   :  { %1144 = vmatpush.bf16.msra.mxu1 %v4081_v50 }
 0x153   :  { %1157 = vmatpush.bf16.msra.mxu2 %v5026_v13  ;;  %v339_v13 = vadd.f32 %v5040_v62, %v5039_v1 }
 0x191   :  { %v4229_v55 = vpop.f32.mrf.mxu1 }
 0x192   :  { %5041 = vst [vmem:[#allocation22_spill] sm:$0xff] %v4229_v55  ;;  %v922_v2 = vpop.f32.mrf.mxu0 }
 0x193   :  { %v952_v50 = vadd.f32 %v922_v2, %v339_v13 }
 0x195   :  { %v3156_v18 = vmul.f32 -1.442695, %v952_v50 }
 0x197   :  { %3446 = vpow2.f32 %v3156_v18  ;;  %v4231_v37 = vpop.f32.mrf.mxu2 }
 0x198   :  { %5042 = vst [vmem:[#allocation52_spill] sm:$0xff] %v4231_v37 }
 0x199   :  { %v4233_v14 = vpop.f32.mrf.mxu3  ;;  %v874_v42 = vpop.f32.mrf.mxu1 }
 0x19a   :  { %5043 = vst [vmem:[#allocation53_spill] sm:$0xff] %v4233_v14  ;;  %v924_v40 = vpop.f32.mrf.mxu0 }
 0x19d   :  { %v3447_v25 = vpop.eup %3446 }
 0x19e   :  { %v960_v60 = vadd.f32 1.0, %v3447_v25 }
 0x19f   :  { %v887_v53 = vpop.f32.mrf.mxu2 }
 0x1a0   :  { %3448 = vrcp.f32 %v960_v60  ;;  %v973_v14 = vand.u32 2147483648, %v960_v60  ;;  %v971_v40 = vand.u32 2147483647, %v960_v60  ;;  %vm967_vm9 = vweird.f32 %v960_v60 }
 0x1a1   :  { %v900_v16 = vpop.f32.mrf.mxu3  ;;  %v935_v62 = vpop.f32.mrf.mxu1 }
 0x1a2   :  { %v953_v1 = vadd.f32 %v935_v62, %v368_v4  ;;  %v974_v16 = vor.u32 1.1754944e-38, %v973_v14  ;;  %vm972_vm11 = vcmp.eq.f32.partialorder %v971_v40, 8.507059e+37  ;;  %v397_v62 = vadd.f32 %v396_v51, %v4124_v36 }
 0x1a4   :  { %v3157_v55 = vmul.f32 -1.442695, %v953_v1 }
 0x1a6   :  { %v3449_v0 = vpop.eup %3448  ;;  %3450 = vpow2.f32 %v3157_v55 }
 0x1a7   :  { %v948_v50 = vpop.f32.mrf.mxu2  ;;  %v963_v13 = vmul.f32 %v3449_v0, %v960_v60  ;;  %vm968_vm8 = vweird.f32 %v3449_v0 }
 0x1a8   :  { %vm969_vm10 = vmor %vm967_vm9, %vm968_vm8  ;;  %v992_v1 = vadd.f32 %v4129_v46, %v948_v50 }
 0x1a9   :  { %v964_v2 = vsub.f32 1.0, %v963_v13  ;;  %v937_v18 = vpop.f32.mrf.mxu1 }
 0x1ab   :  { %v965_v37 = vmul.f32 %v3449_v0, %v964_v2 }
 0x1ac   :  { %v3451_v42 = vpop.eup %3450 }
 0x1ad   :  { %v961_v25 = vadd.f32 1.0, %v3451_v42  ;;  %v966_v53 = vadd.f32 %v3449_v0, %v965_v37 }
 0x1af   :  { %3452 = vrcp.f32 %v961_v25  ;;  %v950_v47 = vpop.f32.mrf.mxu2  ;;  %v970_v4 = vsel %vm969_vm10, %v3449_v0, %v966_v53  ;;  %v988_v42 = vand.u32 2147483648, %v961_v25  ;;  %v986_v60 = vand.u32 2147483647, %v961_v25 }
 0x1b0   :  { %v975_v55 = vsel %vm972_vm11, %v974_v16, %v970_v4  ;;  %vm982_vm13 = vweird.f32 %v961_v25  ;;  %v5049_v47 = vld [vmem:[#allocation31_spill] sm:$0xff]  ;;  %v5050_v4 = vld [vmem:[#allocation33_spill] sm:$0xff] }
 0x1b1   :  { %v993_v13 = vmul.f32 %v992_v1, %v975_v55  ;;  %v989_v0 = vor.u32 1.1754944e-38, %v988_v42  ;;  %vm987_vm15 = vcmp.eq.f32.partialorder %v986_v60, 8.507059e+37  ;;  %v5051_v1 = vld [vmem:[#allocation34_spill] sm:$0xff]  ;;  %v5052_v55 = vld [vmem:[#allocation36_spill] sm:$0xff] }
 0x1b3   :  { %v994_v2 = vadd.f32 %v993_v13, %v397_v62  ;;  %v5053_v62 = vld [vmem:[#allocation37_spill] sm:$0xff] }
 0x1b5   :  { %v3453_v18 = vpop.eup %3452  ;;  %3454 = vtanh.f32 %v994_v2 }
 0x1b6   :  { %v978_v31 = vmul.f32 %v3453_v18, %v961_v25  ;;  %vm983_vm12 = vweird.f32 %v3453_v18  ;;  %v5048_v25 = vld [vmem:[#allocation30_spill] sm:$0xff] }
 0x1b7   :  { %vm984_vm14 = vmor %vm982_vm13, %vm983_vm12 }
 0x1b8   :  { %v979_v54 = vsub.f32 1.0, %v978_v31 }
 0x1ba   :  { %v980_v37 = vmul.f32 %v3453_v18, %v979_v54  ;;  %v5046_v54 = vld [vmem:[#allocation27_spill] sm:$0xff] }
 0x1bb   :  { %v3455_v21 = vpop.eup %3454 }
 0x1bc   :  { %v981_v14 = vadd.f32 %v3453_v18, %v980_v37  ;;  %v996_v40 = vsub.f32 %v4150_v63, %v3455_v21  ;;  %v5047_v63 = vld [vmem:[#allocation28_spill] sm:$0xff] }
 0x1bd   :  { %v5057_v37 = vld [vmem:[#allocation24_spill] sm:$0xff] }
 0x1be   :  { %v985_v50 = vsel %vm984_vm14, %v3453_v18, %v981_v14 }
 0x1bf   :  { %v990_v51 = vsel %vm987_vm15, %v989_v0, %v985_v50 }
 0x1c0   :  { %v997_v53 = vmul.f32 %v996_v40, %v990_v51 }
 0x1c2   :  { %v4239_v16 = vadd.f32 %v3455_v21, %v997_v53  ;;  %v5045_v21 = vld [vmem:[#allocation25_spill] sm:$0xff] }
 0x1c4   :  { %v999_v31 = vpack.c.bf16 %v4239_v16, %v4239_v16 }
 0x1c6   :  { %1008 = vmatmul.bf16.vlgmr.msrb.gmra.mxu3 %v999_v31  ;;  %1021 = vmatmul.bf16.vlgmr.msrb.gmra.mxu0 %v999_v31 }
 0x1c7   :  { %1034 = vmatmul.bf16.vlgmr.msrb.gmra.mxu1 %v999_v31  ;;  %1058 = vmatmul.bf16.vlgmr.msrb.gmra.mxu2 %v999_v31 }
 0x1c8   :  { %1163 = vmatpush.bf16.msrb.mxu3 %v4032_v48  ;;  %1187 = vmatpush.bf16.msrb.mxu0 %v3908_v7 }
 0x1c9   :  { %1200 = vmatpush.bf16.msrb.mxu1 %v3933_v15  ;;  %1213 = vmatpush.bf16.msrb.mxu2 %v3931_v12 }
 0x1cc   :  { %1164 = vmatpush.bf16.msrb.mxu3 %v4044_v3  ;;  %1188 = vmatpush.bf16.msrb.mxu0 %v3911_v11 }
 0x1cd   :  { %1201 = vmatpush.bf16.msrb.mxu1 %v3942_v30  ;;  %1214 = vmatpush.bf16.msrb.mxu2 %v3939_v28 }
 0x1d0   :  { %1165 = vmatpush.bf16.msrb.mxu3 %v4057_v35  ;;  %1189 = vmatpush.bf16.msrb.mxu0 %v3914_v17 }
 0x1d1   :  { %1202 = vmatpush.bf16.msrb.mxu1 %v3950_v44  ;;  %1215 = vmatpush.bf16.msrb.mxu2 %v3947_v43 }
 0x1d4   :  { %1166 = vmatpush.bf16.msrb.mxu3 %v4073_v22  ;;  %1190 = vmatpush.bf16.msrb.mxu0 %v3917_v23 }
 0x1d5   :  { %1203 = vmatpush.bf16.msrb.mxu1 %v3956_v57  ;;  %1216 = vmatpush.bf16.msrb.mxu2 %v3953_v56 }
 0x1d6   :  { %1071 = vmatmul.bf16.vlgmr.msra.gmra.mxu3 %v999_v31  ;;  %1084 = vmatmul.bf16.vlgmr.msra.gmra.mxu0 %v999_v31 }
 0x1d8   :  { %1167 = vmatpush.bf16.msrb.mxu3 %v4087_v8  ;;  %1191 = vmatpush.bf16.msrb.mxu0 %v3920_v34 }
 0x1d9   :  { %1204 = vmatpush.bf16.msrb.mxu1 %v3962_v6  ;;  %1217 = vmatpush.bf16.msrb.mxu2 %v3959_v5 }
 0x1dc   :  { %1168 = vmatpush.bf16.msrb.mxu3 %v4093_v24  ;;  %1192 = vmatpush.bf16.msrb.mxu0 %v3923_v45 }
 0x1dd   :  { %1205 = vmatpush.bf16.msrb.mxu1 %v3969_v20  ;;  %1218 = vmatpush.bf16.msrb.mxu2 %v3966_v19 }
 0x1e0   :  { %1169 = vmatpush.bf16.msrb.mxu3 %v4105_v27  ;;  %1193 = vmatpush.bf16.msrb.mxu0 %v3926_v59 }
 0x1e1   :  { %1206 = vmatpush.bf16.msrb.mxu1 %v3975_v33  ;;  %1219 = vmatpush.bf16.msrb.mxu2 %v3972_v32 }
 0x1e4   :  { %1170 = vmatpush.bf16.msrb.mxu3 %v4111_v49  ;;  %1194 = vmatpush.bf16.msrb.mxu0 %v3929_v10 }
 0x1e5   :  { %1207 = vmatpush.bf16.msrb.mxu1 %v3981_v41  ;;  %1220 = vmatpush.bf16.msrb.mxu2 %v3978_v39 }
 0x1e8   :  { %1274 = vmatpush.bf16.msra.mxu3 %v3996_v52  ;;  %1287 = vmatpush.bf16.msra.mxu0 %v4001_v61 }
 0x1ec   :  { %1275 = vmatpush.bf16.msra.mxu3 %v3999_v58  ;;  %1288 = vmatpush.bf16.msra.mxu0 %v4014_v9 }
 0x1f0   :  { %1276 = vmatpush.bf16.msra.mxu3 %v4021_v26  ;;  %1289 = vmatpush.bf16.msra.mxu0 %v4023_v29 }
 0x1f4   :  { %1277 = vmatpush.bf16.msra.mxu3 %v4028_v38  ;;  %1290 = vmatpush.bf16.msra.mxu0 %v5045_v21 }
 0x1f8   :  { %1278 = vmatpush.bf16.msra.mxu3 %v5046_v54  ;;  %1291 = vmatpush.bf16.msra.mxu0 %v5047_v63 }
 0x1fc   :  { %1279 = vmatpush.bf16.msra.mxu3 %v5048_v25  ;;  %1292 = vmatpush.bf16.msra.mxu0 %v5049_v47 }
 0x200   :  { %1280 = vmatpush.bf16.msra.mxu3 %v5050_v4  ;;  %1293 = vmatpush.bf16.msra.mxu0 %v5051_v1  ;;  %v5058_v1 = vld [vmem:[#allocation29_spill] sm:$0xff] }
 0x204   :  { %1281 = vmatpush.bf16.msra.mxu3 %v5052_v55  ;;  %1294 = vmatpush.bf16.msra.mxu0 %v5053_v62  ;;  %v5059_v62 = vld [vmem:[#allocation40_spill] sm:$0xff] }
 0x205   :  { %v371_v4 = vadd.f32 %v5059_v62, %v5058_v1 }
 0x243   :  { %v4291_v13 = vpop.f32.mrf.mxu0 }
 0x244   :  { %5054 = vst [vmem:[#allocation25_spill] sm:$0xff] %v4291_v13  ;;  %v4293_v2 = vpop.f32.mrf.mxu1 }
 0x245   :  { %5055 = vst [vmem:[#allocation54_spill] sm:$0xff] %v4293_v2 }
 0x249   :  { %v4295_v18 = vpop.f32.mrf.mxu3 }
 0x24a   :  { %5056 = vst [vmem:[#allocation55_spill] sm:$0xff] %v4295_v18  ;;  %v1059_v42 = vpop.f32.mrf.mxu2 }
 0x24b   :  { %v1089_v60 = vadd.f32 %v1059_v42, %v5057_v37  ;;  %v1024_v14 = vpop.f32.mrf.mxu0 }
 0x24c   :  { %v1037_v0 = vpop.f32.mrf.mxu1 }
 0x24d   :  { %v3158_v50 = vmul.f32 -1.442695, %v1089_v60 }
 0x24f   :  { %3456 = vpow2.f32 %v3158_v50 }
 0x251   :  { %v1011_v40 = vpop.f32.mrf.mxu3 }
 0x252   :  { %v1061_v51 = vpop.f32.mrf.mxu2 }
 0x253   :  { %v1085_v53 = vpop.f32.mrf.mxu0 }
 0x255   :  { %v3457_v31 = vpop.eup %3456 }
 0x256   :  { %v1097_v55 = vadd.f32 1.0, %v3457_v31 }
 0x258   :  { %3458 = vrcp.f32 %v1097_v55  ;;  %v1110_v60 = vand.u32 2147483648, %v1097_v55  ;;  %v1108_v50 = vand.u32 2147483647, %v1097_v55  ;;  %vm1104_vm1 = vweird.f32 %v1097_v55 }
 0x259   :  { %v1072_v13 = vpop.f32.mrf.mxu3 }
 0x25a   :  { %v1090_v2 = vadd.f32 %v1072_v13, %v371_v4  ;;  %v1111_v62 = vor.u32 1.1754944e-38, %v1110_v60  ;;  %vm1109_vm3 = vcmp.eq.f32.partialorder %v1108_v50, 8.507059e+37  ;;  %v5060_v13 = vld [vmem:[#allocation41_spill] sm:$0xff] }
 0x25b   :  { %v1087_v47 = vpop.f32.mrf.mxu0 }
 0x25c   :  { %v3159_v18 = vmul.f32 -1.442695, %v1090_v2  ;;  %v1129_v47 = vadd.f32 %v4129_v46, %v1085_v53  ;;  %v400_v2 = vadd.f32 %v5060_v13, %v4124_v36  ;;  %v5064_v13 = vld [vmem:[#allocation33_spill] sm:$0xff] }
 0x25e   :  { %v3459_v25 = vpop.eup %3458  ;;  %3460 = vpow2.f32 %v3159_v18 }
 0x25f   :  { %v1100_v42 = vmul.f32 %v3459_v25, %v1097_v55  ;;  %vm1105_vm0 = vweird.f32 %v3459_v25 }
 0x260   :  { %vm1106_vm2 = vmor %vm1104_vm1, %vm1105_vm0 }
 0x261   :  { %v1101_v37 = vsub.f32 1.0, %v1100_v42  ;;  %v1074_v14 = vpop.f32.mrf.mxu3 }
 0x263   :  { %v1102_v0 = vmul.f32 %v3459_v25, %v1101_v37 }
 0x264   :  { %v3461_v40 = vpop.eup %3460 }
 0x265   :  { %v1103_v51 = vadd.f32 %v3459_v25, %v1102_v0  ;;  %v1098_v31 = vadd.f32 1.0, %v3461_v40 }
 0x267   :  { %v1107_v1 = vsel %vm1106_vm2, %v3459_v25, %v1103_v51  ;;  %3462 = vrcp.f32 %v1098_v31  ;;  %v1125_v0 = vand.u32 2147483648, %v1098_v31  ;;  %v1123_v40 = vand.u32 2147483647, %v1098_v31 }
 0x268   :  { %v1112_v4 = vsel %vm1109_vm3, %v1111_v62, %v1107_v1  ;;  %vm1119_vm5 = vweird.f32 %v1098_v31 }
 0x269   :  { %v1130_v18 = vmul.f32 %v1129_v47, %v1112_v4  ;;  %v1126_v53 = vor.u32 1.1754944e-38, %v1125_v0  ;;  %vm1124_vm7 = vcmp.eq.f32.partialorder %v1123_v40, 8.507059e+37 }
 0x26b   :  { %v1131_v42 = vadd.f32 %v1130_v18, %v400_v2  ;;  %v5065_v2 = vld [vmem:[#allocation34_spill] sm:$0xff]  ;;  %v5066_v18 = vld [vmem:[#allocation36_spill] sm:$0xff] }
 0x26d   :  { %v3463_v37 = vpop.eup %3462  ;;  %3464 = vtanh.f32 %v1131_v42  ;;  %v5067_v42 = vld [vmem:[#allocation37_spill] sm:$0xff] }
 0x26e   :  { %v1115_v14 = vmul.f32 %v3463_v37, %v1098_v31  ;;  %vm1120_vm4 = vweird.f32 %v3463_v37  ;;  %v5063_v31 = vld [vmem:[#allocation31_spill] sm:$0xff] }
 0x26f   :  { %vm1121_vm6 = vmor %vm1119_vm5, %vm1120_vm4 }
 0x270   :  { %v1116_v63 = vsub.f32 1.0, %v1115_v14  ;;  %v5069_v14 = vld [vmem:[#allocation26_spill] sm:$0xff] }
 0x272   :  { %v1117_v55 = vmul.f32 %v3463_v37, %v1116_v63  ;;  %v5062_v63 = vld [vmem:[#allocation30_spill] sm:$0xff] }
 0x273   :  { %v3465_v60 = vpop.eup %3464 }
 0x274   :  { %v1118_v25 = vadd.f32 %v3463_v37, %v1117_v55  ;;  %v1133_v1 = vsub.f32 %v4239_v16, %v3465_v60  ;;  %v5061_v16 = vld [vmem:[#allocation28_spill] sm:$0xff] }
 0x276   :  { %v1122_v50 = vsel %vm1121_vm6, %v3463_v37, %v1118_v25  ;;  %v5068_v37 = vld [vmem:[#allocation23_spill] sm:$0xff] }
 0x277   :  { %v1127_v51 = vsel %vm1124_vm7, %v1126_v53, %v1122_v50  ;;  %v344_v0 = vadd.f32 %v5069_v14, %v5068_v37 }
 0x278   :  { %v1134_v62 = vmul.f32 %v1133_v1, %v1127_v51 }
 0x27a   :  { %v4304_v47 = vadd.f32 %v3465_v60, %v1134_v62 }
 0x27c   :  { %v1136_v4 = vpack.c.bf16 %v4304_v47, %v4304_v47 }
 0x27e   :  { %1145 = vmatmul.bf16.vlgmr.msra.gmra.mxu1 %v1136_v4  ;;  %1158 = vmatmul.bf16.vlgmr.msra.gmra.mxu2 %v1136_v4 }
 0x27f   :  { %1171 = vmatmul.bf16.vlgmr.msrb.gmra.mxu3 %v1136_v4  ;;  %1195 = vmatmul.bf16.vlgmr.msrb.gmra.mxu0 %v1136_v4 }
 0x280   :  { %1300 = vmatpush.bf16.msra.mxu1 %v4032_v48  ;;  %1324 = vmatpush.bf16.msra.mxu2 %v3908_v7 }
 0x281   :  { %1337 = vmatpush.bf16.msrb.mxu3 %v3933_v15  ;;  %1350 = vmatpush.bf16.msrb.mxu0 %v3931_v12 }
 0x284   :  { %1301 = vmatpush.bf16.msra.mxu1 %v4044_v3  ;;  %1325 = vmatpush.bf16.msra.mxu2 %v3911_v11 }
 0x285   :  { %1338 = vmatpush.bf16.msrb.mxu3 %v3942_v30  ;;  %1351 = vmatpush.bf16.msrb.mxu0 %v3939_v28 }
 0x288   :  { %1302 = vmatpush.bf16.msra.mxu1 %v4057_v35  ;;  %1326 = vmatpush.bf16.msra.mxu2 %v3914_v17 }
 0x289   :  { %1339 = vmatpush.bf16.msrb.mxu3 %v3950_v44  ;;  %1352 = vmatpush.bf16.msrb.mxu0 %v3947_v43 }
 0x28c   :  { %1303 = vmatpush.bf16.msra.mxu1 %v4073_v22  ;;  %1327 = vmatpush.bf16.msra.mxu2 %v3917_v23 }
 0x28d   :  { %1340 = vmatpush.bf16.msrb.mxu3 %v3956_v57  ;;  %1353 = vmatpush.bf16.msrb.mxu0 %v3953_v56 }
 0x28e   :  { %1208 = vmatmul.bf16.vlgmr.msrb.gmra.mxu1 %v1136_v4  ;;  %1221 = vmatmul.bf16.vlgmr.msrb.gmra.mxu2 %v1136_v4 }
 0x290   :  { %1304 = vmatpush.bf16.msra.mxu1 %v4087_v8  ;;  %1328 = vmatpush.bf16.msra.mxu2 %v3920_v34 }
 0x291   :  { %1341 = vmatpush.bf16.msrb.mxu3 %v3962_v6  ;;  %1354 = vmatpush.bf16.msrb.mxu0 %v3959_v5 }
 0x294   :  { %1305 = vmatpush.bf16.msra.mxu1 %v4093_v24  ;;  %1329 = vmatpush.bf16.msra.mxu2 %v3923_v45 }
 0x295   :  { %1342 = vmatpush.bf16.msrb.mxu3 %v3969_v20  ;;  %1355 = vmatpush.bf16.msrb.mxu0 %v3966_v19 }
 0x298   :  { %1306 = vmatpush.bf16.msra.mxu1 %v4105_v27  ;;  %1330 = vmatpush.bf16.msra.mxu2 %v3926_v59 }
 0x299   :  { %1343 = vmatpush.bf16.msrb.mxu3 %v3975_v33  ;;  %1356 = vmatpush.bf16.msrb.mxu0 %v3972_v32 }
 0x29c   :  { %1307 = vmatpush.bf16.msra.mxu1 %v4111_v49  ;;  %1331 = vmatpush.bf16.msra.mxu2 %v3929_v10 }
 0x29d   :  { %1344 = vmatpush.bf16.msrb.mxu3 %v3981_v41  ;;  %1357 = vmatpush.bf16.msrb.mxu0 %v3978_v39 }
 0x2a0   :  { %1411 = vmatpush.bf16.msrb.mxu1 %v3996_v52  ;;  %1424 = vmatpush.bf16.msrb.mxu2 %v4001_v61 }
 0x2a4   :  { %1412 = vmatpush.bf16.msrb.mxu1 %v3999_v58  ;;  %1425 = vmatpush.bf16.msrb.mxu2 %v4014_v9 }
 0x2a8   :  { %1413 = vmatpush.bf16.msrb.mxu1 %v4021_v26  ;;  %1426 = vmatpush.bf16.msrb.mxu2 %v4023_v29 }
 0x2ac   :  { %1414 = vmatpush.bf16.msrb.mxu1 %v4028_v38  ;;  %1427 = vmatpush.bf16.msrb.mxu2 %v5045_v21 }
 0x2b0   :  { %1415 = vmatpush.bf16.msrb.mxu1 %v5046_v54  ;;  %1428 = vmatpush.bf16.msrb.mxu2 %v5061_v16 }
 0x2b4   :  { %1416 = vmatpush.bf16.msrb.mxu1 %v5062_v63  ;;  %1429 = vmatpush.bf16.msrb.mxu2 %v5063_v31 }
 0x2b8   :  { %1417 = vmatpush.bf16.msrb.mxu1 %v5064_v13  ;;  %1430 = vmatpush.bf16.msrb.mxu2 %v5065_v2  ;;  %v5073_v2 = vld [vmem:[#allocation29_spill] sm:$0xff] }
 0x2bc   :  { %1418 = vmatpush.bf16.msrb.mxu1 %v5066_v18  ;;  %1431 = vmatpush.bf16.msrb.mxu2 %v5067_v42  ;;  %v5074_v42 = vld [vmem:[#allocation42_spill] sm:$0xff] }
 0x2bd   :  { %v373_v13 = vadd.f32 %v5074_v42, %v5073_v2 }
 0x2fb   :  { %v4358_v55 = vpop.f32.mrf.mxu1 }
 0x2fc   :  { %5070 = vst [vmem:[#allocation24_spill] sm:$0xff] %v4358_v55  ;;  %v1196_v40 = vpop.f32.mrf.mxu0 }
 0x2fd   :  { %v1226_v60 = vadd.f32 %v1196_v40, %v344_v0 }
 0x2ff   :  { %v3160_v25 = vmul.f32 -1.442695, %v1226_v60 }
 0x301   :  { %3466 = vpow2.f32 %v3160_v25  ;;  %v4360_v53 = vpop.f32.mrf.mxu2 }
 0x302   :  { %5071 = vst [vmem:[#allocation40_spill] sm:$0xff] %v4360_v53  ;;  %v4362_v1 = vpop.f32.mrf.mxu3 }
 0x303   :  { %5072 = vst [vmem:[#allocation41_spill] sm:$0xff] %v4362_v1  ;;  %v1148_v50 = vpop.f32.mrf.mxu1 }
 0x304   :  { %v1198_v51 = vpop.f32.mrf.mxu0 }
 0x307   :  { %v3467_v62 = vpop.eup %3466 }
 0x308   :  { %v1234_v4 = vadd.f32 1.0, %v3467_v62 }
 0x309   :  { %v1161_v18 = vpop.f32.mrf.mxu2 }
 0x30a   :  { %3468 = vrcp.f32 %v1234_v4  ;;  %v1174_v14 = vpop.f32.mrf.mxu3  ;;  %v1247_v50 = vand.u32 2147483648, %v1234_v4  ;;  %v1245_v62 = vand.u32 2147483647, %v1234_v4  ;;  %vm1241_vm9 = vweird.f32 %v1234_v4 }
 0x30b   :  { %v1209_v37 = vpop.f32.mrf.mxu1 }
 0x30c   :  { %v1227_v55 = vadd.f32 %v1209_v37, %v373_v13  ;;  %v1248_v42 = vor.u32 1.1754944e-38, %v1247_v50  ;;  %vm1246_vm11 = vcmp.eq.f32.partialorder %v1245_v62, 8.507059e+37 }
 0x30e   :  { %v3161_v31 = vmul.f32 -1.442695, %v1227_v55  ;;  %v5075_v55 = vld [vmem:[#allocation43_spill] sm:$0xff] }
 0x310   :  { %v3469_v0 = vpop.eup %3468  ;;  %3470 = vpow2.f32 %v3161_v31 }
 0x311   :  { %v1222_v40 = vpop.f32.mrf.mxu2  ;;  %v1237_v60 = vmul.f32 %v3469_v0, %v1234_v4  ;;  %vm1242_vm8 = vweird.f32 %v3469_v0 }
 0x312   :  { %vm1243_vm10 = vmor %vm1241_vm9, %vm1242_vm8  ;;  %v1266_v31 = vadd.f32 %v4129_v46, %v1222_v40 }
 0x313   :  { %v1238_v25 = vsub.f32 1.0, %v1237_v60  ;;  %v1211_v53 = vpop.f32.mrf.mxu1 }
 0x314   :  { %v402_v53 = vadd.f32 %v5075_v55, %v4124_v36  ;;  %v5082_v55 = vld [vmem:[#allocation36_spill] sm:$0xff] }
 0x315   :  { %v1239_v1 = vmul.f32 %v3469_v0, %v1238_v25 }
 0x316   :  { %v3471_v51 = vpop.eup %3470 }
 0x317   :  { %v1235_v18 = vadd.f32 1.0, %v3471_v51  ;;  %v1240_v63 = vadd.f32 %v3469_v0, %v1239_v1 }
 0x319   :  { %3472 = vrcp.f32 %v1235_v18  ;;  %v1224_v14 = vpop.f32.mrf.mxu2  ;;  %v1244_v13 = vsel %vm1243_vm10, %v3469_v0, %v1240_v63  ;;  %v1262_v1 = vand.u32 2147483648, %v1235_v18  ;;  %v1260_v54 = vand.u32 2147483647, %v1235_v18 }
 0x31a   :  { %v1249_v37 = vsel %vm1246_vm11, %v1248_v42, %v1244_v13  ;;  %vm1256_vm13 = vweird.f32 %v1235_v18 }
 0x31b   :  { %v1267_v60 = vmul.f32 %v1266_v31, %v1249_v37  ;;  %v1263_v63 = vor.u32 1.1754944e-38, %v1262_v1  ;;  %vm1261_vm15 = vcmp.eq.f32.partialorder %v1260_v54, 8.507059e+37  ;;  %v5076_v54 = vld [vmem:[#allocation27_spill] sm:$0xff]  ;;  %v5080_v31 = vld [vmem:[#allocation33_spill] sm:$0xff]  ;;  %v5081_v37 = vld [vmem:[#allocation34_spill] sm:$0xff] }
 0x31d   :  { %v1268_v25 = vadd.f32 %v1267_v60, %v402_v53  ;;  %v5083_v53 = vld [vmem:[#allocation37_spill] sm:$0xff] }
 0x31f   :  { %v3473_v2 = vpop.eup %3472  ;;  %3474 = vtanh.f32 %v1268_v25 }
 0x320   :  { %v1252_v16 = vmul.f32 %v3473_v2, %v1235_v18  ;;  %vm1257_vm12 = vweird.f32 %v3473_v2  ;;  %v5079_v18 = vld [vmem:[#allocation31_spill] sm:$0xff] }
 0x321   :  { %vm1258_vm14 = vmor %vm1256_vm13, %vm1257_vm12 }
 0x322   :  { %v1253_v51 = vsub.f32 1.0, %v1252_v16 }
 0x324   :  { %v1254_v4 = vmul.f32 %v3473_v2, %v1253_v51 }
 0x325   :  { %v3475_v50 = vpop.eup %3474 }
 0x326   :  { %v1255_v14 = vadd.f32 %v3473_v2, %v1254_v4  ;;  %v1270_v40 = vsub.f32 %v4304_v47, %v3475_v50  ;;  %v5077_v47 = vld [vmem:[#allocation28_spill] sm:$0xff] }
 0x327   :  { %v5087_v4 = vld [vmem:[#allocation32_spill] sm:$0xff] }
 0x328   :  { %v1259_v0 = vsel %vm1258_vm14, %v3473_v2, %v1255_v14  ;;  %v5078_v2 = vld [vmem:[#allocation30_spill] sm:$0xff] }
 0x329   :  { %v1264_v62 = vsel %vm1261_vm15, %v1263_v63, %v1259_v0 }
 0x32a   :  { %v1271_v42 = vmul.f32 %v1270_v40, %v1264_v62 }
 0x32c   :  { %v4370_v13 = vadd.f32 %v3475_v50, %v1271_v42 }
 0x32e   :  { %v1273_v16 = vpack.c.bf16 %v4370_v13, %v4370_v13 }
 0x330   :  { %1282 = vmatmul.bf16.vlgmr.msra.gmra.mxu3 %v1273_v16  ;;  %1295 = vmatmul.bf16.vlgmr.msra.gmra.mxu0 %v1273_v16 }
 0x331   :  { %1308 = vmatmul.bf16.vlgmr.msra.gmra.mxu1 %v1273_v16  ;;  %1332 = vmatmul.bf16.vlgmr.msra.gmra.mxu2 %v1273_v16 }
 0x332   :  { %1437 = vmatpush.bf16.msra.mxu3 %v4032_v48  ;;  %1461 = vmatpush.bf16.msra.mxu0 %v3908_v7 }
 0x333   :  { %1474 = vmatpush.bf16.msra.mxu1 %v3933_v15  ;;  %1487 = vmatpush.bf16.msra.mxu2 %v3931_v12 }
 0x336   :  { %1438 = vmatpush.bf16.msra.mxu3 %v4044_v3  ;;  %1462 = vmatpush.bf16.msra.mxu0 %v3911_v11 }
 0x337   :  { %1475 = vmatpush.bf16.msra.mxu1 %v3942_v30  ;;  %1488 = vmatpush.bf16.msra.mxu2 %v3939_v28 }
 0x33a   :  { %1439 = vmatpush.bf16.msra.mxu3 %v4057_v35  ;;  %1463 = vmatpush.bf16.msra.mxu0 %v3914_v17 }
 0x33b   :  { %1476 = vmatpush.bf16.msra.mxu1 %v3950_v44  ;;  %1489 = vmatpush.bf16.msra.mxu2 %v3947_v43 }
 0x33e   :  { %1440 = vmatpush.bf16.msra.mxu3 %v4073_v22  ;;  %1464 = vmatpush.bf16.msra.mxu0 %v3917_v23 }
 0x33f   :  { %1477 = vmatpush.bf16.msra.mxu1 %v3956_v57  ;;  %1490 = vmatpush.bf16.msra.mxu2 %v3953_v56 }
 0x340   :  { %1345 = vmatmul.bf16.vlgmr.msrb.gmra.mxu3 %v1273_v16  ;;  %1358 = vmatmul.bf16.vlgmr.msrb.gmra.mxu0 %v1273_v16 }
 0x342   :  { %1441 = vmatpush.bf16.msra.mxu3 %v4087_v8  ;;  %1465 = vmatpush.bf16.msra.mxu0 %v3920_v34 }
 0x343   :  { %1478 = vmatpush.bf16.msra.mxu1 %v3962_v6  ;;  %1491 = vmatpush.bf16.msra.mxu2 %v3959_v5 }
 0x346   :  { %1442 = vmatpush.bf16.msra.mxu3 %v4093_v24  ;;  %1466 = vmatpush.bf16.msra.mxu0 %v3923_v45 }
 0x347   :  { %1479 = vmatpush.bf16.msra.mxu1 %v3969_v20  ;;  %1492 = vmatpush.bf16.msra.mxu2 %v3966_v19 }
 0x34a   :  { %1443 = vmatpush.bf16.msra.mxu3 %v4105_v27  ;;  %1467 = vmatpush.bf16.msra.mxu0 %v3926_v59 }
 0x34b   :  { %1480 = vmatpush.bf16.msra.mxu1 %v3975_v33  ;;  %1493 = vmatpush.bf16.msra.mxu2 %v3972_v32 }
 0x34e   :  { %1444 = vmatpush.bf16.msra.mxu3 %v4111_v49  ;;  %1468 = vmatpush.bf16.msra.mxu0 %v3929_v10 }
 0x34f   :  { %1481 = vmatpush.bf16.msra.mxu1 %v3981_v41  ;;  %1494 = vmatpush.bf16.msra.mxu2 %v3978_v39 }
 0x352   :  { %1548 = vmatpush.bf16.msrb.mxu3 %v3996_v52  ;;  %1561 = vmatpush.bf16.msrb.mxu0 %v4001_v61 }
 0x356   :  { %1549 = vmatpush.bf16.msrb.mxu3 %v3999_v58  ;;  %1562 = vmatpush.bf16.msrb.mxu0 %v4014_v9 }
 0x35a   :  { %1550 = vmatpush.bf16.msrb.mxu3 %v4021_v26  ;;  %1563 = vmatpush.bf16.msrb.mxu0 %v4023_v29 }
 0x35e   :  { %1551 = vmatpush.bf16.msrb.mxu3 %v4028_v38  ;;  %1564 = vmatpush.bf16.msrb.mxu0 %v5045_v21 }
 0x362   :  { %1552 = vmatpush.bf16.msrb.mxu3 %v5076_v54  ;;  %1565 = vmatpush.bf16.msrb.mxu0 %v5077_v47 }
 0x366   :  { %1553 = vmatpush.bf16.msrb.mxu3 %v5078_v2  ;;  %1566 = vmatpush.bf16.msrb.mxu0 %v5079_v18 }
 0x36a   :  { %1554 = vmatpush.bf16.msrb.mxu3 %v5080_v31  ;;  %1567 = vmatpush.bf16.msrb.mxu0 %v5081_v37  ;;  %v5088_v31 = vld [vmem:[#allocation29_spill] sm:$0xff] }
 0x36e   :  { %1555 = vmatpush.bf16.msrb.mxu3 %v5082_v55  ;;  %1568 = vmatpush.bf16.msrb.mxu0 %v5083_v53  ;;  %v5089_v53 = vld [vmem:[#allocation44_spill] sm:$0xff] }
 0x36f   :  { %v376_v37 = vadd.f32 %v5089_v53, %v5088_v31 }
 0x3ad   :  { %v4422_v60 = vpop.f32.mrf.mxu0 }
 0x3ae   :  { %5084 = vst [vmem:[#allocation26_spill] sm:$0xff] %v4422_v60  ;;  %v4424_v25 = vpop.f32.mrf.mxu1 }
 0x3af   :  { %5085 = vst [vmem:[#allocation42_spill] sm:$0xff] %v4424_v25 }
 0x3b3   :  { %v4426_v51 = vpop.f32.mrf.mxu3 }
 0x3b4   :  { %5086 = vst [vmem:[#allocation43_spill] sm:$0xff] %v4426_v51  ;;  %v1333_v1 = vpop.f32.mrf.mxu2 }
 0x3b5   :  { %v1363_v50 = vadd.f32 %v1333_v1, %v5087_v4  ;;  %v1298_v14 = vpop.f32.mrf.mxu0 }
 0x3b6   :  { %v1311_v63 = vpop.f32.mrf.mxu1 }
 0x3b7   :  { %v3162_v0 = vmul.f32 -1.442695, %v1363_v50 }
 0x3b9   :  { %3476 = vpow2.f32 %v3162_v0 }
 0x3bb   :  { %v1285_v40 = vpop.f32.mrf.mxu3 }
 0x3bc   :  { %v1335_v62 = vpop.f32.mrf.mxu2 }
 0x3bd   :  { %v1359_v42 = vpop.f32.mrf.mxu0 }
 0x3bf   :  { %v3477_v16 = vpop.eup %3476 }
 0x3c0   :  { %v1371_v55 = vadd.f32 1.0, %v3477_v16 }
 0x3c2   :  { %3478 = vrcp.f32 %v1371_v55  ;;  %v1384_v50 = vand.u32 2147483648, %v1371_v55  ;;  %v1382_v0 = vand.u32 2147483647, %v1371_v55  ;;  %vm1378_vm1 = vweird.f32 %v1371_v55 }
 0x3c3   :  { %v1346_v60 = vpop.f32.mrf.mxu3 }
 0x3c4   :  { %v1364_v25 = vadd.f32 %v1346_v60, %v376_v37  ;;  %v1385_v53 = vor.u32 1.1754944e-38, %v1384_v50  ;;  %vm1383_vm3 = vcmp.eq.f32.partialorder %v1382_v0, 8.507059e+37  ;;  %v5090_v60 = vld [vmem:[#allocation45_spill] sm:$0xff] }
 0x3c5   :  { %v1361_v2 = vpop.f32.mrf.mxu0 }
 0x3c6   :  { %v3163_v51 = vmul.f32 -1.442695, %v1364_v25  ;;  %v1403_v2 = vadd.f32 %v4129_v46, %v1359_v42  ;;  %v405_v25 = vadd.f32 %v5090_v60, %v4124_v36  ;;  %v5095_v60 = vld [vmem:[#allocation33_spill] sm:$0xff] }
 0x3c8   :  { %v3479_v18 = vpop.eup %3478  ;;  %3480 = vpow2.f32 %v3163_v51 }
 0x3c9   :  { %v1374_v1 = vmul.f32 %v3479_v18, %v1371_v55  ;;  %vm1379_vm0 = vweird.f32 %v3479_v18 }
 0x3ca   :  { %vm1380_vm2 = vmor %vm1378_vm1, %vm1379_vm0 }
 0x3cb   :  { %v1375_v4 = vsub.f32 1.0, %v1374_v1  ;;  %v1348_v14 = vpop.f32.mrf.mxu3 }
 0x3cd   :  { %v1376_v63 = vmul.f32 %v3479_v18, %v1375_v4 }
 0x3ce   :  { %v3481_v40 = vpop.eup %3480 }
 0x3cf   :  { %v1377_v62 = vadd.f32 %v3479_v18, %v1376_v63  ;;  %v1372_v16 = vadd.f32 1.0, %v3481_v40 }
 0x3d1   :  { %v1381_v31 = vsel %vm1380_vm2, %v3479_v18, %v1377_v62  ;;  %3482 = vrcp.f32 %v1372_v16  ;;  %v1399_v63 = vand.u32 2147483648, %v1372_v16  ;;  %v1397_v40 = vand.u32 2147483647, %v1372_v16 }
 0x3d2   :  { %v1386_v37 = vsel %vm1383_vm3, %v1385_v53, %v1381_v31  ;;  %vm1393_vm5 = vweird.f32 %v1372_v16 }
 0x3d3   :  { %v1404_v51 = vmul.f32 %v1403_v2, %v1386_v37  ;;  %v1400_v46 = vor.u32 1.1754944e-38, %v1399_v63  ;;  %vm1398_vm7 = vcmp.eq.f32.partialorder %v1397_v40, 8.507059e+37  ;;  %v5094_v37 = vld [vmem:[#allocation34_spill] sm:$0xff] }
 0x3d5   :  { %v1405_v1 = vadd.f32 %v1404_v51, %v405_v25  ;;  %v5096_v25 = vld [vmem:[#allocation37_spill] sm:$0xff]  ;;  %v5097_v51 = vld [vmem:[#allocation36_spill] sm:$0xff] }
 0x3d7   :  { %v3483_v4 = vpop.eup %3482  ;;  %3484 = vtanh.f32 %v1405_v1  ;;  %v5098_v1 = vld [vmem:[#allocation23_spill] sm:$0xff] }
 0x3d8   :  { %v1389_v14 = vmul.f32 %v3483_v4, %v1372_v16  ;;  %vm1394_vm4 = vweird.f32 %v3483_v4  ;;  %v5093_v16 = vld [vmem:[#allocation30_spill] sm:$0xff] }
 0x3d9   :  { %vm1395_vm6 = vmor %vm1393_vm5, %vm1394_vm4 }
 0x3da   :  { %v1390_v54 = vsub.f32 1.0, %v1389_v14 }
 0x3dc   :  { %v1391_v55 = vmul.f32 %v3483_v4, %v1390_v54  ;;  %v5092_v54 = vld [vmem:[#allocation31_spill] sm:$0xff] }
 0x3dd   :  { %v3485_v50 = vpop.eup %3484 }
 0x3de   :  { %v1392_v18 = vadd.f32 %v3483_v4, %v1391_v55  ;;  %v1407_v31 = vsub.f32 %v4370_v13, %v3485_v50  ;;  %v5091_v13 = vld [vmem:[#allocation27_spill] sm:$0xff] }
 0x3e0   :  { %v1396_v42 = vsel %vm1395_vm6, %v3483_v4, %v1392_v18  ;;  %v5099_v4 = vld [vmem:[#allocation35_spill] sm:$0xff] }
 0x3e1   :  { %v1401_v0 = vsel %vm1398_vm7, %v1400_v46, %v1396_v42  ;;  %v349_v14 = vadd.f32 %v5099_v4, %v5098_v1 }
 0x3e2   :  { %v1408_v62 = vmul.f32 %v1407_v31, %v1401_v0 }
 0x3e4   :  { %v4435_v53 = vadd.f32 %v3485_v50, %v1408_v62 }
 0x3e6   :  { %v1410_v2 = vpack.c.bf16 %v4435_v53, %v4435_v53 }
 0x3e8   :  { %1419 = vmatmul.bf16.vlgmr.msrb.gmra.mxu1 %v1410_v2  ;;  %1432 = vmatmul.bf16.vlgmr.msrb.gmra.mxu2 %v1410_v2 }
 0x3e9   :  { %1445 = vmatmul.bf16.vlgmr.msra.gmra.mxu3 %v1410_v2  ;;  %1469 = vmatmul.bf16.vlgmr.msra.gmra.mxu0 %v1410_v2 }
 0x3ea   :  { %1574 = vmatpush.bf16.msrb.mxu1 %v4032_v48  ;;  %1598 = vmatpush.bf16.msrb.mxu2 %v3908_v7 }
 0x3eb   :  { %1611 = vmatpush.bf16.msra.mxu3 %v3933_v15  ;;  %1624 = vmatpush.bf16.msra.mxu0 %v3931_v12 }
 0x3ee   :  { %1575 = vmatpush.bf16.msrb.mxu1 %v4044_v3  ;;  %1599 = vmatpush.bf16.msrb.mxu2 %v3911_v11 }
 0x3ef   :  { %1612 = vmatpush.bf16.msra.mxu3 %v3942_v30  ;;  %1625 = vmatpush.bf16.msra.mxu0 %v3939_v28 }
 0x3f2   :  { %1576 = vmatpush.bf16.msrb.mxu1 %v4057_v35  ;;  %1600 = vmatpush.bf16.msrb.mxu2 %v3914_v17 }
 0x3f3   :  { %1613 = vmatpush.bf16.msra.mxu3 %v3950_v44  ;;  %1626 = vmatpush.bf16.msra.mxu0 %v3947_v43 }
 0x3f6   :  { %1577 = vmatpush.bf16.msrb.mxu1 %v4073_v22  ;;  %1601 = vmatpush.bf16.msrb.mxu2 %v3917_v23 }
 0x3f7   :  { %1614 = vmatpush.bf16.msra.mxu3 %v3956_v57  ;;  %1627 = vmatpush.bf16.msra.mxu0 %v3953_v56 }
 0x3f8   :  { %1482 = vmatmul.bf16.vlgmr.msra.gmra.mxu1 %v1410_v2  ;;  %1495 = vmatmul.bf16.vlgmr.msra.gmra.mxu2 %v1410_v2 }
 0x3fa   :  { %1578 = vmatpush.bf16.msrb.mxu1 %v4087_v8  ;;  %1602 = vmatpush.bf16.msrb.mxu2 %v3920_v34 }
 0x3fb   :  { %1615 = vmatpush.bf16.msra.mxu3 %v3962_v6  ;;  %1628 = vmatpush.bf16.msra.mxu0 %v3959_v5 }
 0x3fe   :  { %1579 = vmatpush.bf16.msrb.mxu1 %v4093_v24  ;;  %1603 = vmatpush.bf16.msrb.mxu2 %v3923_v45 }
 0x3ff   :  { %1616 = vmatpush.bf16.msra.mxu3 %v3969_v20  ;;  %1629 = vmatpush.bf16.msra.mxu0 %v3966_v19 }
 0x402   :  { %1580 = vmatpush.bf16.msrb.mxu1 %v4105_v27  ;;  %1604 = vmatpush.bf16.msrb.mxu2 %v3926_v59 }
 0x403   :  { %1617 = vmatpush.bf16.msra.mxu3 %v3975_v33  ;;  %1630 = vmatpush.bf16.msra.mxu0 %v3972_v32 }
 0x406   :  { %1581 = vmatpush.bf16.msrb.mxu1 %v4111_v49  ;;  %1605 = vmatpush.bf16.msrb.mxu2 %v3929_v10 }
 0x407   :  { %1618 = vmatpush.bf16.msra.mxu3 %v3981_v41  ;;  %1631 = vmatpush.bf16.msra.mxu0 %v3978_v39 }
 0x40a   :  { %1698 = vmatpush.bf16.msra.mxu2 %v4001_v61  ;;  %1685 = vmatpush.bf16.msra.mxu1 %v3996_v52 }
 0x40e   :  { %1699 = vmatpush.bf16.msra.mxu2 %v4014_v9  ;;  %1686 = vmatpush.bf16.msra.mxu1 %v3999_v58 }
 0x412   :  { %1700 = vmatpush.bf16.msra.mxu2 %v4023_v29  ;;  %1687 = vmatpush.bf16.msra.mxu1 %v4021_v26 }
 0x416   :  { %1701 = vmatpush.bf16.msra.mxu2 %v5045_v21  ;;  %1688 = vmatpush.bf16.msra.mxu1 %v4028_v38 }
 0x41a   :  { %1702 = vmatpush.bf16.msra.mxu2 %v5077_v47  ;;  %1689 = vmatpush.bf16.msra.mxu1 %v5091_v13 }
 0x41e   :  { %1703 = vmatpush.bf16.msra.mxu2 %v5092_v54  ;;  %1690 = vmatpush.bf16.msra.mxu1 %v5093_v16 }
 0x422   :  { %1704 = vmatpush.bf16.msra.mxu2 %v5094_v37  ;;  %1691 = vmatpush.bf16.msra.mxu1 %v5095_v60 }
 0x426   :  { %1705 = vmatpush.bf16.msra.mxu2 %v5096_v25  ;;  %1692 = vmatpush.bf16.msra.mxu1 %v5097_v51  ;;  %v5103_v25 = vld [vmem:[#allocation29_spill] sm:$0xff]  ;;  %v5104_v51 = vld [vmem:[#allocation46_spill] sm:$0xff] }
 0x427   :  { %v378_v37 = vadd.f32 %v5104_v51, %v5103_v25 }
 0x465   :  { %v4489_v63 = vpop.f32.mrf.mxu1 }
 0x466   :  { %5100 = vst [vmem:[#allocation28_spill] sm:$0xff] %v4489_v63  ;;  %v1470_v55 = vpop.f32.mrf.mxu0 }
 0x467   :  { %v1500_v40 = vadd.f32 %v1470_v55, %v349_v14 }
 0x469   :  { %v3164_v50 = vmul.f32 -1.442695, %v1500_v40 }
 0x46b   :  { %3486 = vpow2.f32 %v3164_v50  ;;  %v4491_v18 = vpop.f32.mrf.mxu2 }
 0x46c   :  { %5101 = vst [vmem:[#allocation32_spill] sm:$0xff] %v4491_v18  ;;  %v4493_v46 = vpop.f32.mrf.mxu3 }
 0x46d   :  { %5102 = vst [vmem:[#allocation44_spill] sm:$0xff] %v4493_v46  ;;  %v1422_v31 = vpop.f32.mrf.mxu1 }
 0x46e   :  { %v1472_v42 = vpop.f32.mrf.mxu0 }
 0x471   :  { %v3487_v0 = vpop.eup %3486 }
 0x472   :  { %v1508_v62 = vadd.f32 1.0, %v3487_v0 }
 0x473   :  { %v1435_v2 = vpop.f32.mrf.mxu2 }
 0x474   :  { %3488 = vrcp.f32 %v1508_v62  ;;  %v1448_v4 = vpop.f32.mrf.mxu3  ;;  %v1521_v31 = vand.u32 2147483648, %v1508_v62  ;;  %v1519_v0 = vand.u32 2147483647, %v1508_v62  ;;  %vm1515_vm9 = vweird.f32 %v1508_v62 }
 0x475   :  { %v1483_v1 = vpop.f32.mrf.mxu1 }
 0x476   :  { %v1501_v63 = vadd.f32 %v1483_v1, %v378_v37  ;;  %v1522_v51 = vor.u32 1.1754944e-38, %v1521_v31  ;;  %vm1520_vm11 = vcmp.eq.f32.partialorder %v1519_v0, 8.507059e+37 }
 0x478   :  { %v3165_v60 = vmul.f32 -1.442695, %v1501_v63 }
 0x47a   :  { %v3489_v14 = vpop.eup %3488  ;;  %3490 = vpow2.f32 %v3165_v60  ;;  %v4500_v60 = vld [vmem:[%s4974_s4] ss:$0 sm:$0xff] }
 0x47b   :  { %v1496_v55 = vpop.f32.mrf.mxu2  ;;  %v1511_v40 = vmul.f32 %v3489_v14, %v1508_v62  ;;  %vm1516_vm8 = vweird.f32 %v3489_v14 }
 0x47c   :  { %vm1517_vm10 = vmor %vm1515_vm9, %vm1516_vm8  ;;  %v1540_v1 = vadd.f32 %v4500_v60, %v1496_v55 }
 0x47d   :  { %v1512_v50 = vsub.f32 1.0, %v1511_v40  ;;  %v1485_v18 = vpop.f32.mrf.mxu1 }
 0x47e   :  { %v5105_v18 = vld [vmem:[#allocation47_spill] sm:$0xff] }
 0x47f   :  { %v1513_v46 = vmul.f32 %v3489_v14, %v1512_v50  ;;  %v407_v40 = vadd.f32 %v5105_v18, %v4124_v36 }
 0x480   :  { %v3491_v42 = vpop.eup %3490 }
 0x481   :  { %v1509_v2 = vadd.f32 1.0, %v3491_v42  ;;  %v1514_v54 = vadd.f32 %v3489_v14, %v1513_v46 }
 0x483   :  { %3492 = vrcp.f32 %v1509_v2  ;;  %v1498_v4 = vpop.f32.mrf.mxu2  ;;  %v1518_v37 = vsel %vm1517_vm10, %v3489_v14, %v1514_v54  ;;  %v1534_v14 = vand.u32 2147483647, %v1509_v2  ;;  %vm1530_vm13 = vweird.f32 %v1509_v2 }
 0x484   :  { %v1523_v63 = vsel %vm1520_vm11, %v1522_v51, %v1518_v37  ;;  %v1536_v4 = vand.u32 2147483648, %v1509_v2 }
 0x485   :  { %v1541_v50 = vmul.f32 %v1540_v1, %v1523_v63  ;;  %vm1535_vm15 = vcmp.eq.f32.partialorder %v1534_v14, 8.507059e+37 }
 0x486   :  { %v1537_v16 = vor.u32 1.1754944e-38, %v1536_v4 }
 0x487   :  { %v1542_v46 = vadd.f32 %v1541_v50, %v407_v40 }
 0x489   :  { %v3493_v62 = vpop.eup %3492  ;;  %3494 = vtanh.f32 %v1542_v46 }
 0x48a   :  { %v1526_v42 = vmul.f32 %v3493_v62, %v1509_v2  ;;  %vm1531_vm12 = vweird.f32 %v3493_v62 }
 0x48b   :  { %vm1532_vm14 = vmor %vm1530_vm13, %vm1531_vm12 }
 0x48c   :  { %v1527_v31 = vsub.f32 1.0, %v1526_v42 }
 0x48e   :  { %v1528_v54 = vmul.f32 %v3493_v62, %v1527_v31 }
 0x48f   :  { %v3495_v0 = vpop.eup %3494 }
 0x490   :  { %v1529_v25 = vadd.f32 %v3493_v62, %v1528_v54  ;;  %v1544_v51 = vsub.f32 %v4435_v53, %v3495_v0 }
 0x492   :  { %v1533_v55 = vsel %vm1532_vm14, %v3493_v62, %v1529_v25  ;;  %v5115_v62 = vld [vmem:[#allocation49_spill] sm:$0xff] }
 0x493   :  { %v1538_v37 = vsel %vm1535_vm15, %v1537_v16, %v1533_v55  ;;  %v410_v42 = vadd.f32 %v5115_v62, %v4124_v36  ;;  %v3409_v62 = vld [vmem:[#allocation13 + $0xb8] sm:$0xf0] }
 0x494   :  { %v1545_v1 = vmul.f32 %v1544_v51, %v1538_v37 }
 0x496   :  { %v4506_v63 = vadd.f32 %v3495_v0, %v1545_v1 }
 0x498   :  { %v1547_v18 = vpack.c.bf16 %v4506_v63, %v4506_v63 }
 0x49a   :  { %1556 = vmatmul.bf16.vlgmr.msrb.gmra.mxu3 %v1547_v18  ;;  %1569 = vmatmul.bf16.vlgmr.msrb.gmra.mxu0 %v1547_v18 }
 0x49b   :  { %1582 = vmatmul.bf16.vlgmr.msrb.gmra.mxu1 %v1547_v18  ;;  %1606 = vmatmul.bf16.vlgmr.msrb.gmra.mxu2 %v1547_v18 }
 0x49c   :  { %1711 = vmatpush.bf16.msrb.mxu3 %v4032_v48  ;;  %1735 = vmatpush.bf16.msrb.mxu0 %v3908_v7  ;;  %v5106_v7 = vld [vmem:[#allocation30_spill] sm:$0xff] }
 0x49d   :  { %1761 = vmatpush.bf16.msrb.mxu2 %v3931_v12  ;;  %1748 = vmatpush.bf16.msrb.mxu1 %v3933_v15 }
 0x4a0   :  { %1712 = vmatpush.bf16.msrb.mxu3 %v4044_v3  ;;  %1736 = vmatpush.bf16.msrb.mxu0 %v3911_v11  ;;  %v5107_v11 = vld [vmem:[#allocation31_spill] sm:$0xff] }
 0x4a1   :  { %1762 = vmatpush.bf16.msrb.mxu2 %v3939_v28  ;;  %1749 = vmatpush.bf16.msrb.mxu1 %v3942_v30  ;;  %v5112_v28 = vld [vmem:[#allocation38_spill] sm:$0xff] }
 0x4a4   :  { %1713 = vmatpush.bf16.msrb.mxu3 %v4057_v35  ;;  %1737 = vmatpush.bf16.msrb.mxu0 %v3914_v17  ;;  %v5108_v17 = vld [vmem:[#allocation33_spill] sm:$0xff] }
 0x4a5   :  { %1763 = vmatpush.bf16.msrb.mxu2 %v3947_v43  ;;  %1750 = vmatpush.bf16.msrb.mxu1 %v3950_v44 }
 0x4a8   :  { %1714 = vmatpush.bf16.msrb.mxu3 %v4073_v22  ;;  %1738 = vmatpush.bf16.msrb.mxu0 %v3917_v23  ;;  %v5109_v23 = vld [vmem:[#allocation34_spill] sm:$0xff] }
 0x4a9   :  { %1764 = vmatpush.bf16.msrb.mxu2 %v3953_v56  ;;  %1751 = vmatpush.bf16.msrb.mxu1 %v3956_v57 }
 0x4aa   :  { %1619 = vmatmul.bf16.vlgmr.msra.gmra.mxu3 %v1547_v18  ;;  %1632 = vmatmul.bf16.vlgmr.msra.gmra.mxu0 %v1547_v18 }
 0x4ac   :  { %1715 = vmatpush.bf16.msrb.mxu3 %v4087_v8  ;;  %1739 = vmatpush.bf16.msrb.mxu0 %v3920_v34  ;;  %v5110_v34 = vld [vmem:[#allocation36_spill] sm:$0xff] }
 0x4ad   :  { %1765 = vmatpush.bf16.msrb.mxu2 %v3959_v5  ;;  %1752 = vmatpush.bf16.msrb.mxu1 %v3962_v6 }
 0x4b0   :  { %1716 = vmatpush.bf16.msrb.mxu3 %v4093_v24  ;;  %1740 = vmatpush.bf16.msrb.mxu0 %v3923_v45  ;;  %v5111_v45 = vld [vmem:[#allocation37_spill] sm:$0xff] }
 0x4b1   :  { %1766 = vmatpush.bf16.msrb.mxu2 %v3966_v19  ;;  %1753 = vmatpush.bf16.msrb.mxu1 %v3969_v20 }
 0x4b4   :  { %1717 = vmatpush.bf16.msrb.mxu3 %v4105_v27  ;;  %1741 = vmatpush.bf16.msrb.mxu0 %v3926_v59 }
 0x4b5   :  { %1767 = vmatpush.bf16.msrb.mxu2 %v3972_v32  ;;  %1754 = vmatpush.bf16.msrb.mxu1 %v3975_v33  ;;  %v5113_v32 = vld [vmem:[#allocation29_spill] sm:$0xff]  ;;  %v5114_v33 = vld [vmem:[#allocation48_spill] sm:$0xff] }
 0x4b8   :  { %1718 = vmatpush.bf16.msrb.mxu3 %v4111_v49  ;;  %1742 = vmatpush.bf16.msrb.mxu0 %v3929_v10 }
 0x4b9   :  { %1768 = vmatpush.bf16.msrb.mxu2 %v3978_v39  ;;  %1755 = vmatpush.bf16.msrb.mxu1 %v3981_v41  ;;  %v381_v39 = vadd.f32 %v5114_v33, %v5113_v32 }
 0x4bc   :  { %1822 = vmatpush.bf16.msra.mxu3 %v3996_v52  ;;  %1835 = vmatpush.bf16.msra.mxu0 %v4001_v61 }
 0x4c0   :  { %1823 = vmatpush.bf16.msra.mxu3 %v3999_v58  ;;  %1836 = vmatpush.bf16.msra.mxu0 %v4014_v9 }
 0x4c4   :  { %1824 = vmatpush.bf16.msra.mxu3 %v4021_v26  ;;  %1837 = vmatpush.bf16.msra.mxu0 %v4023_v29 }
 0x4c8   :  { %1825 = vmatpush.bf16.msra.mxu3 %v4028_v38  ;;  %1838 = vmatpush.bf16.msra.mxu0 %v5045_v21 }
 0x4cc   :  { %1826 = vmatpush.bf16.msra.mxu3 %v5091_v13  ;;  %1839 = vmatpush.bf16.msra.mxu0 %v5077_v47 }
 0x4d0   :  { %1827 = vmatpush.bf16.msra.mxu3 %v5106_v7  ;;  %1840 = vmatpush.bf16.msra.mxu0 %v5107_v11 }
 0x4d4   :  { %1828 = vmatpush.bf16.msra.mxu3 %v5108_v17  ;;  %1841 = vmatpush.bf16.msra.mxu0 %v5109_v23 }
 0x4d8   :  { %1829 = vmatpush.bf16.msra.mxu3 %v5110_v34  ;;  %1842 = vmatpush.bf16.msra.mxu0 %v5111_v45  ;;  %v3256_v45 = vld [vmem:[#allocation13 + $0xa8] sm:$0xf] }
 0x517   :  { %v4558_v59 = vpop.f32.mrf.mxu0 }
 0x518   :  { %v4560_v10 = vpop.f32.mrf.mxu1 }
 0x51d   :  { %v4562_v12 = vpop.f32.mrf.mxu3 }
 0x51e   :  { %v1607_v15 = vpop.f32.mrf.mxu2 }
 0x51f   :  { %v1637_v30 = vadd.f32 %v1607_v15, %v5112_v28  ;;  %v1572_v43 = vpop.f32.mrf.mxu0  ;;  %v3408_v15 = vld [vmem:[#allocation13 + $0xb0] sm:$0xf0] }
 0x520   :  { %v1585_v44 = vpop.f32.mrf.mxu1  ;;  %v4575_v43 = vor.u32 %v3408_v15, %v3256_v45  ;;  %v3234_v45 = vld [vmem:[#allocation13 + $0x84] sm:$0xf0]  ;;  %v3240_v15 = vld [vmem:[#allocation13 + $0x80] sm:$0xf] }
 0x521   :  { %v3166_v56 = vmul.f32 -1.442695, %v1637_v30  ;;  %v3244_v44 = vld [vmem:[#allocation13 + $0x90] sm:$0xf] }
 0x523   :  { %3496 = vpow2.f32 %v3166_v56  ;;  %v3405_v56 = vld [vmem:[#allocation13 + $0x98] sm:$0xf0] }
 0x525   :  { %v1559_v57 = vpop.f32.mrf.mxu3 }
 0x526   :  { %v1609_v5 = vpop.f32.mrf.mxu2  ;;  %v3232_v57 = vld [vmem:[#allocation13 + $0x78] sm:$0xf] }
 0x527   :  { %v1633_v6 = vpop.f32.mrf.mxu0  ;;  %v3402_v5 = vld [vmem:[#allocation13 + $0x80] sm:$0xf0] }
 0x528   :  { %v1677_v50 = vadd.f32 %v4500_v60, %v1633_v6  ;;  %v4582_v6 = vor.u32 %v3402_v5, %v3232_v57 }
 0x529   :  { %v3497_v19 = vpop.eup %3496 }
 0x52a   :  { %v1645_v20 = vadd.f32 1.0, %v3497_v19  ;;  %v3220_v19 = vld [vmem:[#allocation13 + $0x60] sm:$0xf] }
 0x52c   :  { %3498 = vrcp.f32 %v1645_v20  ;;  %v1658_v21 = vand.u32 2147483648, %v1645_v20  ;;  %v1656_v53 = vand.u32 2147483647, %v1645_v20  ;;  %vm1652_vm1 = vweird.f32 %v1645_v20 }
 0x52d   :  { %v1620_v41 = vpop.f32.mrf.mxu3 }
 0x52e   :  { %v1638_v52 = vadd.f32 %v1620_v41, %v381_v39  ;;  %v1659_v2 = vor.u32 1.1754944e-38, %v1658_v21  ;;  %vm1657_vm3 = vcmp.eq.f32.partialorder %v1656_v53, 8.507059e+37  ;;  %v3208_v39 = vld [vmem:[#allocation13 + $0x48] sm:$0xf]  ;;  %v3396_v41 = vld [vmem:[#allocation13 + $0x50] sm:$0xf0] }
 0x52f   :  { %v1635_v58 = vpop.f32.mrf.mxu0 }
 0x530   :  { %v3167_v61 = vmul.f32 -1.442695, %v1638_v52  ;;  %v3196_v52 = vld [vmem:[#allocation13 + $0x30] sm:$0xf]  ;;  %v3393_v58 = vld [vmem:[#allocation13 + $0x38] sm:$0xf0] }
 0x532   :  { %v3499_v9 = vpop.eup %3498  ;;  %3500 = vpow2.f32 %v3167_v61  ;;  %v3184_v61 = vld [vmem:[#allocation13 + $0x18] sm:$0xf] }
 0x533   :  { %v1648_v26 = vmul.f32 %v3499_v9, %v1645_v20  ;;  %vm1653_vm0 = vweird.f32 %v3499_v9  ;;  %v3399_v20 = vld [vmem:[#allocation13 + $0x68] sm:$0xf0] }
 0x534   :  { %vm1654_vm2 = vmor %vm1652_vm1, %vm1653_vm0  ;;  %v4586_v33 = vor.u32 %v3399_v20, %v3220_v19  ;;  %v3398_v19 = vld [vmem:[#allocation13 + $0x64] sm:$0xf] }
 0x535   :  { %v1649_v29 = vsub.f32 1.0, %v1648_v26  ;;  %v1622_v38 = vpop.f32.mrf.mxu3  ;;  %v3172_v26 = vld [vmem:[#allocation13] sm:$0xf] }
 0x537   :  { %v1650_v47 = vmul.f32 %v3499_v9, %v1649_v29 }
 0x538   :  { %v3501_v13 = vpop.eup %3500 }
 0x539   :  { %v1651_v16 = vadd.f32 %v3499_v9, %v1650_v47  ;;  %v1646_v25 = vadd.f32 1.0, %v3501_v13 }
 0x53b   :  { %v1655_v40 = vsel %vm1654_vm2, %v3499_v9, %v1651_v16  ;;  %3502 = vrcp.f32 %v1646_v25  ;;  %v1673_v55 = vand.u32 2147483648, %v1646_v25  ;;  %v1671_v37 = vand.u32 2147483647, %v1646_v25 }
 0x53c   :  { %v1660_v46 = vsel %vm1657_vm3, %v1659_v2, %v1655_v40  ;;  %vm1667_vm5 = vweird.f32 %v1646_v25  ;;  %v3258_v2 = vld [vmem:[#allocation13 + $0xb4] sm:$0xf0]  ;;  %v3264_v40 = vld [vmem:[#allocation13 + $0xb0] sm:$0xf] }
 0x53d   :  { %v1678_v31 = vmul.f32 %v1677_v50, %v1660_v46  ;;  %v1674_v7 = vor.u32 1.1754944e-38, %v1673_v55  ;;  %vm1672_vm7 = vcmp.eq.f32.partialorder %v1671_v37, 8.507059e+37 }
 0x53f   :  { %v1679_v4 = vadd.f32 %v1678_v31, %v410_v42  ;;  %v4626_v31 = vor.u32 %v3409_v62, %v3264_v40  ;;  %v3204_v40 = vld [vmem:[#allocation13 + $0x38] sm:$0xf] }
 0x541   :  { %v3503_v54 = vpop.eup %3502  ;;  %3504 = vtanh.f32 %v1679_v4  ;;  %v3404_v4 = vld [vmem:[#allocation13 + $0x94] sm:$0xf] }
 0x542   :  { %v1663_v14 = vmul.f32 %v3503_v54, %v1646_v25  ;;  %vm1668_vm4 = vweird.f32 %v3503_v54  ;;  %v3407_v25 = vld [vmem:[#allocation13 + $0xac] sm:$0xf] }
 0x543   :  { %vm1669_vm6 = vmor %vm1667_vm5, %vm1668_vm4  ;;  %v4624_v46 = vor.u32 %v3407_v25, %v3258_v2  ;;  %v3392_v25 = vld [vmem:[#allocation13 + $0x34] sm:$0xf]  ;;  %v3198_v2 = vld [vmem:[#allocation13 + $0x3c] sm:$0xf0] }
 0x544   :  { %v1664_v0 = vsub.f32 1.0, %v1663_v14  ;;  %v3252_v14 = vld [vmem:[#allocation13 + $0x98] sm:$0xf] }
 0x546   :  { %v1665_v51 = vmul.f32 %v3503_v54, %v1664_v0 }
 0x547   :  { %v3505_v1 = vpop.eup %3504 }
 0x548   :  { %v1666_v18 = vadd.f32 %v3503_v54, %v1665_v51  ;;  %v1681_v11 = vsub.f32 %v4506_v63, %v3505_v1  ;;  %v4578_v63 = vor.u32 %v3405_v56, %v3244_v44  ;;  %v3406_v51 = vld [vmem:[#allocation13 + $0xa0] sm:$0xf0] }
 0x54a   :  { %v1670_v17 = vsel %vm1669_vm6, %v3503_v54, %v1666_v18  ;;  %v3246_v54 = vld [vmem:[#allocation13 + $0x9c] sm:$0xf0] }
 0x54b   :  { %v1675_v23 = vsel %vm1672_vm7, %v1674_v7, %v1670_v17  ;;  %v4631_v55 = vor.u32 %v3404_v4, %v3246_v54  ;;  %v5119_v7 = vld [vmem:[#allocation50_spill] sm:$0xff] }
 0x54c   :  { %v1682_v34 = vmul.f32 %v1681_v11, %v1675_v23  ;;  %v383_v11 = vadd.f32 %v5119_v7, %v5113_v32  ;;  %v3401_v23 = vld [vmem:[#allocation13 + $0x7c] sm:$0xf]  ;;  %v3222_v32 = vld [vmem:[#allocation13 + $0x6c] sm:$0xf0] }
 0x54d   :  { %v4643_v56 = vor.u32 %v3401_v23, %v3234_v45  ;;  %v4650_v20 = vor.u32 %v3398_v19, %v3222_v32  ;;  %v3389_v7 = vld [vmem:[#allocation13 + $0x1c] sm:$0xf]  ;;  %v3391_v23 = vld [vmem:[#allocation13 + $0x28] sm:$0xf0]  ;;  %v3386_v32 = vld [vmem:[#allocation13 + $0x4] sm:$0xf] }
 0x54e   :  { %v4571_v28 = vadd.f32 %v3505_v1, %v1682_v34  ;;  %v4635_v1 = vor.u32 %v3406_v51, %v3252_v14  ;;  %v4665_v14 = vor.u32 %v3392_v25, %v3198_v2 }
 0x550   :  { %v1684_v30 = vpack.c.bf16 %v4571_v28, %v4571_v28 }
 0x552   :  { %1693 = vmatmul.bf16.vlgmr.msra.gmra.mxu1 %v1684_v30  ;;  %1706 = vmatmul.bf16.vlgmr.msra.gmra.mxu2 %v1684_v30 }
 0x553   :  { %1719 = vmatmul.bf16.vlgmr.msrb.gmra.mxu3 %v1684_v30  ;;  %1743 = vmatmul.bf16.vlgmr.msrb.gmra.mxu0 %v1684_v30 }
 0x554   :  { %2033 = vmatpush.bf16.msra.mxu2 %v4575_v43  ;;  %1848 = vmatpush.bf16.msra.mxu1 %v4032_v48  ;;  %v4590_v48 = vor.u32 %v3396_v41, %v3208_v39  ;;  %v3228_v39 = vld [vmem:[#allocation13 + $0x68] sm:$0xf]  ;;  %v3400_v41 = vld [vmem:[#allocation13 + $0x70] sm:$0xf0] }
 0x555   :  { %2046 = vmatpush.bf16.msrb.mxu3 %v4624_v46  ;;  %2059 = vmatpush.bf16.msrb.mxu0 %v4626_v31 }
 0x558   :  { %2034 = vmatpush.bf16.msra.mxu2 %v4578_v63  ;;  %1849 = vmatpush.bf16.msra.mxu1 %v4044_v3  ;;  %v4594_v3 = vor.u32 %v3393_v58, %v3196_v52  ;;  %v4652_v58 = vor.u32 %v3400_v41, %v3228_v39  ;;  %v3174_v39 = vld [vmem:[#allocation13 + $0xc] sm:$0xf0] }
 0x559   :  { %2047 = vmatpush.bf16.msrb.mxu3 %v4631_v55  ;;  %2060 = vmatpush.bf16.msrb.mxu0 %v4635_v1  ;;  %v5120_v41 = vld [vmem:[#allocation51_spill] sm:$0xff] }
 0x55c   :  { %2035 = vmatpush.bf16.msra.mxu2 %v4582_v6  ;;  %1850 = vmatpush.bf16.msra.mxu1 %v4057_v35  ;;  %v3390_v35 = vld [vmem:[#allocation13 + $0x20] sm:$0xf0] }
 0x55d   :  { %v4598_v9 = vor.u32 %v3390_v35, %v3184_v61  ;;  %2048 = vmatpush.bf16.msrb.mxu3 %v4643_v56 }
 0x560   :  { %2036 = vmatpush.bf16.msra.mxu2 %v4586_v33  ;;  %1851 = vmatpush.bf16.msra.mxu1 %v4073_v22  ;;  %v3387_v22 = vld [vmem:[#allocation13 + $0x8] sm:$0xf0] }
 0x561   :  { %v4602_v29 = vor.u32 %v3387_v22, %v3172_v26  ;;  %v3395_v26 = vld [vmem:[#allocation13 + $0x4c] sm:$0xf]  ;;  %v3210_v22 = vld [vmem:[#allocation13 + $0x54] sm:$0xf0]  ;;  %2049 = vmatpush.bf16.msrb.mxu3 %v4650_v20 }
 0x562   :  { %1756 = vmatmul.bf16.vlgmr.msrb.gmra.mxu1 %v1684_v30  ;;  %1769 = vmatmul.bf16.vlgmr.msrb.gmra.mxu2 %v1684_v30  ;;  %v3403_v30 = vld [vmem:[#allocation13 + $0x88] sm:$0xf0] }
 0x563   :  { %v4645_v57 = vor.u32 %v3403_v30, %v3240_v15  ;;  %v4676_v15 = vld [vmem:[%s4976_s6] sm:$0x7] }
 0x564   :  { %2037 = vmatpush.bf16.msra.mxu2 %v4590_v48  ;;  %1852 = vmatpush.bf16.msra.mxu1 %v4087_v8  ;;  %v5116_v8 = vmov 0  }
 0x565   :  { %2061 = vmatpush.bf16.msrb.mxu0 %v4645_v57 }
 0x568   :  { %2038 = vmatpush.bf16.msra.mxu2 %v4594_v3  ;;  %1853 = vmatpush.bf16.msra.mxu1 %v4093_v24  ;;  %v5117_v24 = vld [vmem:[#allocation23_spill] sm:$0xff] }
 0x569   :  { %2062 = vmatpush.bf16.msrb.mxu0 %v4652_v58 }
 0x56c   :  { %2039 = vmatpush.bf16.msra.mxu2 %v4598_v9  ;;  %1854 = vmatpush.bf16.msra.mxu1 %v4105_v27 }
 0x570   :  { %2040 = vmatpush.bf16.msra.mxu2 %v4602_v29  ;;  %1855 = vmatpush.bf16.msra.mxu1 %v4111_v49  ;;  %v5118_v49 = vld [vmem:[#allocation39_spill] sm:$0xff] }
 0x571   :  { %v354_v27 = vadd.f32 %v5118_v49, %v5117_v24  ;;  %v3216_v24 = vld [vmem:[#allocation13 + $0x50] sm:$0xf]  ;;  %v4656_v49 = vor.u32 %v3395_v26, %v3210_v22  ;;  %v3180_v26 = vld [vmem:[#allocation13 + $0x8] sm:$0xf]  ;;  %v3388_v22 = vld [vmem:[#allocation13 + $0x10] sm:$0xf0] }
 0x573   :  { %2041 = vmatmul.bf16.vlgmr.msra.gmra.mxu2 %v5116_v8  ;;  %2050 = vmatpush.bf16.msrb.mxu3 %v4656_v49 }
 0x574   :  { %2123 = vmatpush.bf16.msrb.mxu1 %v4575_v43  ;;  %2136 = vmatpush.bf16.msrb.mxu2 %v4624_v46 }
 0x577   :  { %2051 = vmatpush.bf16.msrb.mxu3 %v4665_v14 }
 0x578   :  { %2124 = vmatpush.bf16.msrb.mxu1 %v4578_v63  ;;  %2137 = vmatpush.bf16.msrb.mxu2 %v4631_v55 }
 0x57c   :  { %2125 = vmatpush.bf16.msrb.mxu1 %v4582_v6  ;;  %2138 = vmatpush.bf16.msrb.mxu2 %v4643_v56 }
 0x580   :  { %2126 = vmatpush.bf16.msrb.mxu1 %v4586_v33  ;;  %2139 = vmatpush.bf16.msrb.mxu2 %v4650_v20 }
 0x584   :  { %2127 = vmatpush.bf16.msrb.mxu1 %v4590_v48  ;;  %2140 = vmatpush.bf16.msrb.mxu2 %v4656_v49 }
 0x588   :  { %2128 = vmatpush.bf16.msrb.mxu1 %v4594_v3  ;;  %2141 = vmatpush.bf16.msrb.mxu2 %v4665_v14 }
 0x58c   :  { %2129 = vmatpush.bf16.msrb.mxu1 %v4598_v9 }
 0x590   :  { %2130 = vmatpush.bf16.msrb.mxu1 %v4602_v29 }
 0x5cf   :  { %v4618_v38 = vpop.f32.mrf.mxu1 }
 0x5d0   :  { %v1744_v21 = vpop.f32.mrf.mxu0 }
 0x5d1   :  { %v1774_v47 = vadd.f32 %v1744_v21, %v354_v27  ;;  %v3397_v27 = vld [vmem:[#allocation13 + $0x58] sm:$0xf0] }
 0x5d3   :  { %v3168_v53 = vmul.f32 -1.442695, %v1774_v47 }
 0x5d5   :  { %3506 = vpow2.f32 %v3168_v53  ;;  %v4620_v13 = vpop.f32.mrf.mxu2  ;;  %v4660_v53 = vor.u32 %v3397_v27, %v3216_v24  ;;  %v4692_v24 = vor.u32 %v3386_v32, %v3174_v39 }
 0x5d6   :  { %v4622_v16 = vpop.f32.mrf.mxu3 }
 0x5d7   :  { %v1696_v50 = vpop.f32.mrf.mxu1  ;;  %2063 = vmatpush.bf16.msrb.mxu0 %v4660_v53 }
 0x5d8   :  { %v1746_v42 = vpop.f32.mrf.mxu0  ;;  %v3394_v50 = vld [vmem:[#allocation13 + $0x40] sm:$0xf0] }
 0x5db   :  { %v3507_v0 = vpop.eup %3506 }
 0x5dc   :  { %v4633_v37 = vadd.f32 1.0, %v3507_v0 }
 0x5dd   :  { %v1709_v18 = vpop.f32.mrf.mxu2 }
 0x5de   :  { %3508 = vrcp.f32 %v4633_v37  ;;  %v1722_v17 = vpop.f32.mrf.mxu3  ;;  %v1795_v42 = vand.u32 2147483648, %v4633_v37  ;;  %v1793_v54 = vand.u32 2147483647, %v4633_v37  ;;  %v4669_v18 = vor.u32 %v3394_v50, %v3204_v40 }
 0x5df   :  { %v1757_v34 = vpop.f32.mrf.mxu1  ;;  %vm1789_vm9 = vweird.f32 %v4633_v37  ;;  %v3192_v17 = vld [vmem:[#allocation13 + $0x20] sm:$0xf] }
 0x5e0   :  { %v1775_v44 = vadd.f32 %v1757_v34, %v383_v11  ;;  %v3186_v11 = vld [vmem:[#allocation13 + $0x24] sm:$0xf0]  ;;  %v1796_v34 = vor.u32 1.1754944e-38, %v1795_v42  ;;  %vm1794_vm11 = vcmp.eq.f32.partialorder %v1793_v54, 8.507059e+37  ;;  %2064 = vmatpush.bf16.msrb.mxu0 %v4669_v18  ;;  %v4684_v19 = vor.u32 %v3391_v23, %v3192_v17 }
 0x5e2   :  { %v3169_v5 = vmul.f32 -1.442695, %v1775_v44 }
 0x5e4   :  { %v3509_v52 = vpop.eup %3508  ;;  %3510 = vpow2.f32 %v3169_v5  ;;  %v4680_v5 = vor.u32 %v3389_v7, %v3186_v11  ;;  %2065 = vmatpush.bf16.msrb.mxu0 %v4684_v19 }
 0x5e5   :  { %v1770_v61 = vpop.f32.mrf.mxu2  ;;  %v1785_v35 = vmul.f32 %v3509_v52, %v4633_v37  ;;  %vm1790_vm8 = vweird.f32 %v3509_v52 }
 0x5e6   :  { %vm1791_vm10 = vmor %vm1789_vm9, %vm1790_vm8  ;;  %v1814_v44 = vadd.f32 %v4500_v60, %v1770_v61  ;;  %v4689_v60 = vperm.slane %v4676_v15, 0  ;;  %2052 = vmatpush.bf16.msrb.mxu3 %v4680_v5  ;;  %2142 = vmatpush.bf16.msrb.mxu2 %v4680_v5 }
 0x5e7   :  { %v1786_v21 = vsub.f32 1.0, %v1785_v35  ;;  %v1759_v47 = vpop.f32.mrf.mxu1  ;;  %v412_v35 = vadd.f32 %v5120_v41, %v4124_v36  ;;  %v5121_v36 = vld [vmem:[#allocation22_spill] sm:$0xff] }
 0x5e8   :  { %v873_v25 = vadd.f32 %v5121_v36, %v4689_v60  ;;  %v4766_v36 = vld [vmem:[%s4978_s8] ss:$0 sm:$0xff] }
 0x5e9   :  { %v1787_v62 = vmul.f32 %v3509_v52, %v1786_v21  ;;  %v4696_v21 = vor.u32 %v3388_v22, %v3180_v26 }
 0x5ea   :  { %v3511_v4 = vpop.eup %3510  ;;  %2053 = vmatpush.bf16.msrb.mxu3 %v4692_v24  ;;  %2143 = vmatpush.bf16.msrb.mxu2 %v4692_v24 }
 0x5eb   :  { %v1783_v0 = vadd.f32 1.0, %v3511_v4  ;;  %v1788_v51 = vadd.f32 %v3509_v52, %v1787_v62  ;;  %2066 = vmatpush.bf16.msrb.mxu0 %v4696_v21 }
 0x5ed   :  { %3512 = vrcp.f32 %v1783_v0  ;;  %v1772_v45 = vpop.f32.mrf.mxu2  ;;  %v1792_v30 = vsel %vm1791_vm10, %v3509_v52, %v1788_v51  ;;  %v1810_v50 = vand.u32 2147483648, %v1783_v0  ;;  %v1808_v4 = vand.u32 2147483647, %v1783_v0 }
 0x5ee   :  { %v1797_v37 = vsel %vm1794_vm11, %v1796_v34, %v1792_v30  ;;  %2239 = vmatpush.bf16.msra.mxu2 %v4626_v31  ;;  %vm1804_vm13 = vweird.f32 %v1783_v0 }
 0x5ef   :  { %v1815_v52 = vmul.f32 %v1814_v44, %v1797_v37  ;;  %v1811_v7 = vor.u32 1.1754944e-38, %v1810_v50  ;;  %vm1809_vm15 = vcmp.eq.f32.partialorder %v1808_v4, 8.507059e+37  ;;  %v4772_v4 = vperm.slane %v4676_v15, 1 }
 0x5f1   :  { %v1816_v61 = vadd.f32 %v1815_v52, %v412_v35 }
 0x5f2   :  { %2240 = vmatpush.bf16.msra.mxu2 %v4635_v1 }
 0x5f3   :  { %v3513_v27 = vpop.eup %3512  ;;  %3514 = vtanh.f32 %v1816_v61 }
 0x5f4   :  { %v1800_v47 = vmul.f32 %v3513_v27, %v1783_v0  ;;  %vm1805_vm12 = vweird.f32 %v3513_v27 }
 0x5f5   :  { %vm1806_vm14 = vmor %vm1804_vm13, %vm1805_vm12 }
 0x5f6   :  { %v1801_v2 = vsub.f32 1.0, %v1800_v47  ;;  %v2042_v40 = vpop.f32.mrf.mxu2  ;;  %2241 = vmatpush.bf16.msra.mxu2 %v4645_v57 }
 0x5f7   :  { %v4702_v62 = vadd.f32 %v2042_v40, %v873_v25  ;;  %v4769_v40 = vperm.slane %v4676_v15, 2 }
 0x5f8   :  { %v1802_v42 = vmul.f32 %v3513_v27, %v1801_v2 }
 0x5f9   :  { %v3515_v54 = vpop.eup %3514 }
 0x5fa   :  { %v1803_v51 = vadd.f32 %v3513_v27, %v1802_v42  ;;  %v1818_v17 = vsub.f32 %v4571_v28, %v3515_v54  ;;  %2242 = vmatpush.bf16.msra.mxu2 %v4652_v58  ;;  %v3266_v28 = vmul.f32 -1.442695, %v4702_v62 }
 0x5fc   :  { %v1807_v11 = vsel %vm1806_vm14, %v3513_v27, %v1803_v51  ;;  %3516 = vpow2.f32 %v3266_v28 }
 0x5fd   :  { %v1812_v23 = vsel %vm1809_vm15, %v1811_v7, %v1807_v11  ;;  %v5122_v7 = vld [vmem:[#allocation53_spill] sm:$0xff] }
 0x5fe   :  { %v1819_v34 = vmul.f32 %v1818_v17, %v1812_v23  ;;  %v2044_v45 = vpop.f32.mrf.mxu2  ;;  %2243 = vmatpush.bf16.msra.mxu2 %v4660_v53  ;;  %v899_v11 = vadd.f32 %v5122_v7, %v4769_v40  ;;  %v5123_v23 = vld [vmem:[#allocation52_spill] sm:$0xff] }
 0x600   :  { %v1820_v30 = vadd.f32 %v3515_v54, %v1819_v34  ;;  %v886_v34 = vadd.f32 %v5123_v23, %v4772_v4 }
 0x602   :  { %v1821_v44 = vpack.c.bf16 %v1820_v30, %v1820_v30  ;;  %2244 = vmatpush.bf16.msra.mxu2 %v4669_v18 }
 0x604   :  { %1830 = vmatmul.bf16.vlgmr.msra.gmra.mxu3 %v1821_v44  ;;  %1843 = vmatmul.bf16.vlgmr.msra.gmra.mxu0 %v1821_v44 }
 0x605   :  { %1856 = vmatmul.bf16.vlgmr.msra.gmra.mxu1 %v1821_v44  ;;  %2149 = vmatpush.bf16.msra.mxu3 %v4626_v31 }
 0x606   :  { %2213 = vmatpush.bf16.msra.mxu0 %v4575_v43  ;;  %2226 = vmatpush.bf16.msra.mxu1 %v4624_v46 }
 0x607   :  { %2245 = vmatpush.bf16.msra.mxu2 %v4684_v19 }
 0x609   :  { %2150 = vmatpush.bf16.msra.mxu3 %v4635_v1 }
 0x60a   :  { %2214 = vmatpush.bf16.msra.mxu0 %v4578_v63  ;;  %2227 = vmatpush.bf16.msra.mxu1 %v4631_v55 }
 0x60b   :  { %2246 = vmatpush.bf16.msra.mxu2 %v4696_v21 }
 0x60d   :  { %2151 = vmatpush.bf16.msra.mxu3 %v4645_v57 }
 0x60e   :  { %2215 = vmatpush.bf16.msra.mxu0 %v4582_v6  ;;  %2228 = vmatpush.bf16.msra.mxu1 %v4643_v56 }
 0x611   :  { %2152 = vmatpush.bf16.msra.mxu3 %v4652_v58 }
 0x612   :  { %2216 = vmatpush.bf16.msra.mxu0 %v4586_v33  ;;  %2229 = vmatpush.bf16.msra.mxu1 %v4650_v20 }
 0x614   :  { %2054 = vmatmul.bf16.vlgmr.msrb.gmra.mxu3 %v5116_v8  ;;  %2067 = vmatmul.bf16.vlgmr.msrb.gmra.mxu0 %v5116_v8  ;;  %v3517_v8 = vpop.eup %3516 }
 0x615   :  { %2153 = vmatpush.bf16.msra.mxu3 %v4660_v53  ;;  %v2080_v0 = vadd.f32 1.0, %v3517_v8 }
 0x616   :  { %2217 = vmatpush.bf16.msra.mxu0 %v4590_v48  ;;  %2230 = vmatpush.bf16.msra.mxu1 %v4656_v49 }
 0x617   :  { %3518 = vrcp.f32 %v2080_v0  ;;  %v2093_v47 = vand.u32 2147483648, %v2080_v0  ;;  %vm2087_vm1 = vweird.f32 %v2080_v0  ;;  %v2091_v25 = vand.u32 2147483647, %v2080_v0 }
 0x619   :  { %2154 = vmatpush.bf16.msra.mxu3 %v4669_v18  ;;  %v2094_v42 = vor.u32 1.1754944e-38, %v2093_v47  ;;  %vm2092_vm3 = vcmp.eq.f32.partialorder %v2091_v25, 8.507059e+37 }
 0x61a   :  { %2218 = vmatpush.bf16.msra.mxu0 %v4594_v3  ;;  %2231 = vmatpush.bf16.msra.mxu1 %v4665_v14 }
 0x61d   :  { %2155 = vmatpush.bf16.msra.mxu3 %v4684_v19  ;;  %v3519_v37 = vpop.eup %3518 }
 0x61e   :  { %2219 = vmatpush.bf16.msra.mxu0 %v4598_v9  ;;  %2232 = vmatpush.bf16.msra.mxu1 %v4680_v5  ;;  %v2083_v32 = vmul.f32 %v3519_v37, %v2080_v0  ;;  %vm2088_vm0 = vweird.f32 %v3519_v37 }
 0x61f   :  { %vm2089_vm2 = vmor %vm2087_vm1, %vm2088_vm0 }
 0x620   :  { %v2084_v35 = vsub.f32 1.0, %v2083_v32 }
 0x621   :  { %2156 = vmatpush.bf16.msra.mxu3 %v4696_v21 }
 0x622   :  { %2220 = vmatpush.bf16.msra.mxu0 %v4602_v29  ;;  %2233 = vmatpush.bf16.msra.mxu1 %v4692_v24  ;;  %v2085_v26 = vmul.f32 %v3519_v37, %v2084_v35 }
 0x624   :  { %v2086_v27 = vadd.f32 %v3519_v37, %v2085_v26 }
 0x625   :  { %2303 = vmatpush.bf16.msrb.mxu3 %v4575_v43 }
 0x626   :  { %2316 = vmatpush.bf16.msrb.mxu0 %v4624_v46  ;;  %v2090_v50 = vsel %vm2089_vm2, %v3519_v37, %v2086_v27 }
 0x627   :  { %v2095_v51 = vsel %vm2092_vm3, %v2094_v42, %v2090_v50 }
 0x629   :  { %2304 = vmatpush.bf16.msrb.mxu3 %v4578_v63 }
 0x62a   :  { %2317 = vmatpush.bf16.msrb.mxu0 %v4631_v55 }
 0x62d   :  { %2305 = vmatpush.bf16.msrb.mxu3 %v4582_v6 }
 0x62e   :  { %2318 = vmatpush.bf16.msrb.mxu0 %v4643_v56 }
 0x631   :  { %2306 = vmatpush.bf16.msrb.mxu3 %v4586_v33 }
 0x632   :  { %2319 = vmatpush.bf16.msrb.mxu0 %v4650_v20 }
 0x635   :  { %2307 = vmatpush.bf16.msrb.mxu3 %v4590_v48 }
 0x636   :  { %2320 = vmatpush.bf16.msrb.mxu0 %v4656_v49 }
 0x639   :  { %2308 = vmatpush.bf16.msrb.mxu3 %v4594_v3 }
 0x63a   :  { %2321 = vmatpush.bf16.msrb.mxu0 %v4665_v14 }
 0x63d   :  { %2309 = vmatpush.bf16.msrb.mxu3 %v4598_v9 }
 0x63e   :  { %2322 = vmatpush.bf16.msrb.mxu0 %v4680_v5 }
 0x641   :  { %2310 = vmatpush.bf16.msrb.mxu3 %v4602_v29 }
 0x642   :  { %2323 = vmatpush.bf16.msrb.mxu0 %v4692_v24 }
 0x681   :  { %v4757_v39 = vpop.f32.mrf.mxu0 }
 0x682   :  { %v4759_v41 = vpop.f32.mrf.mxu1 }
 0x687   :  { %v4761_v52 = vpop.f32.mrf.mxu3 }
 0x689   :  { %v1846_v22 = vpop.f32.mrf.mxu0 }
 0x68a   :  { %v1859_v61 = vpop.f32.mrf.mxu1 }
 0x68f   :  { %v1833_v2 = vpop.f32.mrf.mxu3 }
 0x691   :  { %v2068_v62 = vpop.f32.mrf.mxu0 }
 0x692   :  { %v2112_v54 = vadd.f32 %v4766_v36, %v2068_v62 }
 0x694   :  { %v2113_v17 = vmul.f32 %v2112_v54, %v2095_v51 }
 0x696   :  { %v2114_v45 = vadd.f32 %v2113_v17, %v899_v11  ;;  %v5124_v11 = vld [vmem:[#allocation55_spill] sm:$0xff] }
 0x697   :  { %v2055_v30 = vpop.f32.mrf.mxu3  ;;  %v1010_v17 = vadd.f32 %v5124_v11, %v4689_v60 }
 0x698   :  { %v2073_v44 = vadd.f32 %v2055_v30, %v886_v34  ;;  %v5125_v30 = vld [vmem:[#allocation25_spill] sm:$0xff] }
 0x699   :  { %v2070_v28 = vpop.f32.mrf.mxu0 }
 0x69a   :  { %v3267_v8 = vmul.f32 -1.442695, %v2073_v44  ;;  %v1023_v44 = vadd.f32 %v5125_v30, %v4772_v4 }
 0x69c   :  { %3520 = vpow2.f32 %v3267_v8 }
 0x69f   :  { %v2057_v0 = vpop.f32.mrf.mxu3 }
 0x6a2   :  { %v3521_v15 = vpop.eup %3520 }
 0x6a3   :  { %v2081_v37 = vadd.f32 1.0, %v3521_v15 }
 0x6a5   :  { %3522 = vrcp.f32 %v2081_v37  ;;  %v2108_v22 = vand.u32 2147483648, %v2081_v37  ;;  %v2106_v27 = vand.u32 2147483647, %v2081_v37  ;;  %vm2102_vm5 = vweird.f32 %v2081_v37 }
 0x6a6   :  { %3524 = vtanh.f32 %v2114_v45 }
 0x6a7   :  { %v2109_v2 = vor.u32 1.1754944e-38, %v2108_v22  ;;  %vm2107_vm7 = vcmp.eq.f32.partialorder %v2106_v27, 8.507059e+37 }
 0x6ab   :  { %v3523_v32 = vpop.eup %3522 }
 0x6ac   :  { %v2098_v35 = vmul.f32 %v3523_v32, %v2081_v37  ;;  %vm2103_vm4 = vweird.f32 %v3523_v32  ;;  %v3525_v47 = vpop.eup %3524 }
 0x6ad   :  { %vm2104_vm6 = vmor %vm2102_vm5, %vm2103_vm4  ;;  %v2116_v50 = vsub.f32 0.0, %v3525_v47 }
 0x6ae   :  { %v2099_v26 = vsub.f32 1.0, %v2098_v35 }
 0x6b0   :  { %v2100_v61 = vmul.f32 %v3523_v32, %v2099_v26 }
 0x6b2   :  { %v2101_v25 = vadd.f32 %v3523_v32, %v2100_v61 }
 0x6b4   :  { %v2105_v62 = vsel %vm2104_vm6, %v3523_v32, %v2101_v25 }
 0x6b5   :  { %v2110_v42 = vsel %vm2107_vm7, %v2109_v2, %v2105_v62 }
 0x6b6   :  { %v2117_v54 = vmul.f32 %v2116_v50, %v2110_v42 }
 0x6b8   :  { %v4779_v51 = vadd.f32 %v3525_v47, %v2117_v54 }
 0x6ba   :  { %v2122_v7 = vpack.c.bf16 %v4779_v51, %v4779_v51 }
 0x6bc   :  { %2131 = vmatmul.bf16.vlgmr.msrb.gmra.mxu1 %v2122_v7  ;;  %2144 = vmatmul.bf16.vlgmr.msrb.gmra.mxu2 %v2122_v7 }
 0x6bd   :  { %2157 = vmatmul.bf16.vlgmr.msra.gmra.mxu3 %v2122_v7  ;;  %2329 = vmatpush.bf16.msrb.mxu1 %v4626_v31 }
 0x6be   :  { %2393 = vmatpush.bf16.msrb.mxu2 %v4575_v43  ;;  %2406 = vmatpush.bf16.msra.mxu3 %v4624_v46 }
 0x6c1   :  { %2330 = vmatpush.bf16.msrb.mxu1 %v4635_v1 }
 0x6c2   :  { %2394 = vmatpush.bf16.msrb.mxu2 %v4578_v63  ;;  %2407 = vmatpush.bf16.msra.mxu3 %v4631_v55 }
 0x6c5   :  { %2331 = vmatpush.bf16.msrb.mxu1 %v4645_v57 }
 0x6c6   :  { %2395 = vmatpush.bf16.msrb.mxu2 %v4582_v6  ;;  %2408 = vmatpush.bf16.msra.mxu3 %v4643_v56 }
 0x6c9   :  { %2332 = vmatpush.bf16.msrb.mxu1 %v4652_v58 }
 0x6ca   :  { %2396 = vmatpush.bf16.msrb.mxu2 %v4586_v33  ;;  %2409 = vmatpush.bf16.msra.mxu3 %v4650_v20 }
 0x6cd   :  { %2333 = vmatpush.bf16.msrb.mxu1 %v4660_v53 }
 0x6ce   :  { %2397 = vmatpush.bf16.msrb.mxu2 %v4590_v48  ;;  %2410 = vmatpush.bf16.msra.mxu3 %v4656_v49 }
 0x6d1   :  { %2334 = vmatpush.bf16.msrb.mxu1 %v4669_v18 }
 0x6d2   :  { %2398 = vmatpush.bf16.msrb.mxu2 %v4594_v3  ;;  %2411 = vmatpush.bf16.msra.mxu3 %v4665_v14 }
 0x6d5   :  { %2335 = vmatpush.bf16.msrb.mxu1 %v4684_v19 }
 0x6d6   :  { %2399 = vmatpush.bf16.msrb.mxu2 %v4598_v9  ;;  %2412 = vmatpush.bf16.msra.mxu3 %v4680_v5 }
 0x6d9   :  { %2336 = vmatpush.bf16.msrb.mxu1 %v4696_v21 }
 0x6da   :  { %2400 = vmatpush.bf16.msrb.mxu2 %v4602_v29  ;;  %2413 = vmatpush.bf16.msra.mxu3 %v4692_v24 }
 0x739   :  { %v2132_v23 = vpop.f32.mrf.mxu1 }
 0x73a   :  { %v2162_v34 = vadd.f32 %v2132_v23, %v1010_v17 }
 0x73c   :  { %v3268_v45 = vmul.f32 -1.442695, %v2162_v34 }
 0x73e   :  { %3526 = vpow2.f32 %v3268_v45 }
 0x73f   :  { %v2145_v28 = vpop.f32.mrf.mxu2 }
 0x740   :  { %v2163_v8 = vadd.f32 %v2145_v28, %v1023_v44  ;;  %v2158_v0 = vpop.f32.mrf.mxu3  ;;  %v5126_v44 = vld [vmem:[#allocation54_spill] sm:$0xff] }
 0x741   :  { %v2134_v15 = vpop.f32.mrf.mxu1  ;;  %v2202_v45 = vadd.f32 %v4766_v36, %v2158_v0  ;;  %v1036_v28 = vadd.f32 %v5126_v44, %v4769_v40 }
 0x742   :  { %v3269_v37 = vmul.f32 -1.442695, %v2163_v8 }
 0x744   :  { %v3527_v32 = vpop.eup %3526  ;;  %3528 = vpow2.f32 %v3269_v37 }
 0x745   :  { %v2170_v35 = vadd.f32 1.0, %v3527_v32 }
 0x747   :  { %3530 = vrcp.f32 %v2170_v35  ;;  %v2147_v26 = vpop.f32.mrf.mxu2  ;;  %v2183_v50 = vand.u32 2147483648, %v2170_v35  ;;  %v2181_v42 = vand.u32 2147483647, %v2170_v35  ;;  %vm2177_vm9 = vweird.f32 %v2170_v35 }
 0x748   :  { %v2160_v22 = vpop.f32.mrf.mxu3 }
 0x749   :  { %v2184_v17 = vor.u32 1.1754944e-38, %v2183_v50  ;;  %vm2182_vm11 = vcmp.eq.f32.partialorder %v2181_v42, 8.507059e+37  ;;  %v5128_v42 = vld [vmem:[#allocation40_spill] sm:$0xff] }
 0x74a   :  { %v3529_v61 = vpop.eup %3528 }
 0x74b   :  { %v2171_v27 = vadd.f32 1.0, %v3529_v61 }
 0x74d   :  { %v3531_v47 = vpop.eup %3530  ;;  %3532 = vrcp.f32 %v2171_v27  ;;  %v2198_v26 = vand.u32 2147483648, %v2171_v27  ;;  %vm2192_vm13 = vweird.f32 %v2171_v27 }
 0x74e   :  { %v2173_v25 = vmul.f32 %v3531_v47, %v2170_v35  ;;  %vm2178_vm8 = vweird.f32 %v3531_v47  ;;  %v2196_v35 = vand.u32 2147483647, %v2171_v27 }
 0x74f   :  { %vm2179_vm10 = vmor %vm2177_vm9, %vm2178_vm8 }
 0x750   :  { %v2174_v2 = vsub.f32 1.0, %v2173_v25  ;;  %vm2197_vm15 = vcmp.eq.f32.partialorder %v2196_v35, 8.507059e+37 }
 0x752   :  { %v2175_v62 = vmul.f32 %v3531_v47, %v2174_v2 }
 0x753   :  { %v3533_v54 = vpop.eup %3532 }
 0x754   :  { %v2188_v7 = vmul.f32 %v3533_v54, %v2171_v27  ;;  %v2176_v11 = vadd.f32 %v3531_v47, %v2175_v62  ;;  %vm2193_vm12 = vweird.f32 %v3533_v54 }
 0x755   :  { %vm2194_vm14 = vmor %vm2192_vm13, %vm2193_vm12 }
 0x756   :  { %v2189_v23 = vsub.f32 1.0, %v2188_v7  ;;  %v2180_v34 = vsel %vm2179_vm10, %v3531_v47, %v2176_v11  ;;  %v2199_v47 = vor.u32 1.1754944e-38, %v2198_v26 }
 0x757   :  { %v2185_v30 = vsel %vm2182_vm11, %v2184_v17, %v2180_v34 }
 0x758   :  { %v2203_v8 = vmul.f32 %v2202_v45, %v2185_v30  ;;  %v2190_v15 = vmul.f32 %v3533_v54, %v2189_v23 }
 0x75a   :  { %v2204_v37 = vadd.f32 %v2203_v8, %v1036_v28  ;;  %v2191_v32 = vadd.f32 %v3533_v54, %v2190_v15 }
 0x75c   :  { %3534 = vtanh.f32 %v2204_v37  ;;  %v2195_v22 = vsel %vm2194_vm14, %v3533_v54, %v2191_v32  ;;  %v1160_v54 = vadd.f32 %v5128_v42, %v4772_v4 }
 0x75d   :  { %v2200_v25 = vsel %vm2197_vm15, %v2199_v47, %v2195_v22 }
 0x762   :  { %v3535_v61 = vpop.eup %3534 }
 0x763   :  { %v2206_v0 = vsub.f32 %v4779_v51, %v3535_v61  ;;  %v5127_v51 = vld [vmem:[#allocation24_spill] sm:$0xff] }
 0x764   :  { %v1147_v27 = vadd.f32 %v5127_v51, %v4689_v60 }
 0x765   :  { %v2207_v2 = vmul.f32 %v2206_v0, %v2200_v25 }
 0x767   :  { %v4815_v50 = vadd.f32 %v3535_v61, %v2207_v2 }
 0x769   :  { %v2212_v62 = vpack.c.bf16 %v4815_v50, %v4815_v50 }
 0x76b   :  { %2221 = vmatmul.bf16.vlgmr.msra.gmra.mxu0 %v2212_v62  ;;  %2234 = vmatmul.bf16.vlgmr.msra.gmra.mxu1 %v2212_v62 }
 0x76c   :  { %2247 = vmatmul.bf16.vlgmr.msra.gmra.mxu2 %v2212_v62  ;;  %2419 = vmatpush.bf16.msra.mxu0 %v4626_v31 }
 0x76d   :  { %2483 = vmatpush.bf16.msra.mxu1 %v4575_v43  ;;  %2496 = vmatpush.bf16.msra.mxu2 %v4624_v46 }
 0x770   :  { %2420 = vmatpush.bf16.msra.mxu0 %v4635_v1 }
 0x771   :  { %2484 = vmatpush.bf16.msra.mxu1 %v4578_v63  ;;  %2497 = vmatpush.bf16.msra.mxu2 %v4631_v55 }
 0x774   :  { %2421 = vmatpush.bf16.msra.mxu0 %v4645_v57 }
 0x775   :  { %2485 = vmatpush.bf16.msra.mxu1 %v4582_v6  ;;  %2498 = vmatpush.bf16.msra.mxu2 %v4643_v56 }
 0x778   :  { %2422 = vmatpush.bf16.msra.mxu0 %v4652_v58 }
 0x779   :  { %2486 = vmatpush.bf16.msra.mxu1 %v4586_v33  ;;  %2499 = vmatpush.bf16.msra.mxu2 %v4650_v20 }
 0x77c   :  { %2423 = vmatpush.bf16.msra.mxu0 %v4660_v53 }
 0x77d   :  { %2487 = vmatpush.bf16.msra.mxu1 %v4590_v48  ;;  %2500 = vmatpush.bf16.msra.mxu2 %v4656_v49 }
 0x780   :  { %2424 = vmatpush.bf16.msra.mxu0 %v4669_v18 }
 0x781   :  { %2488 = vmatpush.bf16.msra.mxu1 %v4594_v3  ;;  %2501 = vmatpush.bf16.msra.mxu2 %v4665_v14 }
 0x784   :  { %2425 = vmatpush.bf16.msra.mxu0 %v4684_v19 }
 0x785   :  { %2489 = vmatpush.bf16.msra.mxu1 %v4598_v9  ;;  %2502 = vmatpush.bf16.msra.mxu2 %v4680_v5 }
 0x788   :  { %2426 = vmatpush.bf16.msra.mxu0 %v4696_v21 }
 0x789   :  { %2490 = vmatpush.bf16.msra.mxu1 %v4602_v29  ;;  %2503 = vmatpush.bf16.msra.mxu2 %v4692_v24 }
 0x7e8   :  { %v2222_v7 = vpop.f32.mrf.mxu0  ;;  %v2235_v11 = vpop.f32.mrf.mxu1 }
 0x7e9   :  { %v2252_v17 = vadd.f32 %v2222_v7, %v1147_v27  ;;  %v2253_v23 = vadd.f32 %v2235_v11, %v1160_v54 }
 0x7eb   :  { %v3270_v34 = vmul.f32 -1.442695, %v2252_v17  ;;  %v3271_v45 = vmul.f32 -1.442695, %v2253_v23  ;;  %v5129_v17 = vld [vmem:[#allocation41_spill] sm:$0xff] }
 0x7ec   :  { %v1173_v23 = vadd.f32 %v5129_v17, %v4769_v40 }
 0x7ed   :  { %3536 = vpow2.f32 %v3270_v34 }
 0x7ee   :  { %3538 = vpow2.f32 %v3271_v45 }
 0x7ef   :  { %v2248_v30 = vpop.f32.mrf.mxu2 }
 0x7f0   :  { %v2224_v44 = vpop.f32.mrf.mxu0  ;;  %v2237_v28 = vpop.f32.mrf.mxu1  ;;  %v2292_v7 = vadd.f32 %v4766_v36, %v2248_v30 }
 0x7f3   :  { %v3537_v8 = vpop.eup %3536 }
 0x7f4   :  { %v3539_v15 = vpop.eup %3538  ;;  %v2260_v37 = vadd.f32 1.0, %v3537_v8 }
 0x7f5   :  { %v2261_v32 = vadd.f32 1.0, %v3539_v15 }
 0x7f6   :  { %3540 = vrcp.f32 %v2260_v37  ;;  %v2273_v25 = vand.u32 2147483648, %v2260_v37  ;;  %v2271_v62 = vand.u32 2147483647, %v2260_v37  ;;  %vm2267_vm1 = vweird.f32 %v2260_v37 }
 0x7f7   :  { %3542 = vrcp.f32 %v2261_v32  ;;  %v2250_v26 = vpop.f32.mrf.mxu2  ;;  %v2288_v8 = vand.u32 2147483648, %v2261_v32  ;;  %vm2282_vm5 = vweird.f32 %v2261_v32  ;;  %v2286_v15 = vand.u32 2147483647, %v2261_v32 }
 0x7f8   :  { %v2274_v42 = vor.u32 1.1754944e-38, %v2273_v25  ;;  %vm2272_vm3 = vcmp.eq.f32.partialorder %v2271_v62, 8.507059e+37 }
 0x7f9   :  { %vm2287_vm7 = vcmp.eq.f32.partialorder %v2286_v15, 8.507059e+37 }
 0x7fc   :  { %v3541_v35 = vpop.eup %3540 }
 0x7fd   :  { %v3543_v22 = vpop.eup %3542  ;;  %v2263_v61 = vmul.f32 %v3541_v35, %v2260_v37  ;;  %vm2268_vm0 = vweird.f32 %v3541_v35 }
 0x7fe   :  { %v2278_v0 = vmul.f32 %v3543_v22, %v2261_v32  ;;  %vm2269_vm2 = vmor %vm2267_vm1, %vm2268_vm0  ;;  %vm2283_vm4 = vweird.f32 %v3543_v22 }
 0x7ff   :  { %v2264_v47 = vsub.f32 1.0, %v2263_v61  ;;  %vm2284_vm6 = vmor %vm2282_vm5, %vm2283_vm4 }
 0x800   :  { %v2279_v27 = vsub.f32 1.0, %v2278_v0 }
 0x801   :  { %v2265_v2 = vmul.f32 %v3541_v35, %v2264_v47 }
 0x802   :  { %v2280_v45 = vmul.f32 %v3543_v22, %v2279_v27  ;;  %v5131_v27 = vld [vmem:[#allocation43_spill] sm:$0xff] }
 0x803   :  { %v2266_v51 = vadd.f32 %v3541_v35, %v2265_v2 }
 0x804   :  { %v2281_v28 = vadd.f32 %v3543_v22, %v2280_v45 }
 0x805   :  { %v2270_v54 = vsel %vm2269_vm2, %v3541_v35, %v2266_v51  ;;  %v2289_v35 = vor.u32 1.1754944e-38, %v2288_v8 }
 0x806   :  { %v2275_v11 = vsel %vm2272_vm3, %v2274_v42, %v2270_v54  ;;  %v2285_v37 = vsel %vm2284_vm6, %v3543_v22, %v2281_v28  ;;  %v1284_v42 = vadd.f32 %v5131_v27, %v4689_v60 }
 0x807   :  { %v2293_v34 = vmul.f32 %v2292_v7, %v2275_v11  ;;  %v2290_v61 = vsel %vm2287_vm7, %v2289_v35, %v2285_v37 }
 0x809   :  { %v2294_v44 = vadd.f32 %v2293_v34, %v1173_v23 }
 0x80b   :  { %3544 = vtanh.f32 %v2294_v44 }
 0x811   :  { %v3545_v26 = vpop.eup %3544 }
 0x812   :  { %v2296_v30 = vsub.f32 %v4815_v50, %v3545_v26  ;;  %v5130_v50 = vld [vmem:[#allocation26_spill] sm:$0xff] }
 0x813   :  { %v1297_v32 = vadd.f32 %v5130_v50, %v4772_v4 }
 0x814   :  { %v2297_v47 = vmul.f32 %v2296_v30, %v2290_v61 }
 0x816   :  { %v4851_v0 = vadd.f32 %v3545_v26, %v2297_v47 }
 0x818   :  { %v2302_v25 = vpack.c.bf16 %v4851_v0, %v4851_v0 }
 0x81a   :  { %2311 = vmatmul.bf16.vlgmr.msrb.gmra.mxu3 %v2302_v25  ;;  %2324 = vmatmul.bf16.vlgmr.msrb.gmra.mxu0 %v2302_v25 }
 0x81b   :  { %2337 = vmatmul.bf16.vlgmr.msrb.gmra.mxu1 %v2302_v25  ;;  %2509 = vmatpush.bf16.msrb.mxu3 %v4626_v31 }
 0x81c   :  { %2573 = vmatpush.bf16.msrb.mxu0 %v4575_v43  ;;  %2586 = vmatpush.bf16.msrb.mxu1 %v4624_v46 }
 0x81f   :  { %2510 = vmatpush.bf16.msrb.mxu3 %v4635_v1 }
 0x820   :  { %2574 = vmatpush.bf16.msrb.mxu0 %v4578_v63  ;;  %2587 = vmatpush.bf16.msrb.mxu1 %v4631_v55 }
 0x823   :  { %2511 = vmatpush.bf16.msrb.mxu3 %v4645_v57 }
 0x824   :  { %2575 = vmatpush.bf16.msrb.mxu0 %v4582_v6  ;;  %2588 = vmatpush.bf16.msrb.mxu1 %v4643_v56 }
 0x827   :  { %2512 = vmatpush.bf16.msrb.mxu3 %v4652_v58 }
 0x828   :  { %2576 = vmatpush.bf16.msrb.mxu0 %v4586_v33  ;;  %2589 = vmatpush.bf16.msrb.mxu1 %v4650_v20 }
 0x82b   :  { %2513 = vmatpush.bf16.msrb.mxu3 %v4660_v53 }
 0x82c   :  { %2577 = vmatpush.bf16.msrb.mxu0 %v4590_v48  ;;  %2590 = vmatpush.bf16.msrb.mxu1 %v4656_v49 }
 0x82f   :  { %2514 = vmatpush.bf16.msrb.mxu3 %v4669_v18 }
 0x830   :  { %2578 = vmatpush.bf16.msrb.mxu0 %v4594_v3  ;;  %2591 = vmatpush.bf16.msrb.mxu1 %v4665_v14 }
 0x833   :  { %2515 = vmatpush.bf16.msrb.mxu3 %v4684_v19 }
 0x834   :  { %2579 = vmatpush.bf16.msrb.mxu0 %v4598_v9  ;;  %2592 = vmatpush.bf16.msrb.mxu1 %v4680_v5 }
 0x837   :  { %2516 = vmatpush.bf16.msrb.mxu3 %v4696_v21 }
 0x838   :  { %2580 = vmatpush.bf16.msrb.mxu0 %v4602_v29  ;;  %2593 = vmatpush.bf16.msrb.mxu1 %v4692_v24 }
 0x897   :  { %v2325_v22 = vpop.f32.mrf.mxu0 }
 0x898   :  { %v2343_v2 = vadd.f32 %v2325_v22, %v1297_v32  ;;  %v2338_v62 = vpop.f32.mrf.mxu1 }
 0x89a   :  { %v3273_v51 = vmul.f32 -1.442695, %v2343_v2  ;;  %v2382_v2 = vadd.f32 %v4766_v36, %v2338_v62 }
 0x89c   :  { %3546 = vpow2.f32 %v3273_v51 }
 0x89d   :  { %v2312_v54 = vpop.f32.mrf.mxu3 }
 0x89e   :  { %v2342_v7 = vadd.f32 %v2312_v54, %v1284_v42  ;;  %v5132_v42 = vld [vmem:[#allocation42_spill] sm:$0xff] }
 0x89f   :  { %v2327_v11 = vpop.f32.mrf.mxu0  ;;  %v1310_v54 = vadd.f32 %v5132_v42, %v4769_v40 }
 0x8a0   :  { %v3272_v17 = vmul.f32 -1.442695, %v2342_v7  ;;  %v2340_v23 = vpop.f32.mrf.mxu1 }
 0x8a2   :  { %3548 = vpow2.f32 %v3272_v17  ;;  %v3547_v34 = vpop.eup %3546 }
 0x8a3   :  { %v2351_v28 = vadd.f32 1.0, %v3547_v34 }
 0x8a5   :  { %v2314_v45 = vpop.f32.mrf.mxu3  ;;  %v2378_v34 = vand.u32 2147483648, %v2351_v28  ;;  %vm2372_vm13 = vweird.f32 %v2351_v28 }
 0x8a6   :  { %v2376_v45 = vand.u32 2147483647, %v2351_v28 }
 0x8a8   :  { %v3549_v44 = vpop.eup %3548  ;;  %vm2377_vm15 = vcmp.eq.f32.partialorder %v2376_v45, 8.507059e+37 }
 0x8a9   :  { %v2350_v8 = vadd.f32 1.0, %v3549_v44 }
 0x8ab   :  { %3550 = vrcp.f32 %v2350_v8  ;;  %v2363_v61 = vand.u32 2147483648, %v2350_v8  ;;  %v2361_v25 = vand.u32 2147483647, %v2350_v8  ;;  %vm2357_vm9 = vweird.f32 %v2350_v8 }
 0x8ac   :  { %3552 = vrcp.f32 %v2351_v28 }
 0x8ad   :  { %v2364_v22 = vor.u32 1.1754944e-38, %v2363_v61  ;;  %vm2362_vm11 = vcmp.eq.f32.partialorder %v2361_v25, 8.507059e+37 }
 0x8b1   :  { %v3551_v15 = vpop.eup %3550 }
 0x8b2   :  { %v3553_v37 = vpop.eup %3552  ;;  %v2353_v26 = vmul.f32 %v3551_v15, %v2350_v8  ;;  %vm2358_vm8 = vweird.f32 %v3551_v15 }
 0x8b3   :  { %v2368_v30 = vmul.f32 %v3553_v37, %v2351_v28  ;;  %vm2359_vm10 = vmor %vm2357_vm9, %vm2358_vm8  ;;  %vm2373_vm12 = vweird.f32 %v3553_v37 }
 0x8b4   :  { %v2354_v35 = vsub.f32 1.0, %v2353_v26  ;;  %vm2374_vm14 = vmor %vm2372_vm13, %vm2373_vm12  ;;  %v2379_v26 = vor.u32 1.1754944e-38, %v2378_v34 }
 0x8b5   :  { %v2369_v32 = vsub.f32 1.0, %v2368_v30 }
 0x8b6   :  { %v2355_v47 = vmul.f32 %v3551_v15, %v2354_v35 }
 0x8b7   :  { %v2370_v11 = vmul.f32 %v3553_v37, %v2369_v32 }
 0x8b8   :  { %v2356_v50 = vadd.f32 %v3551_v15, %v2355_v47 }
 0x8b9   :  { %v2371_v23 = vadd.f32 %v3553_v37, %v2370_v11 }
 0x8ba   :  { %v2360_v51 = vsel %vm2359_vm10, %v3551_v15, %v2356_v50 }
 0x8bb   :  { %v2365_v27 = vsel %vm2362_vm11, %v2364_v22, %v2360_v51  ;;  %v2375_v44 = vsel %vm2374_vm14, %v3553_v37, %v2371_v23  ;;  %v5135_v23 = vld [vmem:[#allocation44_spill] sm:$0xff] }
 0x8bc   :  { %v2383_v7 = vmul.f32 %v2382_v2, %v2365_v27  ;;  %v2380_v15 = vsel %vm2377_vm15, %v2379_v26, %v2375_v44  ;;  %v1447_v34 = vadd.f32 %v5135_v23, %v4769_v40 }
 0x8be   :  { %v2384_v17 = vadd.f32 %v2383_v7, %v1310_v54 }
 0x8c0   :  { %3554 = vtanh.f32 %v2384_v17 }
 0x8c6   :  { %v3555_v8 = vpop.eup %3554 }
 0x8c7   :  { %v2386_v62 = vsub.f32 %v4851_v0, %v3555_v8 }
 0x8c9   :  { %v2387_v35 = vmul.f32 %v2386_v62, %v2380_v15 }
 0x8cb   :  { %v4887_v30 = vadd.f32 %v3555_v8, %v2387_v35 }
 0x8cd   :  { %v2392_v61 = vpack.c.bf16 %v4887_v30, %v4887_v30 }
 0x8cf   :  { %2401 = vmatmul.bf16.vlgmr.msrb.gmra.mxu2 %v2392_v61  ;;  %2414 = vmatmul.bf16.vlgmr.msra.gmra.mxu3 %v2392_v61 }
 0x8d0   :  { %2427 = vmatmul.bf16.vlgmr.msra.gmra.mxu0 %v2392_v61  ;;  %2599 = vmatpush.bf16.msrb.mxu2 %v4626_v31 }
 0x8d1   :  { %2663 = vmatpush.bf16.msra.mxu3 %v4575_v43  ;;  %2676 = vmatpush.bf16.msra.mxu0 %v4624_v46 }
 0x8d4   :  { %2600 = vmatpush.bf16.msrb.mxu2 %v4635_v1 }
 0x8d5   :  { %2664 = vmatpush.bf16.msra.mxu3 %v4578_v63  ;;  %2677 = vmatpush.bf16.msra.mxu0 %v4631_v55  ;;  %v5133_v63 = vld [vmem:[#allocation28_spill] sm:$0xff] }
 0x8d8   :  { %2601 = vmatpush.bf16.msrb.mxu2 %v4645_v57 }
 0x8d9   :  { %2665 = vmatpush.bf16.msra.mxu3 %v4582_v6  ;;  %2678 = vmatpush.bf16.msra.mxu0 %v4643_v56  ;;  %v1421_v6 = vadd.f32 %v5133_v63, %v4689_v60 }
 0x8dc   :  { %2602 = vmatpush.bf16.msrb.mxu2 %v4652_v58 }
 0x8dd   :  { %2666 = vmatpush.bf16.msra.mxu3 %v4586_v33  ;;  %2679 = vmatpush.bf16.msra.mxu0 %v4650_v20  ;;  %v5134_v33 = vld [vmem:[#allocation32_spill] sm:$0xff] }
 0x8e0   :  { %2603 = vmatpush.bf16.msrb.mxu2 %v4660_v53 }
 0x8e1   :  { %2667 = vmatpush.bf16.msra.mxu3 %v4590_v48  ;;  %2680 = vmatpush.bf16.msra.mxu0 %v4656_v49  ;;  %v1434_v48 = vadd.f32 %v5134_v33, %v4772_v4 }
 0x8e4   :  { %2604 = vmatpush.bf16.msrb.mxu2 %v4669_v18 }
 0x8e5   :  { %2668 = vmatpush.bf16.msra.mxu3 %v4594_v3  ;;  %2681 = vmatpush.bf16.msra.mxu0 %v4665_v14 }
 0x8e8   :  { %2605 = vmatpush.bf16.msrb.mxu2 %v4684_v19 }
 0x8e9   :  { %2669 = vmatpush.bf16.msra.mxu3 %v4598_v9  ;;  %2682 = vmatpush.bf16.msra.mxu0 %v4680_v5 }
 0x8ec   :  { %2606 = vmatpush.bf16.msrb.mxu2 %v4696_v21 }
 0x8ed   :  { %2670 = vmatpush.bf16.msra.mxu3 %v4602_v29  ;;  %2683 = vmatpush.bf16.msra.mxu0 %v4692_v24 }
 0x94d   :  { %v2428_v43 = vpop.f32.mrf.mxu0 }
 0x94e   :  { %v2472_v7 = vadd.f32 %v4766_v36, %v2428_v43 }
 0x952   :  { %v2402_v3 = vpop.f32.mrf.mxu2  ;;  %v2415_v46 = vpop.f32.mrf.mxu3 }
 0x953   :  { %v2432_v55 = vadd.f32 %v2402_v3, %v1421_v6  ;;  %v2433_v56 = vadd.f32 %v2415_v46, %v1434_v48 }
 0x955   :  { %v3274_v9 = vmul.f32 -1.442695, %v2432_v55  ;;  %v3275_v20 = vmul.f32 -1.442695, %v2433_v56  ;;  %v2430_v49 = vpop.f32.mrf.mxu0 }
 0x957   :  { %3556 = vpow2.f32 %v3274_v9 }
 0x958   :  { %3558 = vpow2.f32 %v3275_v20 }
 0x95a   :  { %v2404_v14 = vpop.f32.mrf.mxu2  ;;  %v2417_v29 = vpop.f32.mrf.mxu3 }
 0x95d   :  { %v3557_v5 = vpop.eup %3556 }
 0x95e   :  { %v3559_v24 = vpop.eup %3558  ;;  %v2440_v0 = vadd.f32 1.0, %v3557_v5 }
 0x95f   :  { %v2441_v28 = vadd.f32 1.0, %v3559_v24 }
 0x960   :  { %3560 = vrcp.f32 %v2440_v0  ;;  %v2453_v32 = vand.u32 2147483648, %v2440_v0  ;;  %v2451_v51 = vand.u32 2147483647, %v2440_v0  ;;  %vm2447_vm1 = vweird.f32 %v2440_v0 }
 0x961   :  { %3562 = vrcp.f32 %v2441_v28  ;;  %v2468_v62 = vand.u32 2147483648, %v2441_v28  ;;  %vm2462_vm5 = vweird.f32 %v2441_v28  ;;  %v2466_v15 = vand.u32 2147483647, %v2441_v28 }
 0x962   :  { %v2454_v42 = vor.u32 1.1754944e-38, %v2453_v32  ;;  %vm2452_vm3 = vcmp.eq.f32.partialorder %v2451_v51, 8.507059e+37  ;;  %v1584_v51 = vadd.f32 %v4560_v10, %v4769_v40 }
 0x963   :  { %v2469_v63 = vor.u32 1.1754944e-38, %v2468_v62  ;;  %vm2467_vm7 = vcmp.eq.f32.partialorder %v2466_v15, 8.507059e+37  ;;  %v1695_v15 = vadd.f32 %v4618_v38, %v4689_v60 }
 0x966   :  { %v3561_v37 = vpop.eup %3560 }
 0x967   :  { %v3563_v47 = vpop.eup %3562  ;;  %v2443_v25 = vmul.f32 %v3561_v37, %v2440_v0  ;;  %vm2448_vm0 = vweird.f32 %v3561_v37 }
 0x968   :  { %v2458_v22 = vmul.f32 %v3563_v47, %v2441_v28  ;;  %vm2449_vm2 = vmor %vm2447_vm1, %vm2448_vm0  ;;  %vm2463_vm4 = vweird.f32 %v3563_v47 }
 0x969   :  { %v2444_v50 = vsub.f32 1.0, %v2443_v25  ;;  %vm2464_vm6 = vmor %vm2462_vm5, %vm2463_vm4 }
 0x96a   :  { %v2459_v54 = vsub.f32 1.0, %v2458_v22 }
 0x96b   :  { %v2445_v2 = vmul.f32 %v3561_v37, %v2444_v50 }
 0x96c   :  { %v2460_v44 = vmul.f32 %v3563_v47, %v2459_v54 }
 0x96d   :  { %v2446_v27 = vadd.f32 %v3561_v37, %v2445_v2 }
 0x96e   :  { %v2461_v26 = vadd.f32 %v3563_v47, %v2460_v44 }
 0x96f   :  { %v2450_v11 = vsel %vm2449_vm2, %v3561_v37, %v2446_v27 }
 0x970   :  { %v2455_v17 = vsel %vm2452_vm3, %v2454_v42, %v2450_v11  ;;  %v2465_v35 = vsel %vm2464_vm6, %v3563_v47, %v2461_v26 }
 0x971   :  { %v2473_v45 = vmul.f32 %v2472_v7, %v2455_v17  ;;  %v2470_v6 = vsel %vm2467_vm7, %v2469_v63, %v2465_v35  ;;  %v1708_v35 = vadd.f32 %v4620_v13, %v4772_v4 }
 0x973   :  { %v2474_v8 = vadd.f32 %v2473_v45, %v1447_v34 }
 0x975   :  { %3564 = vtanh.f32 %v2474_v8 }
 0x97b   :  { %v3565_v61 = vpop.eup %3564 }
 0x97c   :  { %v2476_v43 = vsub.f32 %v4887_v30, %v3565_v61  ;;  %v1558_v30 = vadd.f32 %v4562_v12, %v4689_v60 }
 0x97e   :  { %v2477_v33 = vmul.f32 %v2476_v43, %v2470_v6 }
 0x980   :  { %v4923_v48 = vadd.f32 %v3565_v61, %v2477_v33 }
 0x982   :  { %v2482_v3 = vpack.c.bf16 %v4923_v48, %v4923_v48 }
 0x984   :  { %2491 = vmatmul.bf16.vlgmr.msra.gmra.mxu1 %v2482_v3  ;;  %2504 = vmatmul.bf16.vlgmr.msra.gmra.mxu2 %v2482_v3 }
 0x985   :  { %2517 = vmatmul.bf16.vlgmr.msrb.gmra.mxu3 %v2482_v3  ;;  %2689 = vmatpush.bf16.msra.mxu1 %v4626_v31 }
 0x989   :  { %2690 = vmatpush.bf16.msra.mxu1 %v4635_v1  ;;  %v1571_v1 = vadd.f32 %v4558_v59, %v4772_v4 }
 0x98d   :  { %2691 = vmatpush.bf16.msra.mxu1 %v4645_v57 }
 0x991   :  { %2692 = vmatpush.bf16.msra.mxu1 %v4652_v58 }
 0x995   :  { %2693 = vmatpush.bf16.msra.mxu1 %v4660_v53 }
 0x999   :  { %2694 = vmatpush.bf16.msra.mxu1 %v4669_v18 }
 0x99d   :  { %2695 = vmatpush.bf16.msra.mxu1 %v4684_v19 }
 0x9a1   :  { %2696 = vmatpush.bf16.msra.mxu1 %v4696_v21 }
 0xa01   :  { %v2492_v46 = vpop.f32.mrf.mxu1 }
 0xa02   :  { %v2522_v55 = vadd.f32 %v2492_v46, %v1558_v30 }
 0xa04   :  { %v3276_v31 = vmul.f32 -1.442695, %v2522_v55 }
 0xa06   :  { %3566 = vpow2.f32 %v3276_v31 }
 0xa07   :  { %v2505_v57 = vpop.f32.mrf.mxu2 }
 0xa08   :  { %v2523_v58 = vadd.f32 %v2505_v57, %v1571_v1  ;;  %v2518_v56 = vpop.f32.mrf.mxu3 }
 0xa09   :  { %v2494_v53 = vpop.f32.mrf.mxu1  ;;  %v2562_v22 = vadd.f32 %v4766_v36, %v2518_v56 }
 0xa0a   :  { %v3277_v9 = vmul.f32 -1.442695, %v2523_v58 }
 0xa0c   :  { %v3567_v18 = vpop.eup %3566  ;;  %3568 = vpow2.f32 %v3277_v9 }
 0xa0d   :  { %v2530_v19 = vadd.f32 1.0, %v3567_v18 }
 0xa0f   :  { %3570 = vrcp.f32 %v2530_v19  ;;  %v2507_v21 = vpop.f32.mrf.mxu2  ;;  %v2543_v24 = vand.u32 2147483648, %v2530_v19  ;;  %v2541_v0 = vand.u32 2147483647, %v2530_v19  ;;  %vm2537_vm9 = vweird.f32 %v2530_v19 }
 0xa10   :  { %v2520_v20 = vpop.f32.mrf.mxu3 }
 0xa11   :  { %v2544_v25 = vor.u32 1.1754944e-38, %v2543_v24  ;;  %vm2542_vm11 = vcmp.eq.f32.partialorder %v2541_v0, 8.507059e+37  ;;  %v1721_v24 = vadd.f32 %v4622_v16, %v4769_v40 }
 0xa12   :  { %v3569_v49 = vpop.eup %3568 }
 0xa13   :  { %v2531_v12 = vadd.f32 1.0, %v3569_v49 }
 0xa15   :  { %v3571_v14 = vpop.eup %3570  ;;  %3572 = vrcp.f32 %v2531_v12  ;;  %v2558_v11 = vand.u32 2147483648, %v2531_v12  ;;  %vm2552_vm13 = vweird.f32 %v2531_v12  ;;  %v2556_v17 = vand.u32 2147483647, %v2531_v12 }
 0xa16   :  { %v2533_v29 = vmul.f32 %v3571_v14, %v2530_v19  ;;  %vm2538_vm8 = vweird.f32 %v3571_v14 }
 0xa17   :  { %vm2539_vm10 = vmor %vm2537_vm9, %vm2538_vm8  ;;  %v2559_v45 = vor.u32 1.1754944e-38, %v2558_v11  ;;  %vm2557_vm15 = vcmp.eq.f32.partialorder %v2556_v17, 8.507059e+37 }
 0xa18   :  { %v2534_v5 = vsub.f32 1.0, %v2533_v29 }
 0xa1a   :  { %v2535_v59 = vmul.f32 %v3571_v14, %v2534_v5 }
 0xa1b   :  { %v3573_v28 = vpop.eup %3572 }
 0xa1c   :  { %v2548_v37 = vmul.f32 %v3573_v28, %v2531_v12  ;;  %v2536_v47 = vadd.f32 %v3571_v14, %v2535_v59  ;;  %vm2553_vm12 = vweird.f32 %v3573_v28 }
 0xa1d   :  { %vm2554_vm14 = vmor %vm2552_vm13, %vm2553_vm12 }
 0xa1e   :  { %v2549_v50 = vsub.f32 1.0, %v2548_v37  ;;  %v2540_v32 = vsel %vm2539_vm10, %v3571_v14, %v2536_v47 }
 0xa1f   :  { %v2545_v2 = vsel %vm2542_vm11, %v2544_v25, %v2540_v32 }
 0xa20   :  { %v2563_v27 = vmul.f32 %v2562_v22, %v2545_v2  ;;  %v2550_v42 = vmul.f32 %v3573_v28, %v2549_v50 }
 0xa22   :  { %v2564_v54 = vadd.f32 %v2563_v27, %v1584_v51  ;;  %v2551_v7 = vadd.f32 %v3573_v28, %v2550_v42  ;;  %v3417_v42 = vld [vmem:[#allocation15 + $0x38] sm:$0xff] }
 0xa23   :  { %2818 = vmatpush.bf16.msra.mxu2 %v3417_v42 }
 0xa24   :  { %3574 = vtanh.f32 %v2564_v54  ;;  %v2555_v23 = vsel %vm2554_vm14, %v3573_v28, %v2551_v7  ;;  %v1845_v54 = vadd.f32 %v4757_v39, %v4772_v4  ;;  %v3416_v7 = vld [vmem:[#allocation15 + $0x30] sm:$0xff]  ;;  %v3413_v39 = vld [vmem:[#allocation15 + $0x18] sm:$0xff] }
 0xa25   :  { %v2560_v8 = vsel %vm2557_vm15, %v2559_v45, %v2555_v23  ;;  %v3412_v4 = vld [vmem:[#allocation15 + $0x10] sm:$0xff] }
 0xa27   :  { %2819 = vmatpush.bf16.msra.mxu2 %v3416_v7 }
 0xa2a   :  { %v3575_v34 = vpop.eup %3574 }
 0xa2b   :  { %v2566_v44 = vsub.f32 %v4923_v48, %v3575_v34 }
 0xa2d   :  { %v2567_v26 = vmul.f32 %v2566_v44, %v2560_v8  ;;  %v1832_v44 = vadd.f32 %v4761_v52, %v4689_v60  ;;  %v3414_v8 = vld [vmem:[#allocation15 + $0x20] sm:$0xff] }
 0xa2e   :  { %v3410_v52 = vld [vmem:[#allocation15] sm:$0xff] }
 0xa2f   :  { %v2568_v62 = vadd.f32 %v3575_v34, %v2567_v26  ;;  %v3415_v34 = vld [vmem:[#allocation15 + $0x28] sm:$0xff] }
 0xa30   :  { %2820 = vmatpush.bf16.msra.mxu2 %v3415_v34 }
 0xa31   :  { %v2572_v10 = vpack.c.bf16 %v2568_v62, %v2568_v62 }
 0xa33   :  { %2581 = vmatmul.bf16.vlgmr.msrb.gmra.mxu0 %v2572_v10  ;;  %2594 = vmatmul.bf16.vlgmr.msrb.gmra.mxu1 %v2572_v10 }
 0xa34   :  { %2607 = vmatmul.bf16.vlgmr.msrb.gmra.mxu2 %v2572_v10 }
 0xa35   :  { %2821 = vmatpush.bf16.msra.mxu2 %v3414_v8 }
 0xa39   :  { %2822 = vmatpush.bf16.msra.mxu2 %v3413_v39 }
 0xa3d   :  { %2823 = vmatpush.bf16.msra.mxu2 %v3412_v4 }
 0xab0   :  { %v2582_v61 = vpop.f32.mrf.mxu0  ;;  %v2595_v63 = vpop.f32.mrf.mxu1 }
 0xab1   :  { %v2612_v43 = vadd.f32 %v2582_v61, %v1695_v15  ;;  %v2613_v6 = vadd.f32 %v2595_v63, %v1708_v35 }
 0xab3   :  { %v3278_v33 = vmul.f32 -1.442695, %v2612_v43  ;;  %v3279_v3 = vmul.f32 -1.442695, %v2613_v6 }
 0xab5   :  { %3576 = vpow2.f32 %v3278_v33  ;;  %v3411_v33 = vld [vmem:[#allocation15 + $0x8] sm:$0xff] }
 0xab6   :  { %3578 = vpow2.f32 %v3279_v3  ;;  %2824 = vmatpush.bf16.msra.mxu2 %v3411_v33 }
 0xab7   :  { %v2608_v48 = vpop.f32.mrf.mxu2 }
 0xab8   :  { %v2584_v30 = vpop.f32.mrf.mxu0  ;;  %v2597_v46 = vpop.f32.mrf.mxu1  ;;  %v2652_v29 = vadd.f32 %v4766_v36, %v2608_v48 }
 0xaba   :  { %2825 = vmatpush.bf16.msra.mxu2 %v3410_v52 }
 0xabb   :  { %v3577_v55 = vpop.eup %3576 }
 0xabc   :  { %v3579_v31 = vpop.eup %3578  ;;  %v2620_v1 = vadd.f32 1.0, %v3577_v55 }
 0xabd   :  { %v2621_v57 = vadd.f32 1.0, %v3579_v31 }
 0xabe   :  { %3580 = vrcp.f32 %v2620_v1  ;;  %v2633_v18 = vand.u32 2147483648, %v2620_v1  ;;  %v2631_v21 = vand.u32 2147483647, %v2620_v1  ;;  %vm2627_vm1 = vweird.f32 %v2620_v1 }
 0xabf   :  { %3582 = vrcp.f32 %v2621_v57  ;;  %v2610_v38 = vpop.f32.mrf.mxu2  ;;  %v2648_v47 = vand.u32 2147483648, %v2621_v57  ;;  %vm2642_vm5 = vweird.f32 %v2621_v57  ;;  %v2646_v25 = vand.u32 2147483647, %v2621_v57 }
 0xac0   :  { %v2634_v12 = vor.u32 1.1754944e-38, %v2633_v18  ;;  %vm2632_vm3 = vcmp.eq.f32.partialorder %v2631_v21, 8.507059e+37 }
 0xac1   :  { %v2649_v22 = vor.u32 1.1754944e-38, %v2648_v47  ;;  %vm2647_vm7 = vcmp.eq.f32.partialorder %v2646_v25, 8.507059e+37 }
 0xac4   :  { %v3581_v58 = vpop.eup %3580 }
 0xac5   :  { %v3583_v13 = vpop.eup %3582  ;;  %v2623_v56 = vmul.f32 %v3581_v58, %v2620_v1  ;;  %vm2628_vm0 = vweird.f32 %v3581_v58 }
 0xac6   :  { %v2638_v9 = vmul.f32 %v3583_v13, %v2621_v57  ;;  %vm2629_vm2 = vmor %vm2627_vm1, %vm2628_vm0  ;;  %vm2643_vm4 = vweird.f32 %v3583_v13 }
 0xac7   :  { %v2624_v53 = vsub.f32 1.0, %v2623_v56  ;;  %vm2644_vm6 = vmor %vm2642_vm5, %vm2643_vm4  ;;  %v3597_v56 = vld [vmem:[%s4978_s8] ss:$0 sm:$0xff] }
 0xac8   :  { %v2639_v49 = vsub.f32 1.0, %v2638_v9 }
 0xac9   :  { %v2625_v19 = vmul.f32 %v3581_v58, %v2624_v53 }
 0xaca   :  { %v2640_v0 = vmul.f32 %v3583_v13, %v2639_v49 }
 0xacb   :  { %v2626_v20 = vadd.f32 %v3581_v58, %v2625_v19  ;;  %v1858_v19 = vadd.f32 %v4759_v41, %v4769_v40  ;;  %v3435_v40 = vld [vmem:[%s4980_s10] ss:$0 sm:$0xff] }
 0xacc   :  { %v2641_v37 = vadd.f32 %v3583_v13, %v2640_v0 }
 0xacd   :  { %v2630_v14 = vsel %vm2629_vm2, %v3581_v58, %v2626_v20 }
 0xace   :  { %v2635_v5 = vsel %vm2632_vm3, %v2634_v12, %v2630_v14  ;;  %v2645_v50 = vsel %vm2644_vm6, %v3583_v13, %v2641_v37 }
 0xacf   :  { %v2653_v59 = vmul.f32 %v2652_v29, %v2635_v5  ;;  %v2650_v36 = vsel %vm2647_vm7, %v2649_v22, %v2645_v50 }
 0xad1   :  { %v2654_v28 = vadd.f32 %v2653_v59, %v1721_v24 }
 0xad3   :  { %3584 = vtanh.f32 %v2654_v28 }
 0xad9   :  { %v3585_v32 = vpop.eup %3584 }
 0xada   :  { %v2656_v2 = vsub.f32 %v2568_v62, %v3585_v32 }
 0xadc   :  { %v2657_v51 = vmul.f32 %v2656_v2, %v2650_v36 }
 0xade   :  { %v4950_v27 = vadd.f32 %v3585_v32, %v2657_v51 }
 0xae0   :  { %v2662_v16 = vpack.c.bf16 %v4950_v27, %v4950_v27 }
 0xae2   :  { %2671 = vmatmul.bf16.vlgmr.msra.gmra.mxu3 %v2662_v16  ;;  %2684 = vmatmul.bf16.vlgmr.msra.gmra.mxu0 %v2662_v16 }
 0xae3   :  { %2697 = vmatmul.bf16.vlgmr.msra.gmra.mxu1 %v2662_v16 }
 0xb5f   :  { %v2685_v11 = vpop.f32.mrf.mxu0 }
 0xb60   :  { %v2703_v17 = vadd.f32 %v2685_v11, %v1845_v54  ;;  %v2698_v23 = vpop.f32.mrf.mxu1 }
 0xb61   :  { %v2742_v53 = vadd.f32 %v3597_v56, %v2698_v23 }
 0xb62   :  { %v3281_v45 = vmul.f32 -1.442695, %v2703_v17 }
 0xb64   :  { %3586 = vpow2.f32 %v3281_v45 }
 0xb65   :  { %v2672_v26 = vpop.f32.mrf.mxu3 }
 0xb66   :  { %v2702_v62 = vadd.f32 %v2672_v26, %v1832_v44 }
 0xb67   :  { %v2687_v10 = vpop.f32.mrf.mxu0 }
 0xb68   :  { %v3280_v15 = vmul.f32 -1.442695, %v2702_v62  ;;  %v2700_v35 = vpop.f32.mrf.mxu1 }
 0xb6a   :  { %3588 = vpow2.f32 %v3280_v15  ;;  %v3587_v61 = vpop.eup %3586 }
 0xb6b   :  { %v2711_v6 = vadd.f32 1.0, %v3587_v61 }
 0xb6d   :  { %v2674_v63 = vpop.f32.mrf.mxu3  ;;  %v2738_v14 = vand.u32 2147483648, %v2711_v6  ;;  %vm2732_vm13 = vweird.f32 %v2711_v6  ;;  %v2736_v29 = vand.u32 2147483647, %v2711_v6 }
 0xb6f   :  { %v2739_v59 = vor.u32 1.1754944e-38, %v2738_v14  ;;  %vm2737_vm15 = vcmp.eq.f32.partialorder %v2736_v29, 8.507059e+37 }
 0xb70   :  { %v3589_v43 = vpop.eup %3588 }
 0xb71   :  { %v2710_v60 = vadd.f32 1.0, %v3589_v43 }
 0xb73   :  { %3590 = vrcp.f32 %v2710_v60  ;;  %v2723_v31 = vand.u32 2147483648, %v2710_v60  ;;  %v2721_v57 = vand.u32 2147483647, %v2710_v60  ;;  %vm2717_vm9 = vweird.f32 %v2710_v60 }
 0xb74   :  { %3592 = vrcp.f32 %v2711_v6 }
 0xb75   :  { %v2724_v13 = vor.u32 1.1754944e-38, %v2723_v31  ;;  %vm2722_vm11 = vcmp.eq.f32.partialorder %v2721_v57, 8.507059e+37 }
 0xb79   :  { %v3591_v3 = vpop.eup %3590 }
 0xb7a   :  { %v3593_v48 = vpop.eup %3592  ;;  %v2713_v30 = vmul.f32 %v3591_v3, %v2710_v60  ;;  %vm2718_vm8 = vweird.f32 %v3591_v3 }
 0xb7b   :  { %v2728_v55 = vmul.f32 %v3593_v48, %v2711_v6  ;;  %vm2719_vm10 = vmor %vm2717_vm9, %vm2718_vm8  ;;  %vm2733_vm12 = vweird.f32 %v3593_v48 }
 0xb7c   :  { %v2714_v46 = vsub.f32 1.0, %v2713_v30  ;;  %vm2734_vm14 = vmor %vm2732_vm13, %vm2733_vm12 }
 0xb7d   :  { %v2729_v58 = vsub.f32 1.0, %v2728_v55 }
 0xb7e   :  { %v2715_v1 = vmul.f32 %v3591_v3, %v2714_v46 }
 0xb7f   :  { %v2730_v20 = vmul.f32 %v3593_v48, %v2729_v58 }
 0xb80   :  { %v2716_v38 = vadd.f32 %v3591_v3, %v2715_v1 }
 0xb81   :  { %v2731_v12 = vadd.f32 %v3593_v48, %v2730_v20 }
 0xb82   :  { %v2720_v9 = vsel %vm2719_vm10, %v3591_v3, %v2716_v38 }
 0xb83   :  { %v2725_v18 = vsel %vm2722_vm11, %v2724_v13, %v2720_v9  ;;  %v2735_v5 = vsel %vm2734_vm14, %v3593_v48, %v2731_v12 }
 0xb84   :  { %v2743_v21 = vmul.f32 %v2742_v53, %v2725_v18  ;;  %v2740_v28 = vsel %vm2737_vm15, %v2739_v59, %v2735_v5 }
 0xb86   :  { %v2744_v49 = vadd.f32 %v2743_v21, %v1858_v19 }
 0xb88   :  { %3594 = vtanh.f32 %v2744_v49 }
 0xb8e   :  { %v3595_v24 = vpop.eup %3594 }
 0xb8f   :  { %v2746_v0 = vsub.f32 %v4950_v27, %v3595_v24 }
 0xb91   :  { %v2747_v37 = vmul.f32 %v2746_v0, %v2740_v28 }
 0xb93   :  { %v2748_v47 = vadd.f32 %v3595_v24, %v2747_v37 }
 0xb95   :  { %v2749_v41 = vpack.c.bf16 %v2748_v47, %v2748_v47 }
 0xb97   :  { %2826 = vmatmul.bf16.vlgmr.msra.gmra.mxu2 %v2749_v41 }
 0xc1a   :  { %v2827_v25 = vpop.f32.mrf.mxu2 }
 0xc1b   :  { %v2828_v50 = vadd.f32 %v3435_v40, %v2827_v25 }
 0xc1d   :  { %2831 = vst [vmem:[#allocation16] sm:$0xff] %v2828_v50 }
 0xc1e   :  { %2842 = dma.vmem_to_hbm [thread:$0]  %s2838_s20, 128, %s2840_s22, [#allocation6]  }
 0xc22   :  { %v2829_v32 = vpop.f32.mrf.mxu2 }
 0xc23   :  { %3798 = dma.done.wait [#allocation6], 128  }
 0xc24   :  { %3799 = vsyncadd [#allocation6], 4294967168 }
 0xc25   :  { %2847 = vsyncpa [#allocation5], 1 }
 0xc26   :  { %2848 = vsyncpa [#allocation8], 1 }
 0xc27   :  { %2849 = vsyncpa [#allocation11], 1 }
 0xc28   :  { %2850 = vsyncpa [#allocation14], 1 }
 0xc29   :  { %2851 = vsyncpa [#allocation6], 1 }

</bundles_post_ra>
